<compile_context>
chip_gen: v6e
topology: v6e:2x2x1
jax: 0.10.0
libtpu: 0.0.40
codegen_flags: <defaults>
</compile_context>

<pallas_src>
import jax
import jax.numpy as jnp
from jax import lax
from jax.experimental import pallas as pl
from jax.experimental.pallas import tpu as pltpu

LANES = 128  # lane width used for the MLP (120/84/10 outputs padded to 128)


def _round_up(x, m):
    return ((x + m - 1) // m) * m


def _row_tile(rows, target=512):
    """Row-tile size: <= target, multiple of 8 (or full extent when tiny), and
    when the row count allows it, >= 2 grid blocks so v7x's two TensorCores
    both get work under dimension_semantics=("parallel",)."""
    if rows <= 16:
        return rows                       # full-extent block (legal)
    half = _round_up((rows + 1) // 2, 8)  # aim for at least 2 blocks
    return max(8, min(target, half))


# ---------------------------------------------------------------------------
# Pallas kernels
# ---------------------------------------------------------------------------
def _conv_relu_pool_kernel(q_ref, w_ref, b_ref, o_ref):
    """Fused conv-as-matmul + 2x2/2 max-pool + bias + ReLU over a tile of rows.

    q_ref: (4, TM, Kraw) bf16 -- the four pool-window members of the same TM
           pooled output positions (rows span several images).
    w_ref: (Kraw, Cout) bf16, b_ref: (1, Cout) f32, o_ref: (TM, Cout) bf16.
    max / bias / ReLU commute (same bias for every window member), so pooling
    is a running max over four long-M dots sharing one resident RHS.
    """
    w = w_ref[...]
    y = jnp.dot(q_ref[0], w, preferred_element_type=jnp.float32)
    y = jnp.maximum(y, jnp.dot(q_ref[1], w, preferred_element_type=jnp.float32))
    y = jnp.maximum(y, jnp.dot(q_ref[2], w, preferred_element_type=jnp.float32))
    y = jnp.maximum(y, jnp.dot(q_ref[3], w, preferred_element_type=jnp.float32))
    o_ref[...] = jnp.maximum(y + b_ref[...], 0.0).astype(o_ref.dtype)


def _mlp_kernel(x_ref, w1_ref, b1_ref, w2_ref, b2_ref, w3_ref, b3_ref, o_ref):
    """fc1+ReLU -> fc2+ReLU -> fc3, one launch, no HBM round trips for the
    (N,120)/(N,84) intermediates."""
    h = jnp.dot(x_ref[...], w1_ref[...], preferred_element_type=jnp.float32)
    h = jnp.maximum(h + b1_ref[...], 0.0).astype(jnp.bfloat16)
    h = jnp.dot(h, w2_ref[...], preferred_element_type=jnp.float32)
    h = jnp.maximum(h + b2_ref[...], 0.0).astype(jnp.bfloat16)
    h = jnp.dot(h, w3_ref[...], preferred_element_type=jnp.float32)
    o_ref[...] = (h + b3_ref[...]).astype(o_ref.dtype)


# ---------------------------------------------------------------------------
# Wrappers (pallas_call with grids / BlockSpecs)
# ---------------------------------------------------------------------------
def conv_relu_pool(x_nhwc, w_mat, b_vec, ksize):
    """x: (N,H,W,Cin) bf16; w_mat: (Cin*K*K, Cout) bf16 in patch-feature order;
    b_vec: (1, Cout) f32.  Returns (N, Hp, Wp, Cout) bf16 where
    Hp = (H-K+1)//2, Wp = (W-K+1)//2 (valid conv, ReLU, 2x2/2 max-pool)."""
    N, H, W, Cin = x_nhwc.shape
    K = ksize
    Ho, Wo = H - K + 1, W - K + 1
    Hp, Wp = Ho // 2, Wo // 2
    Kraw, Cout = w_mat.shape
    R = N * Hp * Wp

    # im2col as one fused XLA op; K stays un-padded (Kraw = Cin*K*K).
    patches = lax.conv_general_dilated_patches(
        x_nhwc, filter_shape=(K, K), window_strides=(1, 1), padding="VALID",
        dimension_numbers=("NHWC", "HWIO", "NHWC")).astype(jnp.bfloat16)
    # Quad-major stacking: quads[q, n*Hp*Wp + hp*Wp + wp, :] is the patch at
    # conv position (2hp+di, 2wp+dj) with q = 2*di + dj.  One array, one DMA
    # per grid step, pool-max done in-kernel on the f32 dot results.
    quads = patches.reshape(N, Hp, 2, Wp, 2, Kraw)
    quads = jnp.transpose(quads, (2, 4, 0, 1, 3, 5)).reshape(4, R, Kraw)

    TM = _row_tile(R)
    out = pl.pallas_call(
        _conv_relu_pool_kernel,
        out_shape=jax.ShapeDtypeStruct((R, Cout), jnp.bfloat16),
        grid=(pl.cdiv(R, TM),),
        in_specs=[
            pl.BlockSpec((4, TM, Kraw), lambda i: (0, i, 0)),
            pl.BlockSpec((Kraw, Cout), lambda i: (0, 0)),
            pl.BlockSpec((1, Cout), lambda i: (0, 0)),
        ],
        out_specs=pl.BlockSpec((TM, Cout), lambda i: (i, 0)),
        compiler_params=pltpu.CompilerParams(
            dimension_semantics=("parallel",)),
    )(quads, w_mat, b_vec)
    return out.reshape(N, Hp, Wp, Cout)


def mlp_head(x, w1, b1, w2, b2, w3, b3):
    """x: (N, 400) bf16 -> (N, 128) f32 (logical logits in cols [:10])."""
    N, Kin = x.shape
    TM = _row_tile(N)
    full = lambda i: (0, 0)
    return pl.pallas_call(
        _mlp_kernel,
        out_shape=jax.ShapeDtypeStruct((N, LANES), jnp.float32),
        grid=(pl.cdiv(N, TM),),
        in_specs=[
            pl.BlockSpec((TM, Kin), lambda i: (i, 0)),
            pl.BlockSpec(w1.shape, full), pl.BlockSpec(b1.shape, full),
            pl.BlockSpec(w2.shape, full), pl.BlockSpec(b2.shape, full),
            pl.BlockSpec(w3.shape, full), pl.BlockSpec(b3.shape, full),
        ],
        out_specs=pl.BlockSpec((TM, LANES), lambda i: (i, 0)),
        compiler_params=pltpu.CompilerParams(
            dimension_semantics=("parallel",)),
    )(x, w1, b1, w2, b2, w3, b3)


# ---------------------------------------------------------------------------
# Parameters: PyTorch-style init, then one-time repack for the TPU kernels
# ---------------------------------------------------------------------------
def init_params(key):
    ks = jax.random.split(key, 10)

    def u(k, shape, fan_in):
        bound = 1.0 / jnp.sqrt(fan_in)
        return jax.random.uniform(k, shape, jnp.float32, -bound, bound)

    return {
        "conv1_w": u(ks[0], (6, 3, 5, 5), 3 * 5 * 5),
        "conv1_b": u(ks[1], (6,), 3 * 5 * 5),
        "conv2_w": u(ks[2], (16, 6, 5, 5), 6 * 5 * 5),
        "conv2_b": u(ks[3], (16,), 6 * 5 * 5),
        "fc1_w": u(ks[4], (120, 400), 400),
        "fc1_b": u(ks[5], (120,), 400),
        "fc2_w": u(ks[6], (84, 120), 120),
        "fc2_b": u(ks[7], (84,), 120),
        "fc3_w": u(ks[8], (10, 84), 84),
        "fc3_b": u(ks[9], (10,), 84),
    }


def _pad_to(a, shape):
    return jnp.pad(a, [(0, t - s) for s, t in zip(a.shape, shape)])


def _patch_perm(cin, k):
    """perm[f] = PyTorch (ci,ki,kj) flat index stored at patch-feature f.
    Self-calibrates the conv_general_dilated_patches feature ordering."""
    probe = jnp.arange(cin * k * k, dtype=jnp.float32).reshape(cin, k, k)
    probe = jnp.transpose(probe, (1, 2, 0))[None]            # (1,k,k,cin) NHWC
    feat = lax.conv_general_dilated_patches(
        probe, filter_shape=(k, k), window_strides=(1, 1), padding="VALID",
        dimension_numbers=("NHWC", "HWIO", "NHWC"))
    return feat.reshape(cin * k * k).astype(jnp.int32)


def prepare_params(p):
    """One-time repack: transposed, permuted to patch-feature order, bf16
    weights + f32 biases.  Conv weights keep K=Kraw (no 128-pad); conv output
    channels stay narrow (8 / 16); MLP outputs padded to 128 lanes."""
    out = {}
    # conv1: (6,3,5,5) -> (75,6) in patch order -> pad out-channels to 8.
    perm1 = _patch_perm(3, 5)
    w = p["conv1_w"].reshape(6, 75)[:, perm1].T                       # (75, 6)
    out["conv1_w"] = _pad_to(w, (75, 8)).astype(jnp.bfloat16)
    out["conv1_b"] = _pad_to(p["conv1_b"].reshape(1, 6), (1, 8)).astype(jnp.float32)
    # conv2: (16,6,5,5) -> (150,16) in patch order (no padding at all).
    perm2 = _patch_perm(6, 5)
    out["conv2_w"] = p["conv2_w"].reshape(16, 150)[:, perm2].T.astype(jnp.bfloat16)
    out["conv2_b"] = p["conv2_b"].reshape(1, 16).astype(jnp.float32)
    # fc1: PyTorch flattens NCHW (c,h,w); our activation flatten is (h,w,c=16).
    w = p["fc1_w"].reshape(120, 16, 5, 5)            # (j, c, h, w)
    w = jnp.transpose(w, (2, 3, 1, 0)).reshape(400, 120)
    out["fc1_w"] = _pad_to(w, (400, LANES)).astype(jnp.bfloat16)
    out["fc1_b"] = _pad_to(p["fc1_b"].reshape(1, 120), (1, LANES)).astype(jnp.float32)
    # fc2 / fc3: transpose once, pad to (128,128) / 128 lanes.
    out["fc2_w"] = _pad_to(p["fc2_w"].T, (LANES, LANES)).astype(jnp.bfloat16)
    out["fc2_b"] = _pad_to(p["fc2_b"].reshape(1, 84), (1, LANES)).astype(jnp.float32)
    out["fc3_w"] = _pad_to(p["fc3_w"].T, (LANES, LANES)).astype(jnp.bfloat16)
    out["fc3_b"] = _pad_to(p["fc3_b"].reshape(1, 10), (1, LANES)).astype(jnp.float32)
    return out


# ---------------------------------------------------------------------------
# Forward pass
# ---------------------------------------------------------------------------
def net_forward(params, x):
    """x: (N, 3, 32, 32) f32 NCHW (PyTorch layout).  Returns (N, 10) f32."""
    N = x.shape[0]
    # Single layout change + cast at the boundary; NHWC / bf16 thereafter.
    h = jnp.transpose(x, (0, 2, 3, 1)).astype(jnp.bfloat16)            # (N,32,32,3)
    h = conv_relu_pool(h, params["conv1_w"], params["conv1_b"], 5)     # (N,14,14,8)
    h = conv_relu_pool(h[..., :6],                                     # logical 6 ch
                       params["conv2_w"], params["conv2_b"], 5)        # (N,5,5,16)
    h = h.reshape(N, 5 * 5 * 16)                                       # (N,400)
    out = mlp_head(h, params["fc1_w"], params["fc1_b"],
                   params["fc2_w"], params["fc2_b"],
                   params["fc3_w"], params["fc3_b"])                   # (N,128)
    return out[:, :10].astype(jnp.float32)


def reference_forward(p, x):
    """Pure-XLA f32 reference (semantics of the PyTorch module)."""
    dn = ("NCHW", "OIHW", "NCHW")

    def conv(h, w, b):
        y = lax.conv_general_dilated(h, w, (1, 1), "VALID", dimension_numbers=dn)
        return jnp.maximum(y + b.reshape(1, -1, 1, 1), 0.0)

    def pool(h):
        n, c, hh, ww = h.shape
        return h.reshape(n, c, hh // 2, 2, ww // 2, 2).max(axis=(3, 5))

    h = pool(conv(x, p["conv1_w"], p["conv1_b"]))
    h = pool(conv(h, p["conv2_w"], p["conv2_b"]))
    h = h.reshape(h.shape[0], -1)
    h = jnp.maximum(h @ p["fc1_w"].T + p["fc1_b"], 0.0)
    h = jnp.maximum(h @ p["fc2_w"].T + p["fc2_b"], 0.0)
    return h @ p["fc3_w"].T + p["fc3_b"]


if __name__ == "__main__":
    key = jax.random.PRNGKey(0)
    pkey, xkey = jax.random.split(key)
    raw_params = init_params(pkey)
    params = prepare_params(raw_params)
    # CIFAR-10-shaped input: spatial must be 32x32 so the flatten is 16*5*5.
    x = jax.random.normal(xkey, (4, 3, 32, 32), dtype=jnp.float32)

    out = jax.block_until_ready(jax.jit(net_forward)(params, x))

    assert out.shape == (4, 10), out.shape
    assert out.dtype == jnp.float32
    assert bool(jnp.all(jnp.isfinite(out)))

    # Correctness vs a pure-XLA f32 reference (bf16 MXU inputs -> loose tol).
    ref = jax.block_until_ready(jax.jit(reference_forward)(raw_params, x))
    err = float(jnp.max(jnp.abs(out - ref)))
    assert err < 5e-2, f"mismatch vs reference: max abs err = {err}"

    print("KERNEL_OK")
</pallas_src>

<mosaic_0001>
module attributes {stable_mosaic.version = 11 : i64} {
  func.func @_conv_relu_pool_kernel(%arg0: i32, %arg1: memref<4x392x75xbf16, #tpu.memory_space<vmem>>, %arg2: memref<75x8xbf16, #tpu.memory_space<vmem>>, %arg3: memref<1x8xf32, #tpu.memory_space<vmem>>, %arg4: memref<392x8xbf16, #tpu.memory_space<vmem>>) attributes {dimension_semantics = [#tpu.dimension_semantics<parallel>], iteration_bounds = array<i64: 2>, scalar_prefetch = 0 : i64, scratch_operands = 0 : i64, tpu.core_type = #tpu.core_type<tc>, window_params = [{transform_indices = @transform_0, window_bounds = array<i64: 4, 392, 75>}, {pipeline_mode = #tpu.pipeline_mode<synchronous>, transform_indices = @transform_1, window_bounds = array<i64: 75, 8>}, {pipeline_mode = #tpu.pipeline_mode<synchronous>, transform_indices = @transform_2, window_bounds = array<i64: 1, 8>}, {transform_indices = @transform_3, window_bounds = array<i64: 392, 8>}]} {
    %c0 = arith.constant 0 : index
    %c0_0 = arith.constant 0 : index
    %0 = vector.load %arg2[%c0, %c0_0] : memref<75x8xbf16, #tpu.memory_space<vmem>>, vector<75x8xbf16>
    %c0_1 = arith.constant 0 : index
    %c0_2 = arith.constant 0 : index
    %c0_3 = arith.constant 0 : index
    %1 = vector.load %arg1[%c0_1, %c0_2, %c0_3] : memref<4x392x75xbf16, #tpu.memory_space<vmem>>, vector<1x392x75xbf16>
    %2 = vector.shape_cast %1 : vector<1x392x75xbf16> to vector<392x75xbf16>
    %cst = arith.constant dense<0.000000e+00> : vector<392x8xf32>
    %3 = tpu.matmul %2, %0, %cst {dimension_numbers = #tpu.dot_dimension_numbers<[1], [0], [0], [1], [0, 0, 1, 1], [], []>} : vector<392x75xbf16>, vector<75x8xbf16>, vector<392x8xf32> -> vector<392x8xf32>
    %c1 = arith.constant 1 : index
    %c0_4 = arith.constant 0 : index
    %c0_5 = arith.constant 0 : index
    %4 = vector.load %arg1[%c1, %c0_4, %c0_5] : memref<4x392x75xbf16, #tpu.memory_space<vmem>>, vector<1x392x75xbf16>
    %5 = vector.shape_cast %4 : vector<1x392x75xbf16> to vector<392x75xbf16>
    %cst_6 = arith.constant dense<0.000000e+00> : vector<392x8xf32>
    %6 = tpu.matmul %5, %0, %cst_6 {dimension_numbers = #tpu.dot_dimension_numbers<[1], [0], [0], [1], [0, 0, 1, 1], [], []>} : vector<392x75xbf16>, vector<75x8xbf16>, vector<392x8xf32> -> vector<392x8xf32>
    %7 = arith.maximumf %3, %6 : vector<392x8xf32>
    %c2 = arith.constant 2 : index
    %c0_7 = arith.constant 0 : index
    %c0_8 = arith.constant 0 : index
    %8 = vector.load %arg1[%c2, %c0_7, %c0_8] : memref<4x392x75xbf16, #tpu.memory_space<vmem>>, vector<1x392x75xbf16>
    %9 = vector.shape_cast %8 : vector<1x392x75xbf16> to vector<392x75xbf16>
    %cst_9 = arith.constant dense<0.000000e+00> : vector<392x8xf32>
    %10 = tpu.matmul %9, %0, %cst_9 {dimension_numbers = #tpu.dot_dimension_numbers<[1], [0], [0], [1], [0, 0, 1, 1], [], []>} : vector<392x75xbf16>, vector<75x8xbf16>, vector<392x8xf32> -> vector<392x8xf32>
    %11 = arith.maximumf %7, %10 : vector<392x8xf32>
    %c3 = arith.constant 3 : index
    %c0_10 = arith.constant 0 : index
    %c0_11 = arith.constant 0 : index
    %12 = vector.load %arg1[%c3, %c0_10, %c0_11] : memref<4x392x75xbf16, #tpu.memory_space<vmem>>, vector<1x392x75xbf16>
    %13 = vector.shape_cast %12 : vector<1x392x75xbf16> to vector<392x75xbf16>
    %cst_12 = arith.constant dense<0.000000e+00> : vector<392x8xf32>
    %14 = tpu.matmul %13, %0, %cst_12 {dimension_numbers = #tpu.dot_dimension_numbers<[1], [0], [0], [1], [0, 0, 1, 1], [], []>} : vector<392x75xbf16>, vector<75x8xbf16>, vector<392x8xf32> -> vector<392x8xf32>
    %15 = arith.maximumf %11, %14 : vector<392x8xf32>
    %c0_13 = arith.constant 0 : index
    %c0_14 = arith.constant 0 : index
    %16 = vector.load %arg3[%c0_13, %c0_14] : memref<1x8xf32, #tpu.memory_space<vmem>>, vector<1x8xf32>
    %17 = vector.broadcast %16 : vector<1x8xf32> to vector<392x8xf32>
    %18 = arith.addf %15, %17 : vector<392x8xf32>
    %cst_15 = arith.constant 0.000000e+00 : f32
    %19 = vector.broadcast %cst_15 : f32 to vector<392x8xf32>
    %20 = arith.maximumf %18, %19 : vector<392x8xf32>
    %21 = arith.truncf %20 : vector<392x8xf32> to vector<392x8xbf16>
    %c0_16 = arith.constant 0 : index
    %c0_17 = arith.constant 0 : index
    %22 = vector.load %arg4[%c0_16, %c0_17] : memref<392x8xbf16, #tpu.memory_space<vmem>>, vector<392x8xbf16>
    tpu.vector_store %arg4[%c0_16, %c0_17], %21 {strides = array<i32>} : memref<392x8xbf16, #tpu.memory_space<vmem>>, vector<392x8xbf16>,
    return
  }
  func.func @transform_0(%arg0: i32) -> (i32, i32, i32) {
    %c0_i32 = arith.constant 0 : i32
    %c0_i32_0 = arith.constant 0 : i32
    %c0_i32_1 = arith.constant 0 : i32
    return %c0_i32, %arg0, %c0_i32_0 : i32, i32, i32
  }
  func.func @transform_1(%arg0: i32) -> (i32, i32) {
    %c0_i32 = arith.constant 0 : i32
    %c0_i32_0 = arith.constant 0 : i32
    %c0_i32_1 = arith.constant 0 : i32
    return %c0_i32, %c0_i32_0 : i32, i32
  }
  func.func @transform_2(%arg0: i32) -> (i32, i32) {
    %c0_i32 = arith.constant 0 : i32
    %c0_i32_0 = arith.constant 0 : i32
    %c0_i32_1 = arith.constant 0 : i32
    return %c0_i32, %c0_i32_0 : i32, i32
  }
  func.func @transform_3(%arg0: i32) -> (i32, i32) {
    %c0_i32 = arith.constant 0 : i32
    %c0_i32_0 = arith.constant 0 : i32
    return %arg0, %c0_i32 : i32, i32
  }
}

module attributes {stable_mosaic.version = 11 : i64} {
  func.func @_conv_relu_pool_kernel(%arg0: i32, %arg1: memref<4x56x150xbf16, #tpu.memory_space<vmem>>, %arg2: memref<150x16xbf16, #tpu.memory_space<vmem>>, %arg3: memref<1x16xf32, #tpu.memory_space<vmem>>, %arg4: memref<56x16xbf16, #tpu.memory_space<vmem>>) attributes {dimension_semantics = [#tpu.dimension_semantics<parallel>], iteration_bounds = array<i64: 2>, scalar_prefetch = 0 : i64, scratch_operands = 0 : i64, tpu.core_type = #tpu.core_type<tc>, window_params = [{transform_indices = @transform_0, window_bounds = array<i64: 4, 56, 150>}, {pipeline_mode = #tpu.pipeline_mode<synchronous>, transform_indices = @transform_1, window_bounds = array<i64: 150, 16>}, {pipeline_mode = #tpu.pipeline_mode<synchronous>, transform_indices = @transform_2, window_bounds = array<i64: 1, 16>}, {transform_indices = @transform_3, window_bounds = array<i64: 56, 16>}]} {
    %c0 = arith.constant 0 : index
    %c0_0 = arith.constant 0 : index
    %0 = vector.load %arg2[%c0, %c0_0] : memref<150x16xbf16, #tpu.memory_space<vmem>>, vector<150x16xbf16>
    %c0_1 = arith.constant 0 : index
    %c0_2 = arith.constant 0 : index
    %c0_3 = arith.constant 0 : index
    %1 = vector.load %arg1[%c0_1, %c0_2, %c0_3] : memref<4x56x150xbf16, #tpu.memory_space<vmem>>, vector<1x56x150xbf16>
    %2 = vector.shape_cast %1 : vector<1x56x150xbf16> to vector<56x150xbf16>
    %cst = arith.constant dense<0.000000e+00> : vector<56x16xf32>
    %3 = tpu.matmul %2, %0, %cst {dimension_numbers = #tpu.dot_dimension_numbers<[1], [0], [0], [1], [0, 0, 1, 1], [], []>} : vector<56x150xbf16>, vector<150x16xbf16>, vector<56x16xf32> -> vector<56x16xf32>
    %c1 = arith.constant 1 : index
    %c0_4 = arith.constant 0 : index
    %c0_5 = arith.constant 0 : index
    %4 = vector.load %arg1[%c1, %c0_4, %c0_5] : memref<4x56x150xbf16, #tpu.memory_space<vmem>>, vector<1x56x150xbf16>
    %5 = vector.shape_cast %4 : vector<1x56x150xbf16> to vector<56x150xbf16>
    %cst_6 = arith.constant dense<0.000000e+00> : vector<56x16xf32>
    %6 = tpu.matmul %5, %0, %cst_6 {dimension_numbers = #tpu.dot_dimension_numbers<[1], [0], [0], [1], [0, 0, 1, 1], [], []>} : vector<56x150xbf16>, vector<150x16xbf16>, vector<56x16xf32> -> vector<56x16xf32>
    %7 = arith.maximumf %3, %6 : vector<56x16xf32>
    %c2 = arith.constant 2 : index
    %c0_7 = arith.constant 0 : index
    %c0_8 = arith.constant 0 : index
    %8 = vector.load %arg1[%c2, %c0_7, %c0_8] : memref<4x56x150xbf16, #tpu.memory_space<vmem>>, vector<1x56x150xbf16>
    %9 = vector.shape_cast %8 : vector<1x56x150xbf16> to vector<56x150xbf16>
    %cst_9 = arith.constant dense<0.000000e+00> : vector<56x16xf32>
    %10 = tpu.matmul %9, %0, %cst_9 {dimension_numbers = #tpu.dot_dimension_numbers<[1], [0], [0], [1], [0, 0, 1, 1], [], []>} : vector<56x150xbf16>, vector<150x16xbf16>, vector<56x16xf32> -> vector<56x16xf32>
    %11 = arith.maximumf %7, %10 : vector<56x16xf32>
    %c3 = arith.constant 3 : index
    %c0_10 = arith.constant 0 : index
    %c0_11 = arith.constant 0 : index
    %12 = vector.load %arg1[%c3, %c0_10, %c0_11] : memref<4x56x150xbf16, #tpu.memory_space<vmem>>, vector<1x56x150xbf16>
    %13 = vector.shape_cast %12 : vector<1x56x150xbf16> to vector<56x150xbf16>
    %cst_12 = arith.constant dense<0.000000e+00> : vector<56x16xf32>
    %14 = tpu.matmul %13, %0, %cst_12 {dimension_numbers = #tpu.dot_dimension_numbers<[1], [0], [0], [1], [0, 0, 1, 1], [], []>} : vector<56x150xbf16>, vector<150x16xbf16>, vector<56x16xf32> -> vector<56x16xf32>
    %15 = arith.maximumf %11, %14 : vector<56x16xf32>
    %c0_13 = arith.constant 0 : index
    %c0_14 = arith.constant 0 : index
    %16 = vector.load %arg3[%c0_13, %c0_14] : memref<1x16xf32, #tpu.memory_space<vmem>>, vector<1x16xf32>
    %17 = vector.broadcast %16 : vector<1x16xf32> to vector<56x16xf32>
    %18 = arith.addf %15, %17 : vector<56x16xf32>
    %cst_15 = arith.constant 0.000000e+00 : f32
    %19 = vector.broadcast %cst_15 : f32 to vector<56x16xf32>
    %20 = arith.maximumf %18, %19 : vector<56x16xf32>
    %21 = arith.truncf %20 : vector<56x16xf32> to vector<56x16xbf16>
    %c0_16 = arith.constant 0 : index
    %c0_17 = arith.constant 0 : index
    %22 = vector.load %arg4[%c0_16, %c0_17] : memref<56x16xbf16, #tpu.memory_space<vmem>>, vector<56x16xbf16>
    tpu.vector_store %arg4[%c0_16, %c0_17], %21 {strides = array<i32>} : memref<56x16xbf16, #tpu.memory_space<vmem>>, vector<56x16xbf16>,
    return
  }
  func.func @transform_0(%arg0: i32) -> (i32, i32, i32) {
    %c0_i32 = arith.constant 0 : i32
    %c0_i32_0 = arith.constant 0 : i32
    %c0_i32_1 = arith.constant 0 : i32
    return %c0_i32, %arg0, %c0_i32_0 : i32, i32, i32
  }
  func.func @transform_1(%arg0: i32) -> (i32, i32) {
    %c0_i32 = arith.constant 0 : i32
    %c0_i32_0 = arith.constant 0 : i32
    %c0_i32_1 = arith.constant 0 : i32
    return %c0_i32, %c0_i32_0 : i32, i32
  }
  func.func @transform_2(%arg0: i32) -> (i32, i32) {
    %c0_i32 = arith.constant 0 : i32
    %c0_i32_0 = arith.constant 0 : i32
    %c0_i32_1 = arith.constant 0 : i32
    return %c0_i32, %c0_i32_0 : i32, i32
  }
  func.func @transform_3(%arg0: i32) -> (i32, i32) {
    %c0_i32 = arith.constant 0 : i32
    %c0_i32_0 = arith.constant 0 : i32
    return %arg0, %c0_i32 : i32, i32
  }
}

module attributes {stable_mosaic.version = 11 : i64} {
  func.func @_mlp_kernel(%arg0: i32, %arg1: memref<4x400xbf16, #tpu.memory_space<vmem>>, %arg2: memref<400x128xbf16, #tpu.memory_space<vmem>>, %arg3: memref<1x128xf32, #tpu.memory_space<vmem>>, %arg4: memref<128x128xbf16, #tpu.memory_space<vmem>>, %arg5: memref<1x128xf32, #tpu.memory_space<vmem>>, %arg6: memref<128x128xbf16, #tpu.memory_space<vmem>>, %arg7: memref<1x128xf32, #tpu.memory_space<vmem>>, %arg8: memref<4x128xf32, #tpu.memory_space<vmem>>) attributes {dimension_semantics = [#tpu.dimension_semantics<parallel>], iteration_bounds = array<i64: 1>, scalar_prefetch = 0 : i64, scratch_operands = 0 : i64, tpu.core_type = #tpu.core_type<tc>, window_params = [{transform_indices = @transform_0, window_bounds = array<i64: 4, 400>}, {pipeline_mode = #tpu.pipeline_mode<synchronous>, transform_indices = @transform_1, window_bounds = array<i64: 400, 128>}, {pipeline_mode = #tpu.pipeline_mode<synchronous>, transform_indices = @transform_2, window_bounds = array<i64: 1, 128>}, {pipeline_mode = #tpu.pipeline_mode<synchronous>, transform_indices = @transform_3, window_bounds = array<i64: 128, 128>}, {pipeline_mode = #tpu.pipeline_mode<synchronous>, transform_indices = @transform_4, window_bounds = array<i64: 1, 128>}, {pipeline_mode = #tpu.pipeline_mode<synchronous>, transform_indices = @transform_5, window_bounds = array<i64: 128, 128>}, {pipeline_mode = #tpu.pipeline_mode<synchronous>, transform_indices = @transform_6, window_bounds = array<i64: 1, 128>}, {transform_indices = @transform_7, window_bounds = array<i64: 4, 128>}]} {
    %c0 = arith.constant 0 : index
    %c0_0 = arith.constant 0 : index
    %0 = vector.load %arg1[%c0, %c0_0] : memref<4x400xbf16, #tpu.memory_space<vmem>>, vector<4x400xbf16>
    %c0_1 = arith.constant 0 : index
    %c0_2 = arith.constant 0 : index
    %1 = vector.load %arg2[%c0_1, %c0_2] : memref<400x128xbf16, #tpu.memory_space<vmem>>, vector<400x128xbf16>
    %cst = arith.constant dense<0.000000e+00> : vector<4x128xf32>
    %2 = tpu.matmul %0, %1, %cst {dimension_numbers = #tpu.dot_dimension_numbers<[1], [0], [0], [1], [0, 0, 1, 1], [], []>} : vector<4x400xbf16>, vector<400x128xbf16>, vector<4x128xf32> -> vector<4x128xf32>
    %c0_3 = arith.constant 0 : index
    %c0_4 = arith.constant 0 : index
    %3 = vector.load %arg3[%c0_3, %c0_4] : memref<1x128xf32, #tpu.memory_space<vmem>>, vector<1x128xf32>
    %4 = vector.broadcast %3 : vector<1x128xf32> to vector<4x128xf32>
    %5 = arith.addf %2, %4 : vector<4x128xf32>
    %cst_5 = arith.constant 0.000000e+00 : f32
    %6 = vector.broadcast %cst_5 : f32 to vector<4x128xf32>
    %7 = arith.maximumf %5, %6 : vector<4x128xf32>
    %8 = arith.truncf %7 : vector<4x128xf32> to vector<4x128xbf16>
    %c0_6 = arith.constant 0 : index
    %c0_7 = arith.constant 0 : index
    %9 = vector.load %arg4[%c0_6, %c0_7] : memref<128x128xbf16, #tpu.memory_space<vmem>>, vector<128x128xbf16>
    %cst_8 = arith.constant dense<0.000000e+00> : vector<4x128xf32>
    %10 = tpu.matmul %8, %9, %cst_8 {dimension_numbers = #tpu.dot_dimension_numbers<[1], [0], [0], [1], [0, 0, 1, 1], [], []>} : vector<4x128xbf16>, vector<128x128xbf16>, vector<4x128xf32> -> vector<4x128xf32>
    %c0_9 = arith.constant 0 : index
    %c0_10 = arith.constant 0 : index
    %11 = vector.load %arg5[%c0_9, %c0_10] : memref<1x128xf32, #tpu.memory_space<vmem>>, vector<1x128xf32>
    %12 = vector.broadcast %11 : vector<1x128xf32> to vector<4x128xf32>
    %13 = arith.addf %10, %12 : vector<4x128xf32>
    %cst_11 = arith.constant 0.000000e+00 : f32
    %14 = vector.broadcast %cst_11 : f32 to vector<4x128xf32>
    %15 = arith.maximumf %13, %14 : vector<4x128xf32>
    %16 = arith.truncf %15 : vector<4x128xf32> to vector<4x128xbf16>
    %c0_12 = arith.constant 0 : index
    %c0_13 = arith.constant 0 : index
    %17 = vector.load %arg6[%c0_12, %c0_13] : memref<128x128xbf16, #tpu.memory_space<vmem>>, vector<128x128xbf16>
    %cst_14 = arith.constant dense<0.000000e+00> : vector<4x128xf32>
    %18 = tpu.matmul %16, %17, %cst_14 {dimension_numbers = #tpu.dot_dimension_numbers<[1], [0], [0], [1], [0, 0, 1, 1], [], []>} : vector<4x128xbf16>, vector<128x128xbf16>, vector<4x128xf32> -> vector<4x128xf32>
    %c0_15 = arith.constant 0 : index
    %c0_16 = arith.constant 0 : index
    %19 = vector.load %arg7[%c0_15, %c0_16] : memref<1x128xf32, #tpu.memory_space<vmem>>, vector<1x128xf32>
    %20 = vector.broadcast %19 : vector<1x128xf32> to vector<4x128xf32>
    %21 = arith.addf %18, %20 : vector<4x128xf32>
    %c0_17 = arith.constant 0 : index
    %c0_18 = arith.constant 0 : index
    %22 = vector.load %arg8[%c0_17, %c0_18] : memref<4x128xf32, #tpu.memory_space<vmem>>, vector<4x128xf32>
    tpu.vector_store %arg8[%c0_17, %c0_18], %21 {strides = array<i32>} : memref<4x128xf32, #tpu.memory_space<vmem>>, vector<4x128xf32>,
    return
  }
  func.func @transform_0(%arg0: i32) -> (i32, i32) {
    %c0_i32 = arith.constant 0 : i32
    %c0_i32_0 = arith.constant 0 : i32
    return %arg0, %c0_i32 : i32, i32
  }
  func.func @transform_1(%arg0: i32) -> (i32, i32) {
    %c0_i32 = arith.constant 0 : i32
    %c0_i32_0 = arith.constant 0 : i32
    %c0_i32_1 = arith.constant 0 : i32
    return %c0_i32, %c0_i32_0 : i32, i32
  }
  func.func @transform_2(%arg0: i32) -> (i32, i32) {
    %c0_i32 = arith.constant 0 : i32
    %c0_i32_0 = arith.constant 0 : i32
    %c0_i32_1 = arith.constant 0 : i32
    return %c0_i32, %c0_i32_0 : i32, i32
  }
  func.func @transform_3(%arg0: i32) -> (i32, i32) {
    %c0_i32 = arith.constant 0 : i32
    %c0_i32_0 = arith.constant 0 : i32
    %c0_i32_1 = arith.constant 0 : i32
    return %c0_i32, %c0_i32_0 : i32, i32
  }
  func.func @transform_4(%arg0: i32) -> (i32, i32) {
    %c0_i32 = arith.constant 0 : i32
    %c0_i32_0 = arith.constant 0 : i32
    %c0_i32_1 = arith.constant 0 : i32
    return %c0_i32, %c0_i32_0 : i32, i32
  }
  func.func @transform_5(%arg0: i32) -> (i32, i32) {
    %c0_i32 = arith.constant 0 : i32
    %c0_i32_0 = arith.constant 0 : i32
    %c0_i32_1 = arith.constant 0 : i32
    return %c0_i32, %c0_i32_0 : i32, i32
  }
  func.func @transform_6(%arg0: i32) -> (i32, i32) {
    %c0_i32 = arith.constant 0 : i32
    %c0_i32_0 = arith.constant 0 : i32
    %c0_i32_1 = arith.constant 0 : i32
    return %c0_i32, %c0_i32_0 : i32, i32
  }
  func.func @transform_7(%arg0: i32) -> (i32, i32) {
    %c0_i32 = arith.constant 0 : i32
    %c0_i32_0 = arith.constant 0 : i32
    return %arg0, %c0_i32 : i32, i32
  }
}

</mosaic_0001>

<bundles_post_ra>
// kernel: net_forward.3
= control target key start
LH: loop header
LB: loop body
LE: loop exit
PB: predicated region body
PF: predicated region fallthrough
CT: control target
= control target key end

     0   :  { %s4727_s12 = smov 0   ;;  %s4729_s13 = smov 0   ;;  %s6015_s0 = inlined_call_operand.vmem [shape: bf16[4,784,75], index: 0, kind: input, shape index: {}]   ;;  %s6016_s1 = inlined_call_operand.vmem [shape: bf16[75,8], index: 1, kind: input, shape index: {}]   ;;  %s6017_s2 = inlined_call_operand.vmem [shape: f32[1,8], index: 2, kind: input, shape index: {}]   ;;  %s6018_s3 = inlined_call_operand.vmem [shape: bf16[784,8], index: 3, kind: output, shape index: {}]  }
   0x1   :  { %s4731_s14 = smov 0  }
   0x2 LB: > { %s3525_s15 = sadd.s32 4294967295, %s4702_s14   ;;  %s4744_s16 = sadd.s32 1, %s4702_s14   ;;  %s4702_s14 = sphi %s4731_s14, %s6217_s14   ;;  %s4698_s13 = sphi %s4729_s13, %s6216_s13   ;;  %s4694_s12 = sphi %s4727_s12, %s6215_s12  }
   0x3   : > { %s17_s17 = ssub.s32 %s4702_s14, %s4744_s16  ;;  %s20_s18 = sadd.s32 1, %s4698_s13 }
   0x4   : > { %p18_p0 = scmp.eq.s32.totalorder %s17_s17, 0  ;;  %p27_p1 = scmp.ne.s32.totalorder %s4698_s13, %s4694_s12 }
   0x5   : > { %p28_p2 = scmp.eq.s32.totalorder %s4702_s14, 0  ;;  %p3528_p4 = scmp.ge.s32.totalorder %s4702_s14, 2 }
   0x6   : > { %s4753_s19 = scalar_select %p18_p0, %s4698_s13, %s20_s18  }
   0x7   : > { %p29_p3 = por %p28_p2, %p27_p1  ;;  %127 = sbr.rel (%p3528_p4) target bundleno = 67 (0x43), region = 24 }
   0xc   : > { %130 = sbr.rel (!%p29_p3) target bundleno = 67 (0x43), region = 28  ;;  %s132_s20 = sand.u32 (%p29_p3), 1, %s4698_s13  }
   0xd   : > { %s3936_s21 = smul.u32 (%p29_p3), 196, %s4702_s14 }
   0xe   : > { %s4546_s22 = smul.u32 (%p29_p3), 784, %s132_s20 }
   0xf   : > { %s4761_s25 = scalar_lea.vmem (%p29_p3), %s6015_s0, %s3936_s21 }
  0x10   : > { %v154_v0 = vld [vmem:[%s4761_s25] sm:$0xff] (%p29_p3)   ;;  %v158_v1 = vld [vmem:[%s4761_s25 + $0x8] sm:$0xff] (%p29_p3)   ;;  %v162_v2 = vld [vmem:[%s4761_s25 + $0x10] sm:$0xff] (%p29_p3)   ;;  %s4766_s26 = scalar_lea.vmem (%p29_p3), [#allocation2], %s4546_s22 }
  0x11   : > { %155 = vst [vmem:[%s4766_s26] sm:$0xff] %v154_v0   ;;  %159 = vst [vmem:[%s4766_s26 + $0x8] sm:$0xff] %v158_v1   ;;  %v166_v3 = vld [vmem:[%s4761_s25 + $0x18] sm:$0xff]   ;;  %v170_v4 = vld [vmem:[%s4761_s25 + $0x20] sm:$0xff]  }
  0x12   : > { %163 = vst [vmem:[%s4766_s26 + $0x10] sm:$0xff] %v162_v2   ;;  %v174_v5 = vld [vmem:[%s4761_s25 + $0x28] sm:$0xff]   ;;  %167 = vst [vmem:[%s4766_s26 + $0x18] sm:$0xff] %v166_v3   ;;  %v178_v6 = vld [vmem:[%s4761_s25 + $0x30] sm:$0xff]  }
  0x13   : > { %171 = vst [vmem:[%s4766_s26 + $0x20] sm:$0xff] %v170_v4   ;;  %175 = vst [vmem:[%s4766_s26 + $0x28] sm:$0xff] %v174_v5   ;;  %v182_v7 = vld [vmem:[%s4761_s25 + $0x38] sm:$0xff]   ;;  %v186_v8 = vld [vmem:[%s4761_s25 + $0x40] sm:$0xff]  }
  0x14   : > { %179 = vst [vmem:[%s4766_s26 + $0x30] sm:$0xff] %v178_v6   ;;  %183 = vst [vmem:[%s4766_s26 + $0x38] sm:$0xff] %v182_v7   ;;  %v190_v9 = vld [vmem:[%s4761_s25 + $0x48] sm:$0xff]   ;;  %v194_v10 = vld [vmem:[%s4761_s25 + $0x50] sm:$0xff]  }
  0x15   : > { %187 = vst [vmem:[%s4766_s26 + $0x40] sm:$0xff] %v186_v8   ;;  %v198_v11 = vld [vmem:[%s4761_s25 + $0x58] sm:$0xff]   ;;  %191 = vst [vmem:[%s4766_s26 + $0x48] sm:$0xff] %v190_v9   ;;  %v202_v12 = vld [vmem:[%s4761_s25 + $0x60] sm:$0xff]  }
  0x16   : > { %195 = vst [vmem:[%s4766_s26 + $0x50] sm:$0xff] %v194_v10   ;;  %199 = vst [vmem:[%s4766_s26 + $0x58] sm:$0xff] %v198_v11   ;;  %v206_v13 = vld [vmem:[%s4761_s25 + $0x68] sm:$0xff]   ;;  %v210_v14 = vld [vmem:[%s4761_s25 + $0x70] sm:$0xff]  }
  0x17   : > { %203 = vst [vmem:[%s4766_s26 + $0x60] sm:$0xff] %v202_v12   ;;  %207 = vst [vmem:[%s4766_s26 + $0x68] sm:$0xff] %v206_v13   ;;  %v214_v15 = vld [vmem:[%s4761_s25 + $0x78] sm:$0xff]   ;;  %v218_v16 = vld [vmem:[%s4761_s25 + $0x80] sm:$0xff]  }
  0x18   : > { %211 = vst [vmem:[%s4766_s26 + $0x70] sm:$0xff] %v210_v14   ;;  %v222_v17 = vld [vmem:[%s4761_s25 + $0x88] sm:$0xff]   ;;  %215 = vst [vmem:[%s4766_s26 + $0x78] sm:$0xff] %v214_v15   ;;  %v226_v18 = vld [vmem:[%s4761_s25 + $0x90] sm:$0xff]  }
  0x19   : > { %219 = vst [vmem:[%s4766_s26 + $0x80] sm:$0xff] %v218_v16   ;;  %223 = vst [vmem:[%s4766_s26 + $0x88] sm:$0xff] %v222_v17   ;;  %v230_v19 = vld [vmem:[%s4761_s25 + $0x98] sm:$0xff]   ;;  %v234_v20 = vld [vmem:[%s4761_s25 + $0xa0] sm:$0xff]  }
  0x1a   : > { %227 = vst [vmem:[%s4766_s26 + $0x90] sm:$0xff] %v226_v18   ;;  %231 = vst [vmem:[%s4766_s26 + $0x98] sm:$0xff] %v230_v19   ;;  %v238_v21 = vld [vmem:[%s4761_s25 + $0xa8] sm:$0xff]   ;;  %v242_v22 = vld [vmem:[%s4761_s25 + $0xb0] sm:$0xff]  }
  0x1b   : > { %235 = vst [vmem:[%s4766_s26 + $0xa0] sm:$0xff] %v234_v20   ;;  %v246_v23 = vld [vmem:[%s4761_s25 + $0xb8] sm:$0xff]   ;;  %239 = vst [vmem:[%s4766_s26 + $0xa8] sm:$0xff] %v238_v21   ;;  %v250_v24 = vld [vmem:[%s4761_s25 + $0xc0] sm:$0xf] }
  0x1c   : > { %243 = vst [vmem:[%s4766_s26 + $0xb0] sm:$0xff] %v242_v22   ;;  %247 = vst [vmem:[%s4766_s26 + $0xb8] sm:$0xff] %v246_v23   ;;  %v252_v25 = vld [vmem:[%s4761_s25 + $0x188] sm:$0xff]   ;;  %v256_v26 = vld [vmem:[%s4761_s25 + $0x190] sm:$0xff]  }
  0x1d   : > { %251 = vst [vmem:[%s4766_s26 + $0xc0] sm:$0xf] %v250_v24  ;;  %253 = vst [vmem:[%s4766_s26 + $0xc4] sm:$0xff] %v252_v25   ;;  %v260_v27 = vld [vmem:[%s4761_s25 + $0x198] sm:$0xff]   ;;  %v264_v28 = vld [vmem:[%s4761_s25 + $0x1a0] sm:$0xff]  }
  0x1e   : > { %257 = vst [vmem:[%s4766_s26 + $0xcc] sm:$0xff] %v256_v26   ;;  %v268_v29 = vld [vmem:[%s4761_s25 + $0x1a8] sm:$0xff]   ;;  %261 = vst [vmem:[%s4766_s26 + $0xd4] sm:$0xff] %v260_v27   ;;  %v272_v30 = vld [vmem:[%s4761_s25 + $0x1b0] sm:$0xff]  }
  0x1f   : > { %265 = vst [vmem:[%s4766_s26 + $0xdc] sm:$0xff] %v264_v28   ;;  %269 = vst [vmem:[%s4766_s26 + $0xe4] sm:$0xff] %v268_v29   ;;  %v276_v31 = vld [vmem:[%s4761_s25 + $0x1b8] sm:$0xff]   ;;  %v280_v32 = vld [vmem:[%s4761_s25 + $0x1c0] sm:$0xff]  }
  0x20   : > { %273 = vst [vmem:[%s4766_s26 + $0xec] sm:$0xff] %v272_v30   ;;  %277 = vst [vmem:[%s4766_s26 + $0xf4] sm:$0xff] %v276_v31   ;;  %v284_v33 = vld [vmem:[%s4761_s25 + $0x1c8] sm:$0xff]   ;;  %v288_v34 = vld [vmem:[%s4761_s25 + $0x1d0] sm:$0xff]  }
  0x21   : > { %281 = vst [vmem:[%s4766_s26 + $0xfc] sm:$0xff] %v280_v32   ;;  %v292_v35 = vld [vmem:[%s4761_s25 + $0x1d8] sm:$0xff]   ;;  %285 = vst [vmem:[%s4766_s26 + $0x104] sm:$0xff] %v284_v33   ;;  %v296_v36 = vld [vmem:[%s4761_s25 + $0x1e0] sm:$0xff]  }
  0x22   : > { %289 = vst [vmem:[%s4766_s26 + $0x10c] sm:$0xff] %v288_v34   ;;  %293 = vst [vmem:[%s4766_s26 + $0x114] sm:$0xff] %v292_v35   ;;  %v300_v37 = vld [vmem:[%s4761_s25 + $0x1e8] sm:$0xff]   ;;  %v304_v38 = vld [vmem:[%s4761_s25 + $0x1f0] sm:$0xff]  }
  0x23   : > { %297 = vst [vmem:[%s4766_s26 + $0x11c] sm:$0xff] %v296_v36   ;;  %301 = vst [vmem:[%s4766_s26 + $0x124] sm:$0xff] %v300_v37   ;;  %v308_v39 = vld [vmem:[%s4761_s25 + $0x1f8] sm:$0xff]   ;;  %v312_v40 = vld [vmem:[%s4761_s25 + $0x200] sm:$0xff]  }
  0x24   : > { %305 = vst [vmem:[%s4766_s26 + $0x12c] sm:$0xff] %v304_v38   ;;  %v316_v41 = vld [vmem:[%s4761_s25 + $0x208] sm:$0xff]   ;;  %309 = vst [vmem:[%s4766_s26 + $0x134] sm:$0xff] %v308_v39   ;;  %v320_v42 = vld [vmem:[%s4761_s25 + $0x210] sm:$0xff]  }
  0x25   : > { %313 = vst [vmem:[%s4766_s26 + $0x13c] sm:$0xff] %v312_v40   ;;  %317 = vst [vmem:[%s4766_s26 + $0x144] sm:$0xff] %v316_v41   ;;  %v324_v43 = vld [vmem:[%s4761_s25 + $0x218] sm:$0xff]   ;;  %v328_v44 = vld [vmem:[%s4761_s25 + $0x220] sm:$0xff]  }
  0x26   : > { %321 = vst [vmem:[%s4766_s26 + $0x14c] sm:$0xff] %v320_v42   ;;  %325 = vst [vmem:[%s4766_s26 + $0x154] sm:$0xff] %v324_v43   ;;  %v332_v45 = vld [vmem:[%s4761_s25 + $0x228] sm:$0xff]   ;;  %v336_v46 = vld [vmem:[%s4761_s25 + $0x230] sm:$0xff]  }
  0x27   : > { %329 = vst [vmem:[%s4766_s26 + $0x15c] sm:$0xff] %v328_v44   ;;  %v340_v47 = vld [vmem:[%s4761_s25 + $0x238] sm:$0xff]   ;;  %333 = vst [vmem:[%s4766_s26 + $0x164] sm:$0xff] %v332_v45   ;;  %v344_v48 = vld [vmem:[%s4761_s25 + $0x240] sm:$0xff]  }
  0x28   : > { %337 = vst [vmem:[%s4766_s26 + $0x16c] sm:$0xff] %v336_v46   ;;  %341 = vst [vmem:[%s4766_s26 + $0x174] sm:$0xff] %v340_v47   ;;  %v348_v49 = vld [vmem:[%s4761_s25 + $0x248] sm:$0xf]  ;;  %v350_v50 = vld [vmem:[%s4761_s25 + $0x310] sm:$0xff]  }
  0x29   : > { %345 = vst [vmem:[%s4766_s26 + $0x17c] sm:$0xff] %v344_v48   ;;  %349 = vst [vmem:[%s4766_s26 + $0x184] sm:$0xf] %v348_v49  ;;  %v354_v51 = vld [vmem:[%s4761_s25 + $0x318] sm:$0xff]   ;;  %v358_v52 = vld [vmem:[%s4761_s25 + $0x320] sm:$0xff]  }
  0x2a   : > { %351 = vst [vmem:[%s4766_s26 + $0x188] sm:$0xff] %v350_v50   ;;  %v362_v53 = vld [vmem:[%s4761_s25 + $0x328] sm:$0xff]   ;;  %355 = vst [vmem:[%s4766_s26 + $0x190] sm:$0xff] %v354_v51   ;;  %v366_v54 = vld [vmem:[%s4761_s25 + $0x330] sm:$0xff]  }
  0x2b   : > { %359 = vst [vmem:[%s4766_s26 + $0x198] sm:$0xff] %v358_v52   ;;  %363 = vst [vmem:[%s4766_s26 + $0x1a0] sm:$0xff] %v362_v53   ;;  %v370_v55 = vld [vmem:[%s4761_s25 + $0x338] sm:$0xff]   ;;  %v374_v56 = vld [vmem:[%s4761_s25 + $0x340] sm:$0xff]  }
  0x2c   : > { %367 = vst [vmem:[%s4766_s26 + $0x1a8] sm:$0xff] %v366_v54   ;;  %371 = vst [vmem:[%s4766_s26 + $0x1b0] sm:$0xff] %v370_v55   ;;  %v378_v57 = vld [vmem:[%s4761_s25 + $0x348] sm:$0xff]   ;;  %v382_v58 = vld [vmem:[%s4761_s25 + $0x350] sm:$0xff]  }
  0x2d   : > { %375 = vst [vmem:[%s4766_s26 + $0x1b8] sm:$0xff] %v374_v56   ;;  %v386_v59 = vld [vmem:[%s4761_s25 + $0x358] sm:$0xff]   ;;  %379 = vst [vmem:[%s4766_s26 + $0x1c0] sm:$0xff] %v378_v57   ;;  %v390_v60 = vld [vmem:[%s4761_s25 + $0x360] sm:$0xff]  }
  0x2e   : > { %383 = vst [vmem:[%s4766_s26 + $0x1c8] sm:$0xff] %v382_v58   ;;  %387 = vst [vmem:[%s4766_s26 + $0x1d0] sm:$0xff] %v386_v59   ;;  %v394_v61 = vld [vmem:[%s4761_s25 + $0x368] sm:$0xff]   ;;  %v398_v62 = vld [vmem:[%s4761_s25 + $0x370] sm:$0xff]  }
  0x2f   : > { %391 = vst [vmem:[%s4766_s26 + $0x1d8] sm:$0xff] %v390_v60   ;;  %395 = vst [vmem:[%s4766_s26 + $0x1e0] sm:$0xff] %v394_v61   ;;  %v402_v63 = vld [vmem:[%s4761_s25 + $0x378] sm:$0xff]   ;;  %v406_v0 = vld [vmem:[%s4761_s25 + $0x380] sm:$0xff]  }
  0x30   : > { %399 = vst [vmem:[%s4766_s26 + $0x1e8] sm:$0xff] %v398_v62   ;;  %v410_v1 = vld [vmem:[%s4761_s25 + $0x388] sm:$0xff]   ;;  %403 = vst [vmem:[%s4766_s26 + $0x1f0] sm:$0xff] %v402_v63   ;;  %v414_v2 = vld [vmem:[%s4761_s25 + $0x390] sm:$0xff]  }
  0x31   : > { %407 = vst [vmem:[%s4766_s26 + $0x1f8] sm:$0xff] %v406_v0   ;;  %411 = vst [vmem:[%s4766_s26 + $0x200] sm:$0xff] %v410_v1   ;;  %v418_v3 = vld [vmem:[%s4761_s25 + $0x398] sm:$0xff]   ;;  %v422_v4 = vld [vmem:[%s4761_s25 + $0x3a0] sm:$0xff]  }
  0x32   : > { %415 = vst [vmem:[%s4766_s26 + $0x208] sm:$0xff] %v414_v2   ;;  %419 = vst [vmem:[%s4766_s26 + $0x210] sm:$0xff] %v418_v3   ;;  %v426_v5 = vld [vmem:[%s4761_s25 + $0x3a8] sm:$0xff]   ;;  %v430_v6 = vld [vmem:[%s4761_s25 + $0x3b0] sm:$0xff]  }
  0x33   : > { %423 = vst [vmem:[%s4766_s26 + $0x218] sm:$0xff] %v422_v4   ;;  %v434_v7 = vld [vmem:[%s4761_s25 + $0x3b8] sm:$0xff]   ;;  %427 = vst [vmem:[%s4766_s26 + $0x220] sm:$0xff] %v426_v5   ;;  %v438_v8 = vld [vmem:[%s4761_s25 + $0x3c0] sm:$0xff]  }
  0x34   : > { %431 = vst [vmem:[%s4766_s26 + $0x228] sm:$0xff] %v430_v6   ;;  %435 = vst [vmem:[%s4766_s26 + $0x230] sm:$0xff] %v434_v7   ;;  %v442_v9 = vld [vmem:[%s4761_s25 + $0x3c8] sm:$0xff]   ;;  %v446_v10 = vld [vmem:[%s4761_s25 + $0x3d0] sm:$0xf] }
  0x35   : > { %439 = vst [vmem:[%s4766_s26 + $0x238] sm:$0xff] %v438_v8   ;;  %443 = vst [vmem:[%s4766_s26 + $0x240] sm:$0xff] %v442_v9   ;;  %v448_v11 = vld [vmem:[%s4761_s25 + $0x498] sm:$0xff]   ;;  %v452_v12 = vld [vmem:[%s4761_s25 + $0x4a0] sm:$0xff]  }
  0x36   : > { %447 = vst [vmem:[%s4766_s26 + $0x248] sm:$0xf] %v446_v10  ;;  %v456_v13 = vld [vmem:[%s4761_s25 + $0x4a8] sm:$0xff]   ;;  %449 = vst [vmem:[%s4766_s26 + $0x24c] sm:$0xff] %v448_v11   ;;  %v460_v14 = vld [vmem:[%s4761_s25 + $0x4b0] sm:$0xff]  }
  0x37   : > { %453 = vst [vmem:[%s4766_s26 + $0x254] sm:$0xff] %v452_v12   ;;  %457 = vst [vmem:[%s4766_s26 + $0x25c] sm:$0xff] %v456_v13   ;;  %v464_v15 = vld [vmem:[%s4761_s25 + $0x4b8] sm:$0xff]   ;;  %v468_v16 = vld [vmem:[%s4761_s25 + $0x4c0] sm:$0xff]  }
  0x38   : > { %461 = vst [vmem:[%s4766_s26 + $0x264] sm:$0xff] %v460_v14   ;;  %465 = vst [vmem:[%s4766_s26 + $0x26c] sm:$0xff] %v464_v15   ;;  %v472_v17 = vld [vmem:[%s4761_s25 + $0x4c8] sm:$0xff]   ;;  %v476_v18 = vld [vmem:[%s4761_s25 + $0x4d0] sm:$0xff]  }
  0x39   : > { %469 = vst [vmem:[%s4766_s26 + $0x274] sm:$0xff] %v468_v16   ;;  %v480_v19 = vld [vmem:[%s4761_s25 + $0x4d8] sm:$0xff]   ;;  %473 = vst [vmem:[%s4766_s26 + $0x27c] sm:$0xff] %v472_v17   ;;  %v484_v20 = vld [vmem:[%s4761_s25 + $0x4e0] sm:$0xff]  }
  0x3a   : > { %477 = vst [vmem:[%s4766_s26 + $0x284] sm:$0xff] %v476_v18   ;;  %481 = vst [vmem:[%s4766_s26 + $0x28c] sm:$0xff] %v480_v19   ;;  %v488_v21 = vld [vmem:[%s4761_s25 + $0x4e8] sm:$0xff]   ;;  %v492_v22 = vld [vmem:[%s4761_s25 + $0x4f0] sm:$0xff]  }
  0x3b   : > { %485 = vst [vmem:[%s4766_s26 + $0x294] sm:$0xff] %v484_v20   ;;  %489 = vst [vmem:[%s4766_s26 + $0x29c] sm:$0xff] %v488_v21   ;;  %v496_v23 = vld [vmem:[%s4761_s25 + $0x4f8] sm:$0xff]   ;;  %v500_v24 = vld [vmem:[%s4761_s25 + $0x500] sm:$0xff]  }
  0x3c   : > { %493 = vst [vmem:[%s4766_s26 + $0x2a4] sm:$0xff] %v492_v22   ;;  %v504_v25 = vld [vmem:[%s4761_s25 + $0x508] sm:$0xff]   ;;  %497 = vst [vmem:[%s4766_s26 + $0x2ac] sm:$0xff] %v496_v23   ;;  %v508_v26 = vld [vmem:[%s4761_s25 + $0x510] sm:$0xff]  }
  0x3d   : > { %501 = vst [vmem:[%s4766_s26 + $0x2b4] sm:$0xff] %v500_v24   ;;  %505 = vst [vmem:[%s4766_s26 + $0x2bc] sm:$0xff] %v504_v25   ;;  %v512_v27 = vld [vmem:[%s4761_s25 + $0x518] sm:$0xff]   ;;  %v516_v28 = vld [vmem:[%s4761_s25 + $0x520] sm:$0xff]  }
  0x3e   : > { %509 = vst [vmem:[%s4766_s26 + $0x2c4] sm:$0xff] %v508_v26   ;;  %513 = vst [vmem:[%s4766_s26 + $0x2cc] sm:$0xff] %v512_v27   ;;  %v520_v29 = vld [vmem:[%s4761_s25 + $0x528] sm:$0xff]   ;;  %v524_v30 = vld [vmem:[%s4761_s25 + $0x530] sm:$0xff]  }
  0x3f   : > { %517 = vst [vmem:[%s4766_s26 + $0x2d4] sm:$0xff] %v516_v28   ;;  %v528_v31 = vld [vmem:[%s4761_s25 + $0x538] sm:$0xff]   ;;  %521 = vst [vmem:[%s4766_s26 + $0x2dc] sm:$0xff] %v520_v29   ;;  %v532_v32 = vld [vmem:[%s4761_s25 + $0x540] sm:$0xff]  }
  0x40   : > { %525 = vst [vmem:[%s4766_s26 + $0x2e4] sm:$0xff] %v524_v30   ;;  %529 = vst [vmem:[%s4766_s26 + $0x2ec] sm:$0xff] %v528_v31   ;;  %v536_v33 = vld [vmem:[%s4761_s25 + $0x548] sm:$0xff]   ;;  %v540_v34 = vld [vmem:[%s4761_s25 + $0x550] sm:$0xff]  }
  0x41   : > { %533 = vst [vmem:[%s4766_s26 + $0x2f4] sm:$0xff] %v532_v32   ;;  %537 = vst [vmem:[%s4766_s26 + $0x2fc] sm:$0xff] %v536_v33   ;;  %v544_v35 = vld [vmem:[%s4761_s25 + $0x558] sm:$0xf] }
  0x42   : > { %541 = vst [vmem:[%s4766_s26 + $0x304] sm:$0xff] %v540_v34   ;;  %545 = vst [vmem:[%s4766_s26 + $0x30c] sm:$0xf] %v544_v35 }
  0x43 PF: > { %p3530_p5 = scmp.ge.s32.totalorder %s4702_s14, 1  ;;  %p960_p6 = scmp.lt.s32.totalorder %s4702_s14, 3 }
  0x45   : > { %p961_p7 = pnand %p3530_p5, %p960_p6 }
  0x47   : > { %964 = sbr.rel (%p961_p7) target bundleno = 696 (0x2b8), region = 69 }
  0x4c   : > { %vm1285_vm0 = vcmask 1044480   ;;  %v4704_v36 = vmov 0.0   ;;  %v4575_v37 = vld [vmem:[%s6016_s1 + $0x20] sm:$0x3f]   ;;  %vm1286_vm1 = vcmask 1045504   ;;  %v4705_v38 = vmov 65535  }
  0x4d   : > { %4106 = vmatprep.subr.bf16.mxu0 %v4704_v36  ;;  %4216 = vmatprep.subr.bf16.mxu1 %v4704_v36  ;;  %v1287_v39 = vsel %vm1285_vm0, 4294967295, %v4705_v38  ;;  %vm4706_vm2 = vmmov 0   ;;  %s967_s29 = sand.u32 1, %s4694_s12   ;;  %v4576_v42 = vld [vmem:[%s6016_s1 + $0x18] sm:$0xff]   ;;  %v4577_v43 = vld [vmem:[%s6016_s1 + $0x10] sm:$0xff]   ;;  %v4578_v44 = vld [vmem:[%s6016_s1 + $0x8] sm:$0xff]  }
  0x4e   : > { %v1288_v40 = vsel %vm1286_vm1, %v1287_v39, 0  ;;  %4116 = vmatprep.mubr.msk.bf16.mxu0 %vm4706_vm2, %v4704_v36  ;;  %4226 = vmatprep.mubr.msk.bf16.mxu1 %vm4706_vm2, %v4704_v36  ;;  %s4547_s5 = smul.u32 784, %s967_s29  ;;  %v4579_v45 = vld [vmem:[%s6016_s1] sm:$0xff]   ;;  %vm1209_vm3 = vcmask 613376   ;;  %vm3413_vm4 = vcmask 60416  }
  0x4f   : > { %v1290_v41 = vand.u32 %v4575_v37, %v1288_v40  ;;  %s991_s17 = smul.u32 49, %s3525_s15 }
  0x50   : > { %s4982_s6 = scalar_lea.vmem [#allocation2], %s4547_s5 }
  0x51   : > { %4107 = vmatpush3.bf16.msra.mxu0 %v1290_v41  ;;  %4217 = vmatpush3.bf16.msra.mxu1 %v1290_v41  ;;  %v4580_v46 = vld [vmem:[%s4982_s6] sm:$0xff]   ;;  %v4582_v48 = vld [vmem:[%s4982_s6 + $0x8] sm:$0xff]   ;;  %v4584_v50 = vld [vmem:[%s4982_s6 + $0x10] sm:$0xff]   ;;  %p992_p8 = scmp.lt.s32.totalorder %s991_s17, 97 }
  0x52   : > { %4108 = vmatprep.subr.bf16.mxu0 %v4704_v36  ;;  %4218 = vmatprep.subr.bf16.mxu1 %v4704_v36  ;;  %v4581_v47 = vld [vmem:[%s4982_s6 + $0xc4] sm:$0xff]   ;;  %v4583_v49 = vld [vmem:[%s4982_s6 + $0xcc] sm:$0xff]   ;;  %v4585_v51 = vld [vmem:[%s4982_s6 + $0xd4] sm:$0xff]  }
  0x53   : > { %v4586_v52 = vld [vmem:[%s4982_s6 + $0x18] sm:$0xff]   ;;  %v4588_v54 = vld [vmem:[%s4982_s6 + $0x20] sm:$0xff]   ;;  %v4590_v56 = vld [vmem:[%s4982_s6 + $0x28] sm:$0xff]   ;;  %s6219_s17 = smov (!%p992_p8, %s991_s17), 97 }
  0x54   : > { %v4587_v53 = vld [vmem:[%s4982_s6 + $0xdc] sm:$0xff]   ;;  %v4589_v55 = vld [vmem:[%s4982_s6 + $0xe4] sm:$0xff]   ;;  %v4591_v57 = vld [vmem:[%s4982_s6 + $0xec] sm:$0xff]   ;;  %s3531_s18 = sshll.u32 %s6219_s17, 2 }
  0x55   : > { %4109 = vmatpush3.bf16.msra.mxu0 %v4576_v42  ;;  %4219 = vmatpush3.bf16.msra.mxu1 %v4576_v42  ;;  %v4592_v58 = vld [vmem:[%s4982_s6 + $0x30] sm:$0xff]   ;;  %v4594_v60 = vld [vmem:[%s4982_s6 + $0x38] sm:$0xff]   ;;  %v4596_v62 = vld [vmem:[%s4982_s6 + $0x40] sm:$0xff]   ;;  %s5716_s22 = scalar_lea.vmem %s6018_s3, %s3531_s18 }
  0x56   : > { %4110 = vmatprep.subr.bf16.mxu0 %v4704_v36  ;;  %4220 = vmatprep.subr.bf16.mxu1 %v4704_v36  ;;  %v4593_v59 = vld [vmem:[%s4982_s6 + $0xf4] sm:$0xff]   ;;  %v4595_v61 = vld [vmem:[%s4982_s6 + $0xfc] sm:$0xff]   ;;  %v4597_v63 = vld [vmem:[%s4982_s6 + $0x104] sm:$0xff]  }
  0x57   : > { %v4598_v0 = vld [vmem:[%s4982_s6 + $0x48] sm:$0xff]   ;;  %v4600_v2 = vld [vmem:[%s4982_s6 + $0x50] sm:$0xff]   ;;  %v4602_v4 = vld [vmem:[%s4982_s6 + $0x58] sm:$0xff]  }
  0x58   : > { %v4599_v1 = vld [vmem:[%s4982_s6 + $0x10c] sm:$0xff]   ;;  %v4601_v3 = vld [vmem:[%s4982_s6 + $0x114] sm:$0xff]   ;;  %v4603_v5 = vld [vmem:[%s4982_s6 + $0x11c] sm:$0xff]  }
  0x59   : > { %4111 = vmatpush3.bf16.msra.mxu0 %v4577_v43  ;;  %4221 = vmatpush3.bf16.msra.mxu1 %v4577_v43  ;;  %v4604_v6 = vld [vmem:[%s4982_s6 + $0x60] sm:$0xff]   ;;  %v4606_v8 = vld [vmem:[%s4982_s6 + $0x68] sm:$0xff]   ;;  %v4608_v10 = vld [vmem:[%s4982_s6 + $0x70] sm:$0xff]  }
  0x5a   : > { %4112 = vmatprep.subr.bf16.mxu0 %v4704_v36  ;;  %4222 = vmatprep.subr.bf16.mxu1 %v4704_v36  ;;  %v4605_v7 = vld [vmem:[%s4982_s6 + $0x124] sm:$0xff]   ;;  %v4607_v9 = vld [vmem:[%s4982_s6 + $0x12c] sm:$0xff]   ;;  %v4609_v11 = vld [vmem:[%s4982_s6 + $0x134] sm:$0xff]  }
  0x5b   : > { %v4610_v12 = vld [vmem:[%s4982_s6 + $0x78] sm:$0xff]   ;;  %v4612_v14 = vld [vmem:[%s4982_s6 + $0x80] sm:$0xff]   ;;  %v4614_v16 = vld [vmem:[%s4982_s6 + $0x88] sm:$0xff]  }
  0x5c   : > { %v4611_v13 = vld [vmem:[%s4982_s6 + $0x13c] sm:$0xff]   ;;  %v4613_v15 = vld [vmem:[%s4982_s6 + $0x144] sm:$0xff]   ;;  %v4615_v17 = vld [vmem:[%s4982_s6 + $0x14c] sm:$0xff]  }
  0x5d   : > { %4113 = vmatpush3.bf16.msra.mxu0 %v4578_v44  ;;  %4223 = vmatpush3.bf16.msra.mxu1 %v4578_v44  ;;  %v4616_v18 = vld [vmem:[%s4982_s6 + $0x90] sm:$0xff]   ;;  %v4618_v20 = vld [vmem:[%s4982_s6 + $0x98] sm:$0xff]   ;;  %v4620_v22 = vld [vmem:[%s4982_s6 + $0xa0] sm:$0xff]  }
  0x5e   : > { %4114 = vmatprep.subr.bf16.mxu0 %v4704_v36  ;;  %4224 = vmatprep.subr.bf16.mxu1 %v4704_v36  ;;  %v4617_v19 = vld [vmem:[%s4982_s6 + $0x154] sm:$0xff]   ;;  %v4619_v21 = vld [vmem:[%s4982_s6 + $0x15c] sm:$0xff]   ;;  %v4621_v23 = vld [vmem:[%s4982_s6 + $0x164] sm:$0xff]  }
  0x5f   : > { %v4622_v24 = vld [vmem:[%s4982_s6 + $0xa8] sm:$0xff]   ;;  %v4624_v26 = vld [vmem:[%s4982_s6 + $0xb0] sm:$0xff]   ;;  %v4626_v28 = vld [vmem:[%s4982_s6 + $0xb8] sm:$0xff]  }
  0x60   : > { %v4623_v25 = vld [vmem:[%s4982_s6 + $0x16c] sm:$0xff]   ;;  %v4625_v27 = vld [vmem:[%s4982_s6 + $0x174] sm:$0xff]   ;;  %v4627_v29 = vld [vmem:[%s4982_s6 + $0x17c] sm:$0xff]  }
  0x61   : > { %4115 = vmatpush3.bf16.msra.mxu0 %v4579_v45  ;;  %4225 = vmatpush3.bf16.msra.mxu1 %v4579_v45  ;;  %v4628_v30 = vld [vmem:[%s4982_s6 + $0xc0] ss:$0 sps:$4 sm:$0xff]   ;;  %v4629_v31 = vld [vmem:[%s4982_s6 + $0x184] ss:$0 sps:$4 sm:$0xff]   ;;  %v4630_v40 = vld [vmem:[%s4982_s6 + $0x188] sm:$0xff]  }
  0x62   : > { %4326 = vmatprep.subr.bf16.mxu0 %v4704_v36  ;;  %4436 = vmatprep.subr.bf16.mxu1 %v4704_v36 }
  0x64   : > { %4117 = vmatmul.mubr.msk.bf16.vlgmr.msra.gmra.mxu0 %vm1209_vm3, %v4580_v46  ;;  %4227 = vmatmul.mubr.msk.bf16.vlgmr.msra.gmra.mxu1 %vm1209_vm3, %v4581_v47 }
  0x65   : > { %4327 = vmatpush3.bf16.msra.mxu0 %v1290_v41  ;;  %4437 = vmatpush3.bf16.msra.mxu1 %v1290_v41  ;;  %v4631_v41 = vld [vmem:[%s4982_s6 + $0x24c] sm:$0xff]  }
  0x66   : > { %4120 = vmatprep.mubr.msk.bf16.mxu0 %vm4706_vm2, %v4704_v36  ;;  %4230 = vmatprep.mubr.msk.bf16.mxu1 %vm4706_vm2, %v4704_v36 }
  0x67   : > { %4328 = vmatprep.subr.bf16.mxu0 %v4704_v36  ;;  %4438 = vmatprep.subr.bf16.mxu1 %v4704_v36 }
  0x69   : > { %4329 = vmatpush3.bf16.msra.mxu0 %v4576_v42  ;;  %4439 = vmatpush3.bf16.msra.mxu1 %v4576_v42  ;;  %v4656_v42 = vld [vmem:[%s4982_s6 + $0x1f0] sm:$0xff]  }
  0x6a   : > { %4330 = vmatprep.subr.bf16.mxu0 %v4704_v36  ;;  %4440 = vmatprep.subr.bf16.mxu1 %v4704_v36 }
  0x6c   : > { %4121 = vmatmul.mubr.msk.bf16.gmra.mxu0 %vm1209_vm3, %v4582_v48  ;;  %4231 = vmatmul.mubr.msk.bf16.gmra.mxu1 %vm1209_vm3, %v4583_v49 }
  0x6d   : > { %4124 = vmatprep.mubr.msk.bf16.mxu0 %vm4706_vm2, %v4704_v36  ;;  %4234 = vmatprep.mubr.msk.bf16.mxu1 %vm4706_vm2, %v4704_v36 }
  0x6e   : > { %4331 = vmatpush3.bf16.msra.mxu0 %v4577_v43  ;;  %4441 = vmatpush3.bf16.msra.mxu1 %v4577_v43 }
  0x6f   : > { %4332 = vmatprep.subr.bf16.mxu0 %v4704_v36  ;;  %4442 = vmatprep.subr.bf16.mxu1 %v4704_v36 }
  0x72   : > { %4333 = vmatpush3.bf16.msra.mxu0 %v4578_v44  ;;  %4443 = vmatpush3.bf16.msra.mxu1 %v4578_v44 }
  0x73   : > { %4334 = vmatprep.subr.bf16.mxu0 %v4704_v36  ;;  %4444 = vmatprep.subr.bf16.mxu1 %v4704_v36 }
  0x74   : > { %4125 = vmatmul.mubr.msk.bf16.gmra.mxu0 %vm1209_vm3, %v4584_v50  ;;  %4235 = vmatmul.mubr.msk.bf16.gmra.mxu1 %vm1209_vm3, %v4585_v51 }
  0x75   : > { %4128 = vmatprep.mubr.msk.bf16.mxu0 %vm4706_vm2, %v4704_v36  ;;  %4238 = vmatprep.mubr.msk.bf16.mxu1 %vm4706_vm2, %v4704_v36 }
  0x76   : > { %4335 = vmatpush3.bf16.msra.mxu0 %v4579_v45  ;;  %4445 = vmatpush3.bf16.msra.mxu1 %v4579_v45 }
  0x7c   : > { %4129 = vmatmul.mubr.msk.bf16.gmra.mxu0 %vm1209_vm3, %v4586_v52  ;;  %4239 = vmatmul.mubr.msk.bf16.gmra.mxu1 %vm1209_vm3, %v4587_v53  ;;  %v4632_v52 = vld [vmem:[%s4982_s6 + $0x190] sm:$0xff]  }
  0x7d   : > { %4132 = vmatprep.mubr.msk.bf16.mxu0 %vm4706_vm2, %v4704_v36  ;;  %4242 = vmatprep.mubr.msk.bf16.mxu1 %vm4706_vm2, %v4704_v36  ;;  %v4633_v53 = vld [vmem:[%s4982_s6 + $0x254] sm:$0xff]  }
  0x84   : > { %4133 = vmatmul.mubr.msk.bf16.gmra.mxu0 %vm1209_vm3, %v4588_v54  ;;  %4243 = vmatmul.mubr.msk.bf16.gmra.mxu1 %vm1209_vm3, %v4589_v55 }
  0x85   : > { %4136 = vmatprep.mubr.msk.bf16.mxu0 %vm4706_vm2, %v4704_v36  ;;  %4246 = vmatprep.mubr.msk.bf16.mxu1 %vm4706_vm2, %v4704_v36 }
  0x8c   : > { %4137 = vmatmul.mubr.msk.bf16.gmra.mxu0 %vm1209_vm3, %v4590_v56  ;;  %4247 = vmatmul.mubr.msk.bf16.gmra.mxu1 %vm1209_vm3, %v4591_v57 }
  0x8d   : > { %4140 = vmatprep.mubr.msk.bf16.mxu0 %vm4706_vm2, %v4704_v36  ;;  %4250 = vmatprep.mubr.msk.bf16.mxu1 %vm4706_vm2, %v4704_v36 }
  0x94   : > { %4141 = vmatmul.mubr.msk.bf16.gmra.mxu0 %vm1209_vm3, %v4592_v58  ;;  %4251 = vmatmul.mubr.msk.bf16.gmra.mxu1 %vm1209_vm3, %v4593_v59 }
  0x95   : > { %4144 = vmatprep.mubr.msk.bf16.mxu0 %vm4706_vm2, %v4704_v36  ;;  %4254 = vmatprep.mubr.msk.bf16.mxu1 %vm4706_vm2, %v4704_v36 }
  0x9c   : > { %4145 = vmatmul.mubr.msk.bf16.gmra.mxu0 %vm1209_vm3, %v4594_v60  ;;  %4255 = vmatmul.mubr.msk.bf16.gmra.mxu1 %vm1209_vm3, %v4595_v61 }
  0x9d   : > { %4148 = vmatprep.mubr.msk.bf16.mxu0 %vm4706_vm2, %v4704_v36  ;;  %4258 = vmatprep.mubr.msk.bf16.mxu1 %vm4706_vm2, %v4704_v36 }
  0xa4   : > { %4149 = vmatmul.mubr.msk.bf16.gmra.mxu0 %vm1209_vm3, %v4596_v62  ;;  %4259 = vmatmul.mubr.msk.bf16.gmra.mxu1 %vm1209_vm3, %v4597_v63 }
  0xa5   : > { %4152 = vmatprep.mubr.msk.bf16.mxu0 %vm4706_vm2, %v4704_v36  ;;  %4262 = vmatprep.mubr.msk.bf16.mxu1 %vm4706_vm2, %v4704_v36 }
  0xac   : > { %4153 = vmatmul.mubr.msk.bf16.gmra.mxu0 %vm1209_vm3, %v4598_v0  ;;  %4263 = vmatmul.mubr.msk.bf16.gmra.mxu1 %vm1209_vm3, %v4599_v1  ;;  %v4634_v0 = vld [vmem:[%s4982_s6 + $0x198] sm:$0xff]  }
  0xad   : > { %4156 = vmatprep.mubr.msk.bf16.mxu0 %vm4706_vm2, %v4704_v36  ;;  %4266 = vmatprep.mubr.msk.bf16.mxu1 %vm4706_vm2, %v4704_v36  ;;  %v4635_v1 = vld [vmem:[%s4982_s6 + $0x25c] sm:$0xff]  }
  0xb4   : > { %4157 = vmatmul.mubr.msk.bf16.gmra.mxu0 %vm1209_vm3, %v4600_v2  ;;  %4267 = vmatmul.mubr.msk.bf16.gmra.mxu1 %vm1209_vm3, %v4601_v3  ;;  %v4654_v2 = vld [vmem:[%s4982_s6 + $0x1e8] sm:$0xff]  }
  0xb5   : > { %4160 = vmatprep.mubr.msk.bf16.mxu0 %vm4706_vm2, %v4704_v36  ;;  %4270 = vmatprep.mubr.msk.bf16.mxu1 %vm4706_vm2, %v4704_v36 }
  0xbc   : > { %4161 = vmatmul.mubr.msk.bf16.gmra.mxu0 %vm1209_vm3, %v4602_v4  ;;  %4271 = vmatmul.mubr.msk.bf16.gmra.mxu1 %vm1209_vm3, %v4603_v5 }
  0xbd   : > { %4164 = vmatprep.mubr.msk.bf16.mxu0 %vm4706_vm2, %v4704_v36  ;;  %4274 = vmatprep.mubr.msk.bf16.mxu1 %vm4706_vm2, %v4704_v36 }
  0xc4   : > { %4165 = vmatmul.mubr.msk.bf16.gmra.mxu0 %vm1209_vm3, %v4604_v6  ;;  %4275 = vmatmul.mubr.msk.bf16.gmra.mxu1 %vm1209_vm3, %v4605_v7 }
  0xc5   : > { %4168 = vmatprep.mubr.msk.bf16.mxu0 %vm4706_vm2, %v4704_v36  ;;  %4278 = vmatprep.mubr.msk.bf16.mxu1 %vm4706_vm2, %v4704_v36 }
  0xcc   : > { %4169 = vmatmul.mubr.msk.bf16.gmra.mxu0 %vm1209_vm3, %v4606_v8  ;;  %4279 = vmatmul.mubr.msk.bf16.gmra.mxu1 %vm1209_vm3, %v4607_v9 }
  0xcd   : > { %4172 = vmatprep.mubr.msk.bf16.mxu0 %vm4706_vm2, %v4704_v36  ;;  %4282 = vmatprep.mubr.msk.bf16.mxu1 %vm4706_vm2, %v4704_v36 }
  0xd4   : > { %4173 = vmatmul.mubr.msk.bf16.gmra.mxu0 %vm1209_vm3, %v4608_v10  ;;  %4283 = vmatmul.mubr.msk.bf16.gmra.mxu1 %vm1209_vm3, %v4609_v11 }
  0xd5   : > { %4176 = vmatprep.mubr.msk.bf16.mxu0 %vm4706_vm2, %v4704_v36  ;;  %4286 = vmatprep.mubr.msk.bf16.mxu1 %vm4706_vm2, %v4704_v36 }
  0xdc   : > { %4177 = vmatmul.mubr.msk.bf16.gmra.mxu0 %vm1209_vm3, %v4610_v12  ;;  %4287 = vmatmul.mubr.msk.bf16.gmra.mxu1 %vm1209_vm3, %v4611_v13  ;;  %v4636_v12 = vld [vmem:[%s4982_s6 + $0x1a0] sm:$0xff]  }
  0xdd   : > { %4180 = vmatprep.mubr.msk.bf16.mxu0 %vm4706_vm2, %v4704_v36  ;;  %4290 = vmatprep.mubr.msk.bf16.mxu1 %vm4706_vm2, %v4704_v36  ;;  %v4637_v13 = vld [vmem:[%s4982_s6 + $0x264] sm:$0xff]  }
  0xe4   : > { %4181 = vmatmul.mubr.msk.bf16.gmra.mxu0 %vm1209_vm3, %v4612_v14  ;;  %4291 = vmatmul.mubr.msk.bf16.gmra.mxu1 %vm1209_vm3, %v4613_v15 }
  0xe5   : > { %4184 = vmatprep.mubr.msk.bf16.mxu0 %vm4706_vm2, %v4704_v36  ;;  %4294 = vmatprep.mubr.msk.bf16.mxu1 %vm4706_vm2, %v4704_v36 }
  0xec   : > { %4185 = vmatmul.mubr.msk.bf16.gmra.mxu0 %vm1209_vm3, %v4614_v16  ;;  %4295 = vmatmul.mubr.msk.bf16.gmra.mxu1 %vm1209_vm3, %v4615_v17 }
  0xed   : > { %4188 = vmatprep.mubr.msk.bf16.mxu0 %vm4706_vm2, %v4704_v36  ;;  %4298 = vmatprep.mubr.msk.bf16.mxu1 %vm4706_vm2, %v4704_v36 }
  0xf4   : > { %4189 = vmatmul.mubr.msk.bf16.gmra.mxu0 %vm1209_vm3, %v4616_v18  ;;  %4299 = vmatmul.mubr.msk.bf16.gmra.mxu1 %vm1209_vm3, %v4617_v19 }
  0xf5   : > { %4192 = vmatprep.mubr.msk.bf16.mxu0 %vm4706_vm2, %v4704_v36  ;;  %4302 = vmatprep.mubr.msk.bf16.mxu1 %vm4706_vm2, %v4704_v36 }
  0xfc   : > { %4193 = vmatmul.mubr.msk.bf16.gmra.mxu0 %vm1209_vm3, %v4618_v20  ;;  %4303 = vmatmul.mubr.msk.bf16.gmra.mxu1 %vm1209_vm3, %v4619_v21 }
  0xfd   : > { %4196 = vmatprep.mubr.msk.bf16.mxu0 %vm4706_vm2, %v4704_v36  ;;  %4306 = vmatprep.mubr.msk.bf16.mxu1 %vm4706_vm2, %v4704_v36 }
 0x104   : > { %4197 = vmatmul.mubr.msk.bf16.gmra.mxu0 %vm1209_vm3, %v4620_v22  ;;  %4307 = vmatmul.mubr.msk.bf16.gmra.mxu1 %vm1209_vm3, %v4621_v23 }
 0x105   : > { %4200 = vmatprep.mubr.msk.bf16.mxu0 %vm4706_vm2, %v4704_v36  ;;  %4310 = vmatprep.mubr.msk.bf16.mxu1 %vm4706_vm2, %v4704_v36 }
 0x10c   : > { %4201 = vmatmul.mubr.msk.bf16.gmra.mxu0 %vm1209_vm3, %v4622_v24  ;;  %4311 = vmatmul.mubr.msk.bf16.gmra.mxu1 %vm1209_vm3, %v4623_v25  ;;  %v4638_v24 = vld [vmem:[%s4982_s6 + $0x1a8] sm:$0xff]  }
 0x10d   : > { %4204 = vmatprep.mubr.msk.bf16.mxu0 %vm4706_vm2, %v4704_v36  ;;  %4314 = vmatprep.mubr.msk.bf16.mxu1 %vm4706_vm2, %v4704_v36  ;;  %v4639_v25 = vld [vmem:[%s4982_s6 + $0x26c] sm:$0xff]  }
 0x114   : > { %4205 = vmatmul.mubr.msk.bf16.gmra.mxu0 %vm1209_vm3, %v4624_v26  ;;  %4315 = vmatmul.mubr.msk.bf16.gmra.mxu1 %vm1209_vm3, %v4625_v27  ;;  %v4652_v26 = vld [vmem:[%s4982_s6 + $0x1e0] sm:$0xff]  }
 0x115   : > { %4208 = vmatprep.mubr.msk.bf16.mxu0 %vm4706_vm2, %v4704_v36  ;;  %4318 = vmatprep.mubr.msk.bf16.mxu1 %vm4706_vm2, %v4704_v36 }
 0x11c   : > { %4209 = vmatmul.mubr.msk.bf16.gmra.mxu0 %vm1209_vm3, %v4626_v28  ;;  %4319 = vmatmul.mubr.msk.bf16.gmra.mxu1 %vm1209_vm3, %v4627_v29 }
 0x11d   : > { %4212 = vmatprep.mubr.msk.bf16.mxu0 %vm4706_vm2, %v4704_v36  ;;  %4322 = vmatprep.mubr.msk.bf16.mxu1 %vm4706_vm2, %v4704_v36 }
 0x124   : > { %v5203_v32 = vpop.f32.mrf.mxu0  ;;  %4213 = vmatmul.mubr.msk.bf16.gmra.mxu0 %vm1209_vm3, %v4628_v30  ;;  %v5206_v33 = vpop.f32.mrf.mxu1  ;;  %4323 = vmatmul.mubr.msk.bf16.gmra.mxu1 %vm1209_vm3, %v4629_v31 }
 0x125   : > { %4336 = vmatprep.mubr.msk.bf16.mxu0 %vm4706_vm2, %v4704_v36  ;;  %4446 = vmatprep.mubr.msk.bf16.mxu1 %vm4706_vm2, %v4704_v36 }
 0x126   : > { %v4118_v35 = vpop.f32.mrf.mxu0  ;;  %v4228_v37 = vpop.f32.mrf.mxu1 }
 0x128   : > { %v5215_v38 = vpop.f32.mrf.mxu0  ;;  %v5217_v39 = vpop.f32.mrf.mxu1 }
 0x12a   : > { %v4119_v43 = vpop.f32.mrf.mxu0  ;;  %v4229_v44 = vpop.f32.mrf.mxu1 }
 0x12b   : > { %v4640_v43 = vld [vmem:[%s4982_s6 + $0x1b0] sm:$0xff]  }
 0x12c   : > { %v5223_v45 = vpop.f32.mrf.mxu0  ;;  %v5225_v46 = vpop.f32.mrf.mxu1  ;;  %4337 = vmatmul.mubr.msk.bf16.vlgmr.msra.gmra.mxu0 %vm1209_vm3, %v4630_v40  ;;  %4447 = vmatmul.mubr.msk.bf16.vlgmr.msra.gmra.mxu1 %vm1209_vm3, %v4631_v41  ;;  %v4641_v44 = vld [vmem:[%s4982_s6 + $0x274] sm:$0xff]  }
 0x12d   : > { %4340 = vmatprep.mubr.msk.bf16.mxu0 %vm4706_vm2, %v4704_v36  ;;  %4450 = vmatprep.mubr.msk.bf16.mxu1 %vm4706_vm2, %v4704_v36 }
 0x12e   : > { %v4122_v48 = vpop.f32.mrf.mxu0  ;;  %v4232_v49 = vpop.f32.mrf.mxu1 }
 0x130   : > { %v5235_v50 = vpop.f32.mrf.mxu0  ;;  %v5237_v51 = vpop.f32.mrf.mxu1 }
 0x132   : > { %v4123_v55 = vpop.f32.mrf.mxu0  ;;  %v4233_v56 = vpop.f32.mrf.mxu1 }
 0x134   : > { %v5243_v57 = vpop.f32.mrf.mxu0  ;;  %v5245_v58 = vpop.f32.mrf.mxu1  ;;  %4341 = vmatmul.mubr.msk.bf16.gmra.mxu0 %vm1209_vm3, %v4632_v52  ;;  %4451 = vmatmul.mubr.msk.bf16.gmra.mxu1 %vm1209_vm3, %v4633_v53 }
 0x135   : > { %4344 = vmatprep.mubr.msk.bf16.mxu0 %vm4706_vm2, %v4704_v36  ;;  %4454 = vmatprep.mubr.msk.bf16.mxu1 %vm4706_vm2, %v4704_v36 }
 0x136   : > { %v4126_v60 = vpop.f32.mrf.mxu0  ;;  %v4236_v61 = vpop.f32.mrf.mxu1 }
 0x138   : > { %v5255_v62 = vpop.f32.mrf.mxu0  ;;  %v5257_v63 = vpop.f32.mrf.mxu1 }
 0x13a   : > { %v4127_v3 = vpop.f32.mrf.mxu0  ;;  %v4237_v4 = vpop.f32.mrf.mxu1 }
 0x13b   : > { %v4642_v3 = vld [vmem:[%s4982_s6 + $0x1b8] sm:$0xff]  }
 0x13c   : > { %v5263_v5 = vpop.f32.mrf.mxu0  ;;  %v5265_v6 = vpop.f32.mrf.mxu1  ;;  %4345 = vmatmul.mubr.msk.bf16.gmra.mxu0 %vm1209_vm3, %v4634_v0  ;;  %4455 = vmatmul.mubr.msk.bf16.gmra.mxu1 %vm1209_vm3, %v4635_v1  ;;  %v4643_v4 = vld [vmem:[%s4982_s6 + $0x27c] sm:$0xff]  }
 0x13d   : > { %4348 = vmatprep.mubr.msk.bf16.mxu0 %vm4706_vm2, %v4704_v36  ;;  %4458 = vmatprep.mubr.msk.bf16.mxu1 %vm4706_vm2, %v4704_v36 }
 0x13e   : > { %v4130_v8 = vpop.f32.mrf.mxu0  ;;  %v4240_v9 = vpop.f32.mrf.mxu1 }
 0x13f   : > { %v4650_v8 = vld [vmem:[%s4982_s6 + $0x1d8] sm:$0xff]  }
 0x140   : > { %v5275_v10 = vpop.f32.mrf.mxu0  ;;  %v5277_v11 = vpop.f32.mrf.mxu1 }
 0x142   : > { %v4131_v15 = vpop.f32.mrf.mxu0  ;;  %v4241_v16 = vpop.f32.mrf.mxu1 }
 0x144   : > { %v5283_v17 = vpop.f32.mrf.mxu0  ;;  %v5285_v18 = vpop.f32.mrf.mxu1  ;;  %4349 = vmatmul.mubr.msk.bf16.gmra.mxu0 %vm1209_vm3, %v4636_v12  ;;  %4459 = vmatmul.mubr.msk.bf16.gmra.mxu1 %vm1209_vm3, %v4637_v13 }
 0x145   : > { %4352 = vmatprep.mubr.msk.bf16.mxu0 %vm4706_vm2, %v4704_v36  ;;  %4462 = vmatprep.mubr.msk.bf16.mxu1 %vm4706_vm2, %v4704_v36 }
 0x146   : > { %v4134_v20 = vpop.f32.mrf.mxu0  ;;  %v4244_v21 = vpop.f32.mrf.mxu1 }
 0x148   : > { %v5295_v22 = vpop.f32.mrf.mxu0  ;;  %v5297_v23 = vpop.f32.mrf.mxu1 }
 0x14a   : > { %v4135_v27 = vpop.f32.mrf.mxu0  ;;  %v4245_v28 = vpop.f32.mrf.mxu1 }
 0x14b   : > { %v4644_v27 = vld [vmem:[%s4982_s6 + $0x1c0] sm:$0xff]  }
 0x14c   : > { %v5303_v29 = vpop.f32.mrf.mxu0  ;;  %v5305_v30 = vpop.f32.mrf.mxu1  ;;  %4353 = vmatmul.mubr.msk.bf16.gmra.mxu0 %vm1209_vm3, %v4638_v24  ;;  %4463 = vmatmul.mubr.msk.bf16.gmra.mxu1 %vm1209_vm3, %v4639_v25  ;;  %v4645_v28 = vld [vmem:[%s4982_s6 + $0x284] sm:$0xff]  }
 0x14d   : > { %4356 = vmatprep.mubr.msk.bf16.mxu0 %vm4706_vm2, %v4704_v36  ;;  %4466 = vmatprep.mubr.msk.bf16.mxu1 %vm4706_vm2, %v4704_v36 }
 0x14e   : > { %v4138_v35 = vpop.f32.mrf.mxu0  ;;  %v4248_v37 = vpop.f32.mrf.mxu1 }
 0x150   : > { %v5315_v40 = vpop.f32.mrf.mxu0  ;;  %v5317_v41 = vpop.f32.mrf.mxu1 }
 0x152   : > { %v4139_v49 = vpop.f32.mrf.mxu0  ;;  %v4249_v52 = vpop.f32.mrf.mxu1 }
 0x154   : > { %v5323_v53 = vpop.f32.mrf.mxu0  ;;  %v5325_v55 = vpop.f32.mrf.mxu1  ;;  %4357 = vmatmul.mubr.msk.bf16.gmra.mxu0 %vm1209_vm3, %v4640_v43  ;;  %4467 = vmatmul.mubr.msk.bf16.gmra.mxu1 %vm1209_vm3, %v4641_v44 }
 0x155   : > { %4360 = vmatprep.mubr.msk.bf16.mxu0 %vm4706_vm2, %v4704_v36  ;;  %4470 = vmatprep.mubr.msk.bf16.mxu1 %vm4706_vm2, %v4704_v36 }
 0x156   : > { %v4142_v60 = vpop.f32.mrf.mxu0  ;;  %v4252_v61 = vpop.f32.mrf.mxu1 }
 0x158   : > { %v5335_v0 = vpop.f32.mrf.mxu0  ;;  %v5337_v1 = vpop.f32.mrf.mxu1 }
 0x15a   : > { %v4143_v9 = vpop.f32.mrf.mxu0  ;;  %v4253_v12 = vpop.f32.mrf.mxu1 }
 0x15b   : > { %v4646_v9 = vld [vmem:[%s4982_s6 + $0x1c8] sm:$0xff]  }
 0x15c   : > { %v5343_v13 = vpop.f32.mrf.mxu0  ;;  %v5345_v15 = vpop.f32.mrf.mxu1  ;;  %4361 = vmatmul.mubr.msk.bf16.gmra.mxu0 %vm1209_vm3, %v4642_v3  ;;  %4471 = vmatmul.mubr.msk.bf16.gmra.mxu1 %vm1209_vm3, %v4643_v4  ;;  %v4647_v12 = vld [vmem:[%s4982_s6 + $0x28c] sm:$0xff]  }
 0x15d   : > { %4364 = vmatprep.mubr.msk.bf16.mxu0 %vm4706_vm2, %v4704_v36  ;;  %4474 = vmatprep.mubr.msk.bf16.mxu1 %vm4706_vm2, %v4704_v36 }
 0x15e   : > { %v4146_v20 = vpop.f32.mrf.mxu0  ;;  %v4256_v21 = vpop.f32.mrf.mxu1 }
 0x15f   : > { %v4648_v20 = vld [vmem:[%s4982_s6 + $0x1d0] sm:$0xff]  }
 0x160   : > { %v5355_v24 = vpop.f32.mrf.mxu0  ;;  %v5357_v25 = vpop.f32.mrf.mxu1 }
 0x162   : > { %v4147_v37 = vpop.f32.mrf.mxu0  ;;  %v4257_v43 = vpop.f32.mrf.mxu1 }
 0x164   : > { %v5363_v44 = vpop.f32.mrf.mxu0  ;;  %v5365_v49 = vpop.f32.mrf.mxu1  ;;  %4365 = vmatmul.mubr.msk.bf16.gmra.mxu0 %vm1209_vm3, %v4644_v27  ;;  %4475 = vmatmul.mubr.msk.bf16.gmra.mxu1 %vm1209_vm3, %v4645_v28 }
 0x165   : > { %4368 = vmatprep.mubr.msk.bf16.mxu0 %vm4706_vm2, %v4704_v36  ;;  %4478 = vmatprep.mubr.msk.bf16.mxu1 %vm4706_vm2, %v4704_v36 }
 0x166   : > { %v4150_v60 = vpop.f32.mrf.mxu0  ;;  %v4260_v61 = vpop.f32.mrf.mxu1 }
 0x168   : > { %v5375_v3 = vpop.f32.mrf.mxu0  ;;  %v5377_v4 = vpop.f32.mrf.mxu1 }
 0x16a   : > { %v4151_v21 = vpop.f32.mrf.mxu0  ;;  %v4261_v27 = vpop.f32.mrf.mxu1 }
 0x16c   : > { %v5383_v28 = vpop.f32.mrf.mxu0  ;;  %v5385_v37 = vpop.f32.mrf.mxu1  ;;  %4369 = vmatmul.mubr.msk.bf16.gmra.mxu0 %vm1209_vm3, %v4646_v9  ;;  %4479 = vmatmul.mubr.msk.bf16.gmra.mxu1 %vm1209_vm3, %v4647_v12  ;;  %v4649_v9 = vld [vmem:[%s4982_s6 + $0x294] sm:$0xff]  }
 0x16d   : > { %4372 = vmatprep.mubr.msk.bf16.mxu0 %vm4706_vm2, %v4704_v36  ;;  %4482 = vmatprep.mubr.msk.bf16.mxu1 %vm4706_vm2, %v4704_v36 }
 0x16e   : > { %v4154_v60 = vpop.f32.mrf.mxu0  ;;  %v4264_v61 = vpop.f32.mrf.mxu1 }
 0x170   : > { %v5395_v21 = vpop.f32.mrf.mxu0  ;;  %v5397_v27 = vpop.f32.mrf.mxu1 }
 0x172   : > { %v4155_v43 = vpop.f32.mrf.mxu0  ;;  %v4265_v52 = vpop.f32.mrf.mxu1 }
 0x174   : > { %v5403_v35 = vpop.f32.mrf.mxu0  ;;  %v5405_v16 = vpop.f32.mrf.mxu1  ;;  %4373 = vmatmul.mubr.msk.bf16.gmra.mxu0 %vm1209_vm3, %v4648_v20  ;;  %4483 = vmatmul.mubr.msk.bf16.gmra.mxu1 %vm1209_vm3, %v4649_v9  ;;  %v4651_v20 = vld [vmem:[%s4982_s6 + $0x29c] sm:$0xff]  }
 0x175   : > { %4376 = vmatprep.mubr.msk.bf16.mxu0 %vm4706_vm2, %v4704_v36  ;;  %4486 = vmatprep.mubr.msk.bf16.mxu1 %vm4706_vm2, %v4704_v36 }
 0x176   : > { %v4158_v61 = vpop.f32.mrf.mxu0  ;;  %v4268_v43 = vpop.f32.mrf.mxu1 }
 0x178   : > { %v5415_v52 = vpop.f32.mrf.mxu0  ;;  %v5417_v12 = vpop.f32.mrf.mxu1 }
 0x17a   : > { %v4159_v60 = vpop.f32.mrf.mxu0  ;;  %v4269_v56 = vpop.f32.mrf.mxu1 }
 0x17c   : > { %v5423_v48 = vpop.f32.mrf.mxu0  ;;  %v5425_v31 = vpop.f32.mrf.mxu1  ;;  %4377 = vmatmul.mubr.msk.bf16.gmra.mxu0 %vm1209_vm3, %v4650_v8  ;;  %4487 = vmatmul.mubr.msk.bf16.gmra.mxu1 %vm1209_vm3, %v4651_v20  ;;  %v4653_v8 = vld [vmem:[%s4982_s6 + $0x2a4] sm:$0xff]  }
 0x17d   : > { %4380 = vmatprep.mubr.msk.bf16.mxu0 %vm4706_vm2, %v4704_v36  ;;  %4490 = vmatprep.mubr.msk.bf16.mxu1 %vm4706_vm2, %v4704_v36 }
 0x17e   : > { %v4162_v43 = vpop.f32.mrf.mxu0  ;;  %v4272_v60 = vpop.f32.mrf.mxu1 }
 0x180   : > { %v5435_v56 = vpop.f32.mrf.mxu0  ;;  %v5437_v9 = vpop.f32.mrf.mxu1 }
 0x182   : > { %v4163_v61 = vpop.f32.mrf.mxu0  ;;  %v4273_v19 = vpop.f32.mrf.mxu1 }
 0x184   : > { %v5443_v14 = vpop.f32.mrf.mxu0  ;;  %v5445_v7 = vpop.f32.mrf.mxu1  ;;  %4381 = vmatmul.mubr.msk.bf16.gmra.mxu0 %vm1209_vm3, %v4652_v26  ;;  %4491 = vmatmul.mubr.msk.bf16.gmra.mxu1 %vm1209_vm3, %v4653_v8  ;;  %v4655_v26 = vld [vmem:[%s4982_s6 + $0x2ac] sm:$0xff]  }
 0x185   : > { %6068 = vst [vmem:[#allocation3_spill] sm:$0xff] %v5445_v7  ;;  %4384 = vmatprep.mubr.msk.bf16.mxu0 %vm4706_vm2, %v4704_v36  ;;  %4494 = vmatprep.mubr.msk.bf16.mxu1 %vm4706_vm2, %v4704_v36 }
 0x186   : > { %v4166_v60 = vpop.f32.mrf.mxu0  ;;  %v4276_v61 = vpop.f32.mrf.mxu1 }
 0x188   : > { %v5455_v19 = vpop.f32.mrf.mxu0  ;;  %v5457_v20 = vpop.f32.mrf.mxu1 }
 0x189   : > { %6069 = vst [vmem:[#allocation4_spill] sm:$0xff] %v5455_v19  ;;  %6070 = vst [vmem:[#allocation5_spill] sm:$0xff] %v5457_v20 }
 0x18a   : > { %v4167_v43 = vpop.f32.mrf.mxu0  ;;  %v4277_v59 = vpop.f32.mrf.mxu1 }
 0x18c   : > { %v5463_v54 = vpop.f32.mrf.mxu0  ;;  %v5465_v47 = vpop.f32.mrf.mxu1  ;;  %4385 = vmatmul.mubr.msk.bf16.gmra.mxu0 %vm1209_vm3, %v4654_v2  ;;  %4495 = vmatmul.mubr.msk.bf16.gmra.mxu1 %vm1209_vm3, %v4655_v26  ;;  %v4657_v2 = vld [vmem:[%s4982_s6 + $0x2b4] sm:$0xff]  }
 0x18d   : > { %6071 = vst [vmem:[#allocation6_spill] sm:$0xff] %v5463_v54  ;;  %6072 = vst [vmem:[#allocation7_spill] sm:$0xff] %v5465_v47  ;;  %4388 = vmatprep.mubr.msk.bf16.mxu0 %vm4706_vm2, %v4704_v36  ;;  %4498 = vmatprep.mubr.msk.bf16.mxu1 %vm4706_vm2, %v4704_v36 }
 0x18e   : > { %v4170_v61 = vpop.f32.mrf.mxu0  ;;  %v4280_v43 = vpop.f32.mrf.mxu1 }
 0x190   : > { %v5475_v59 = vpop.f32.mrf.mxu0  ;;  %v5477_v8 = vpop.f32.mrf.mxu1 }
 0x191   : > { %6073 = vst [vmem:[#allocation8_spill] sm:$0xff] %v5475_v59  ;;  %6074 = vst [vmem:[#allocation9_spill] sm:$0xff] %v5477_v8  ;;  %v4658_v8 = vld [vmem:[%s4982_s6 + $0x1f8] sm:$0xff]  }
 0x192   : > { %v4171_v60 = vpop.f32.mrf.mxu0  ;;  %v4281_v34 = vpop.f32.mrf.mxu1 }
 0x194   : > { %v5483_v47 = vpop.f32.mrf.mxu0  ;;  %v5485_v54 = vpop.f32.mrf.mxu1  ;;  %4389 = vmatmul.mubr.msk.bf16.gmra.mxu0 %vm1209_vm3, %v4656_v42  ;;  %4499 = vmatmul.mubr.msk.bf16.gmra.mxu1 %vm1209_vm3, %v4657_v2  ;;  %v4659_v42 = vld [vmem:[%s4982_s6 + $0x2bc] sm:$0xff]  }
 0x195   : > { %6075 = vst [vmem:[#allocation10_spill] sm:$0xff] %v5483_v47  ;;  %6076 = vst [vmem:[#allocation11_spill] sm:$0xff] %v5485_v54  ;;  %4392 = vmatprep.mubr.msk.bf16.mxu0 %vm4706_vm2, %v4704_v36  ;;  %4502 = vmatprep.mubr.msk.bf16.mxu1 %vm4706_vm2, %v4704_v36 }
 0x196   : > { %v4174_v43 = vpop.f32.mrf.mxu0  ;;  %v4284_v60 = vpop.f32.mrf.mxu1 }
 0x198   : > { %v5495_v34 = vpop.f32.mrf.mxu0  ;;  %v5497_v26 = vpop.f32.mrf.mxu1 }
 0x199   : > { %6077 = vst [vmem:[#allocation12_spill] sm:$0xff] %v5495_v34  ;;  %6078 = vst [vmem:[#allocation13_spill] sm:$0xff] %v5497_v26  ;;  %v4660_v26 = vld [vmem:[%s4982_s6 + $0x200] sm:$0xff]  }
 0x19a   : > { %v4175_v61 = vpop.f32.mrf.mxu0  ;;  %v4285_v54 = vpop.f32.mrf.mxu1 }
 0x19c   : > { %v5503_v47 = vpop.f32.mrf.mxu0  ;;  %v5505_v59 = vpop.f32.mrf.mxu1  ;;  %4393 = vmatmul.mubr.msk.bf16.gmra.mxu0 %vm1209_vm3, %v4658_v8  ;;  %4503 = vmatmul.mubr.msk.bf16.gmra.mxu1 %vm1209_vm3, %v4659_v42  ;;  %v4661_v8 = vld [vmem:[%s4982_s6 + $0x2c4] sm:$0xff]  }
 0x19d   : > { %6079 = vst [vmem:[#allocation14_spill] sm:$0xff] %v5503_v47  ;;  %6080 = vst [vmem:[#allocation15_spill] sm:$0xff] %v5505_v59  ;;  %4396 = vmatprep.mubr.msk.bf16.mxu0 %vm4706_vm2, %v4704_v36  ;;  %4506 = vmatprep.mubr.msk.bf16.mxu1 %vm4706_vm2, %v4704_v36 }
 0x19e   : > { %v4178_v60 = vpop.f32.mrf.mxu0  ;;  %v4288_v61 = vpop.f32.mrf.mxu1 }
 0x1a0   : > { %v5515_v54 = vpop.f32.mrf.mxu0  ;;  %v5517_v2 = vpop.f32.mrf.mxu1 }
 0x1a1   : > { %6081 = vst [vmem:[#allocation16_spill] sm:$0xff] %v5515_v54  ;;  %6082 = vst [vmem:[#allocation17_spill] sm:$0xff] %v5517_v2  ;;  %v4662_v2 = vld [vmem:[%s4982_s6 + $0x208] sm:$0xff]  }
 0x1a2   : > { %v4179_v43 = vpop.f32.mrf.mxu0  ;;  %v4289_v59 = vpop.f32.mrf.mxu1 }
 0x1a4   : > { %v5523_v47 = vpop.f32.mrf.mxu0  ;;  %v5525_v34 = vpop.f32.mrf.mxu1  ;;  %4397 = vmatmul.mubr.msk.bf16.gmra.mxu0 %vm1209_vm3, %v4660_v26  ;;  %4507 = vmatmul.mubr.msk.bf16.gmra.mxu1 %vm1209_vm3, %v4661_v8  ;;  %v4663_v26 = vld [vmem:[%s4982_s6 + $0x2cc] sm:$0xff]  }
 0x1a5   : > { %6083 = vst [vmem:[#allocation18_spill] sm:$0xff] %v5523_v47  ;;  %6084 = vst [vmem:[#allocation19_spill] sm:$0xff] %v5525_v34  ;;  %4400 = vmatprep.mubr.msk.bf16.mxu0 %vm4706_vm2, %v4704_v36  ;;  %4510 = vmatprep.mubr.msk.bf16.mxu1 %vm4706_vm2, %v4704_v36 }
 0x1a6   : > { %v4182_v61 = vpop.f32.mrf.mxu0  ;;  %v4292_v43 = vpop.f32.mrf.mxu1 }
 0x1a8   : > { %v5535_v59 = vpop.f32.mrf.mxu0  ;;  %v5537_v42 = vpop.f32.mrf.mxu1 }
 0x1a9   : > { %6085 = vst [vmem:[#allocation20_spill] sm:$0xff] %v5535_v59  ;;  %6086 = vst [vmem:[#allocation21_spill] sm:$0xff] %v5537_v42  ;;  %v4664_v42 = vld [vmem:[%s4982_s6 + $0x210] sm:$0xff]  }
 0x1aa   : > { %v4183_v60 = vpop.f32.mrf.mxu0  ;;  %v4293_v34 = vpop.f32.mrf.mxu1 }
 0x1ac   : > { %v5543_v47 = vpop.f32.mrf.mxu0  ;;  %v5545_v54 = vpop.f32.mrf.mxu1  ;;  %4401 = vmatmul.mubr.msk.bf16.gmra.mxu0 %vm1209_vm3, %v4662_v2  ;;  %4511 = vmatmul.mubr.msk.bf16.gmra.mxu1 %vm1209_vm3, %v4663_v26  ;;  %v4665_v2 = vld [vmem:[%s4982_s6 + $0x2d4] sm:$0xff]  }
 0x1ad   : > { %6087 = vst [vmem:[#allocation22_spill] sm:$0xff] %v5543_v47  ;;  %6088 = vst [vmem:[#allocation23_spill] sm:$0xff] %v5545_v54  ;;  %4404 = vmatprep.mubr.msk.bf16.mxu0 %vm4706_vm2, %v4704_v36  ;;  %4514 = vmatprep.mubr.msk.bf16.mxu1 %vm4706_vm2, %v4704_v36 }
 0x1ae   : > { %v4186_v43 = vpop.f32.mrf.mxu0  ;;  %v4296_v60 = vpop.f32.mrf.mxu1 }
 0x1b0   : > { %v5555_v34 = vpop.f32.mrf.mxu0  ;;  %v5557_v8 = vpop.f32.mrf.mxu1 }
 0x1b1   : > { %6089 = vst [vmem:[#allocation24_spill] sm:$0xff] %v5555_v34  ;;  %6090 = vst [vmem:[#allocation25_spill] sm:$0xff] %v5557_v8  ;;  %v4666_v8 = vld [vmem:[%s4982_s6 + $0x218] sm:$0xff]  }
 0x1b2   : > { %v4187_v61 = vpop.f32.mrf.mxu0  ;;  %v4297_v54 = vpop.f32.mrf.mxu1 }
 0x1b4   : > { %v5563_v47 = vpop.f32.mrf.mxu0  ;;  %v5565_v59 = vpop.f32.mrf.mxu1  ;;  %4405 = vmatmul.mubr.msk.bf16.gmra.mxu0 %vm1209_vm3, %v4664_v42  ;;  %4515 = vmatmul.mubr.msk.bf16.gmra.mxu1 %vm1209_vm3, %v4665_v2  ;;  %v4667_v42 = vld [vmem:[%s4982_s6 + $0x2dc] sm:$0xff]  }
 0x1b5   : > { %6091 = vst [vmem:[#allocation26_spill] sm:$0xff] %v5563_v47  ;;  %6092 = vst [vmem:[#allocation27_spill] sm:$0xff] %v5565_v59  ;;  %4408 = vmatprep.mubr.msk.bf16.mxu0 %vm4706_vm2, %v4704_v36  ;;  %4518 = vmatprep.mubr.msk.bf16.mxu1 %vm4706_vm2, %v4704_v36 }
 0x1b6   : > { %v4190_v60 = vpop.f32.mrf.mxu0  ;;  %v4300_v61 = vpop.f32.mrf.mxu1 }
 0x1b8   : > { %v5575_v54 = vpop.f32.mrf.mxu0  ;;  %v5577_v26 = vpop.f32.mrf.mxu1 }
 0x1b9   : > { %6093 = vst [vmem:[#allocation28_spill] sm:$0xff] %v5575_v54  ;;  %6094 = vst [vmem:[#allocation29_spill] sm:$0xff] %v5577_v26  ;;  %v4668_v26 = vld [vmem:[%s4982_s6 + $0x220] sm:$0xff]  }
 0x1ba   : > { %v4191_v43 = vpop.f32.mrf.mxu0  ;;  %v4301_v59 = vpop.f32.mrf.mxu1 }
 0x1bc   : > { %v5583_v47 = vpop.f32.mrf.mxu0  ;;  %v5585_v34 = vpop.f32.mrf.mxu1  ;;  %4409 = vmatmul.mubr.msk.bf16.gmra.mxu0 %vm1209_vm3, %v4666_v8  ;;  %4519 = vmatmul.mubr.msk.bf16.gmra.mxu1 %vm1209_vm3, %v4667_v42  ;;  %v4669_v8 = vld [vmem:[%s4982_s6 + $0x2e4] sm:$0xff]  }
 0x1bd   : > { %6095 = vst [vmem:[#allocation30_spill] sm:$0xff] %v5583_v47  ;;  %6096 = vst [vmem:[#allocation31_spill] sm:$0xff] %v5585_v34  ;;  %4412 = vmatprep.mubr.msk.bf16.mxu0 %vm4706_vm2, %v4704_v36  ;;  %4522 = vmatprep.mubr.msk.bf16.mxu1 %vm4706_vm2, %v4704_v36 }
 0x1be   : > { %v4194_v61 = vpop.f32.mrf.mxu0  ;;  %v4304_v43 = vpop.f32.mrf.mxu1 }
 0x1c0   : > { %v5595_v59 = vpop.f32.mrf.mxu0  ;;  %v5597_v2 = vpop.f32.mrf.mxu1 }
 0x1c1   : > { %6097 = vst [vmem:[#allocation32_spill] sm:$0xff] %v5595_v59  ;;  %6098 = vst [vmem:[#allocation33_spill] sm:$0xff] %v5597_v2  ;;  %v4670_v2 = vld [vmem:[%s4982_s6 + $0x228] sm:$0xff]  }
 0x1c2   : > { %v4195_v60 = vpop.f32.mrf.mxu0  ;;  %v4305_v34 = vpop.f32.mrf.mxu1 }
 0x1c4   : > { %v5603_v47 = vpop.f32.mrf.mxu0  ;;  %v5605_v54 = vpop.f32.mrf.mxu1  ;;  %4413 = vmatmul.mubr.msk.bf16.gmra.mxu0 %vm1209_vm3, %v4668_v26  ;;  %4523 = vmatmul.mubr.msk.bf16.gmra.mxu1 %vm1209_vm3, %v4669_v8  ;;  %v4671_v26 = vld [vmem:[%s4982_s6 + $0x2ec] sm:$0xff]  }
 0x1c5   : > { %6099 = vst [vmem:[#allocation34_spill] sm:$0xff] %v5603_v47  ;;  %6100 = vst [vmem:[#allocation35_spill] sm:$0xff] %v5605_v54  ;;  %4416 = vmatprep.mubr.msk.bf16.mxu0 %vm4706_vm2, %v4704_v36  ;;  %4526 = vmatprep.mubr.msk.bf16.mxu1 %vm4706_vm2, %v4704_v36 }
 0x1c6   : > { %v4198_v43 = vpop.f32.mrf.mxu0  ;;  %v4308_v60 = vpop.f32.mrf.mxu1 }
 0x1c8   : > { %v5615_v34 = vpop.f32.mrf.mxu0  ;;  %v5617_v42 = vpop.f32.mrf.mxu1 }
 0x1c9   : > { %6101 = vst [vmem:[#allocation36_spill] sm:$0xff] %v5615_v34  ;;  %6102 = vst [vmem:[#allocation37_spill] sm:$0xff] %v5617_v42  ;;  %v4672_v42 = vld [vmem:[%s4982_s6 + $0x230] sm:$0xff]  }
 0x1ca   : > { %v4199_v61 = vpop.f32.mrf.mxu0  ;;  %v4309_v54 = vpop.f32.mrf.mxu1 }
 0x1cc   : > { %v5623_v47 = vpop.f32.mrf.mxu0  ;;  %v5625_v59 = vpop.f32.mrf.mxu1  ;;  %4417 = vmatmul.mubr.msk.bf16.gmra.mxu0 %vm1209_vm3, %v4670_v2  ;;  %4527 = vmatmul.mubr.msk.bf16.gmra.mxu1 %vm1209_vm3, %v4671_v26  ;;  %v4673_v2 = vld [vmem:[%s4982_s6 + $0x2f4] sm:$0xff]  }
 0x1cd   : > { %6103 = vst [vmem:[#allocation38_spill] sm:$0xff] %v5623_v47  ;;  %6104 = vst [vmem:[#allocation39_spill] sm:$0xff] %v5625_v59  ;;  %4420 = vmatprep.mubr.msk.bf16.mxu0 %vm4706_vm2, %v4704_v36  ;;  %4530 = vmatprep.mubr.msk.bf16.mxu1 %vm4706_vm2, %v4704_v36 }
 0x1ce   : > { %v4202_v60 = vpop.f32.mrf.mxu0  ;;  %v4312_v61 = vpop.f32.mrf.mxu1 }
 0x1d0   : > { %v5635_v54 = vpop.f32.mrf.mxu0  ;;  %v5637_v8 = vpop.f32.mrf.mxu1 }
 0x1d1   : > { %6105 = vst [vmem:[#allocation40_spill] sm:$0xff] %v5635_v54  ;;  %6106 = vst [vmem:[#allocation41_spill] sm:$0xff] %v5637_v8  ;;  %v4674_v8 = vld [vmem:[%s4982_s6 + $0x238] sm:$0xff]  }
 0x1d2   : > { %v4203_v43 = vpop.f32.mrf.mxu0  ;;  %v4313_v59 = vpop.f32.mrf.mxu1 }
 0x1d4   : > { %v5643_v47 = vpop.f32.mrf.mxu0  ;;  %v5645_v34 = vpop.f32.mrf.mxu1  ;;  %4421 = vmatmul.mubr.msk.bf16.gmra.mxu0 %vm1209_vm3, %v4672_v42  ;;  %4531 = vmatmul.mubr.msk.bf16.gmra.mxu1 %vm1209_vm3, %v4673_v2  ;;  %v4675_v42 = vld [vmem:[%s4982_s6 + $0x2fc] sm:$0xff]  }
 0x1d5   : > { %6107 = vst [vmem:[#allocation42_spill] sm:$0xff] %v5643_v47  ;;  %6108 = vst [vmem:[#allocation43_spill] sm:$0xff] %v5645_v34  ;;  %4424 = vmatprep.mubr.msk.bf16.mxu0 %vm4706_vm2, %v4704_v36  ;;  %4534 = vmatprep.mubr.msk.bf16.mxu1 %vm4706_vm2, %v4704_v36 }
 0x1d6   : > { %v4206_v61 = vpop.f32.mrf.mxu0  ;;  %v4316_v43 = vpop.f32.mrf.mxu1 }
 0x1d8   : > { %v5655_v59 = vpop.f32.mrf.mxu0  ;;  %v5657_v26 = vpop.f32.mrf.mxu1 }
 0x1d9   : > { %6109 = vst [vmem:[#allocation44_spill] sm:$0xff] %v5655_v59  ;;  %6110 = vst [vmem:[#allocation45_spill] sm:$0xff] %v5657_v26  ;;  %v4676_v26 = vld [vmem:[%s4982_s6 + $0x240] sm:$0xff]  }
 0x1da   : > { %v4207_v60 = vpop.f32.mrf.mxu0  ;;  %v4317_v34 = vpop.f32.mrf.mxu1 }
 0x1dc   : > { %v5663_v47 = vpop.f32.mrf.mxu0  ;;  %v5665_v54 = vpop.f32.mrf.mxu1  ;;  %4425 = vmatmul.mubr.msk.bf16.gmra.mxu0 %vm1209_vm3, %v4674_v8  ;;  %4535 = vmatmul.mubr.msk.bf16.gmra.mxu1 %vm1209_vm3, %v4675_v42  ;;  %v4677_v8 = vld [vmem:[%s4982_s6 + $0x304] sm:$0xff]  }
 0x1dd   : > { %6111 = vst [vmem:[#allocation46_spill] sm:$0xff] %v5663_v47  ;;  %6112 = vst [vmem:[#allocation47_spill] sm:$0xff] %v5665_v54  ;;  %4428 = vmatprep.mubr.msk.bf16.mxu0 %vm4706_vm2, %v4704_v36  ;;  %4538 = vmatprep.mubr.msk.bf16.mxu1 %vm4706_vm2, %v4704_v36 }
 0x1de   : > { %v4210_v43 = vpop.f32.mrf.mxu0  ;;  %v4320_v34 = vpop.f32.mrf.mxu1 }
 0x1e0   : > { %v5675_v60 = vpop.f32.mrf.mxu0  ;;  %v5677_v2 = vpop.f32.mrf.mxu1 }
 0x1e1   : > { %6113 = vst [vmem:[#allocation48_spill] sm:$0xff] %v5675_v60  ;;  %6114 = vst [vmem:[#allocation49_spill] sm:$0xff] %v5677_v2  ;;  %v4678_v2 = vld [vmem:[%s4982_s6 + $0x248] ss:$0 sps:$4 sm:$0xff]   ;;  %v4679_v60 = vld [vmem:[%s4982_s6 + $0x30c] ss:$0 sps:$4 sm:$0xff]  }
 0x1e2   : > { %v4211_v61 = vpop.f32.mrf.mxu0  ;;  %v4321_v54 = vpop.f32.mrf.mxu1 }
 0x1e4   : > { %v5683_v47 = vpop.f32.mrf.mxu0  ;;  %v5685_v59 = vpop.f32.mrf.mxu1  ;;  %4429 = vmatmul.mubr.msk.bf16.gmra.mxu0 %vm1209_vm3, %v4676_v26  ;;  %4539 = vmatmul.mubr.msk.bf16.gmra.mxu1 %vm1209_vm3, %v4677_v8 }
 0x1e5   : > { %6115 = vst [vmem:[#allocation50_spill] sm:$0xff] %v5683_v47  ;;  %6116 = vst [vmem:[#allocation51_spill] sm:$0xff] %v5685_v59  ;;  %4432 = vmatprep.mubr.msk.bf16.mxu0 %vm4706_vm2, %v4704_v36  ;;  %4542 = vmatprep.mubr.msk.bf16.mxu1 %vm4706_vm2, %v4704_v36  ;;  %v6117_v36 = vmax.f32 %v5203_v32, %v5206_v33 }
 0x1e6   : > { %v4214_v54 = vpop.f32.mrf.mxu0  ;;  %v4324_v61 = vpop.f32.mrf.mxu1 }
 0x1e8   : > { %v1521_v34 = vpop.f32.mrf.mxu0  ;;  %v2001_v42 = vpop.f32.mrf.mxu1 }
 0x1e9   : > { %v5707_v42 = vld [vmem:[%s6017_s2] ss:$0 sm:$0xff] }
 0x1ea   : > { %v4215_v26 = vpop.f32.mrf.mxu0  ;;  %v4325_v8 = vpop.f32.mrf.mxu1 }
 0x1ec   : > { %v2335_v20 = vpop.f32.mrf.mxu0  ;;  %4433 = vmatmul.mubr.msk.bf16.gmra.mxu0 %vm1209_vm3, %v4678_v2  ;;  %v2864_v43 = vpop.f32.mrf.mxu1  ;;  %4543 = vmatmul.mubr.msk.bf16.gmra.mxu1 %vm1209_vm3, %v4679_v60  ;;  %v6118_v60 = vmax.f32 %v5215_v38, %v5217_v39  ;;  %v6119_v38 = vmax.f32 %v5223_v45, %v5225_v46 }
 0x1ed   : > { %v2533_v59 = vmax.f32 %v6117_v36, %v2335_v20 }
 0x1ee   : > { %v4338_v54 = vpop.f32.mrf.mxu0  ;;  %v4448_v61 = vpop.f32.mrf.mxu1 }
 0x1ef   : > { %v3062_v34 = vmax.f32 %v2533_v59, %v2864_v43 }
 0x1f0   : > { %v2338_v26 = vpop.f32.mrf.mxu0  ;;  %v2867_v8 = vpop.f32.mrf.mxu1 }
 0x1f1   : > { %v3118_v2 = vadd.f32 %v5707_v42, %v3062_v34  ;;  %v2534_v47 = vmax.f32 %v6118_v60, %v2338_v26 }
 0x1f2   : > { %v4339_v32 = vpop.f32.mrf.mxu0  ;;  %v4449_v33 = vpop.f32.mrf.mxu1 }
 0x1f3   : > { %v3167_v20 = vmax.f32 %v3118_v2, 0.0  ;;  %v3063_v36 = vmax.f32 %v2534_v47, %v2867_v8 }
 0x1f4   : > { %v2343_v59 = vpop.f32.mrf.mxu0  ;;  %v2872_v43 = vpop.f32.mrf.mxu1 }
 0x1f5   : > { %v3937_v54 = vpack.c.bf16 %v3167_v20, %v3167_v20  ;;  %v3119_v61 = vadd.f32 %v5707_v42, %v3063_v36  ;;  %v2535_v39 = vmax.f32 %v6119_v38, %v2343_v59  ;;  %v6120_v20 = vmax.f32 %v5235_v50, %v5237_v51 }
 0x1f6   : > { %v4342_v34 = vpop.f32.mrf.mxu0  ;;  %v4452_v26 = vpop.f32.mrf.mxu1  ;;  %v6121_v38 = vmax.f32 %v5243_v57, %v5245_v58 }
 0x1f7   : > { %3414 = vst.msk [vmem:[%s5716_s22] sm:$0xf] %vm3413_vm4, %v3937_v54  ;;  %v3168_v47 = vmax.f32 %v3119_v61, 0.0  ;;  %v3064_v8 = vmax.f32 %v2535_v39, %v2872_v43 }
 0x1f8   : > { %v2346_v2 = vpop.f32.mrf.mxu0  ;;  %v2875_v60 = vpop.f32.mrf.mxu1 }
 0x1f9   : > { %v3938_v32 = vpack.c.bf16 %v3168_v47, %v3168_v47  ;;  %v3120_v33 = vadd.f32 %v5707_v42, %v3064_v8  ;;  %v2536_v36 = vmax.f32 %v6120_v20, %v2346_v2  ;;  %v6122_v2 = vmax.f32 %v5255_v62, %v5257_v63 }
 0x1fa   : > { %v4343_v19 = vpop.f32.mrf.mxu0  ;;  %v4453_v7 = vpop.f32.mrf.mxu1 }
 0x1fb   : > { %3415 = vst.msk [vmem:[%s5716_s22 + $0x4] sm:$0xf] %vm3413_vm4, %v3938_v32  ;;  %v3169_v45 = vmax.f32 %v3120_v33, 0.0  ;;  %v3065_v46 = vmax.f32 %v2536_v36, %v2875_v60 }
 0x1fc   : > { %v2351_v59 = vpop.f32.mrf.mxu0  ;;  %v2880_v54 = vpop.f32.mrf.mxu1 }
 0x1fd   : > { %v3939_v43 = vpack.c.bf16 %v3169_v45, %v3169_v45  ;;  %v3121_v61 = vadd.f32 %v5707_v42, %v3065_v46  ;;  %v2537_v39 = vmax.f32 %v6121_v38, %v2351_v59  ;;  %v6123_v59 = vmax.f32 %v5263_v5, %v5265_v6 }
 0x1fe   : > { %v4346_v34 = vpop.f32.mrf.mxu0  ;;  %v4456_v26 = vpop.f32.mrf.mxu1 }
 0x1ff   : > { %3416 = vst.msk [vmem:[%s5716_s22 + $0x8] sm:$0xf] %vm3413_vm4, %v3939_v43  ;;  %v3170_v50 = vmax.f32 %v3121_v61, 0.0  ;;  %v3066_v51 = vmax.f32 %v2537_v39, %v2880_v54 }
 0x200   : > { %v2354_v7 = vpop.f32.mrf.mxu0  ;;  %v2883_v19 = vpop.f32.mrf.mxu1 }
 0x201   : > { %v3940_v47 = vpack.c.bf16 %v3170_v50, %v3170_v50  ;;  %v3122_v8 = vadd.f32 %v5707_v42, %v3066_v51  ;;  %v2538_v60 = vmax.f32 %v6122_v2, %v2354_v7  ;;  %v6124_v50 = vmax.f32 %v5275_v10, %v5277_v11 }
 0x202   : > { %v4347_v32 = vpop.f32.mrf.mxu0  ;;  %v4457_v33 = vpop.f32.mrf.mxu1 }
 0x203   : > { %3417 = vst.msk [vmem:[%s5716_s22 + $0xc] sm:$0xf] %vm3413_vm4, %v3940_v47  ;;  %v3171_v57 = vmax.f32 %v3122_v8, 0.0  ;;  %v3067_v58 = vmax.f32 %v2538_v60, %v2883_v19  ;;  %v6125_v32 = vmax.f32 %v5283_v17, %v5285_v18 }
 0x204   : > { %v2359_v20 = vpop.f32.mrf.mxu0  ;;  %v2888_v36 = vpop.f32.mrf.mxu1 }
 0x205   : > { %v3941_v45 = vpack.c.bf16 %v3171_v57, %v3171_v57  ;;  %v3123_v46 = vadd.f32 %v5707_v42, %v3067_v58  ;;  %v2539_v54 = vmax.f32 %v6123_v59, %v2359_v20  ;;  %v6126_v59 = vmax.f32 %v5295_v22, %v5297_v23 }
 0x206   : > { %v4350_v43 = vpop.f32.mrf.mxu0  ;;  %v4460_v61 = vpop.f32.mrf.mxu1 }
 0x207   : > { %3418 = vst.msk [vmem:[%s5716_s22 + $0x10] sm:$0xf] %vm3413_vm4, %v3941_v45  ;;  %v3172_v62 = vmax.f32 %v3123_v46, 0.0  ;;  %v3068_v63 = vmax.f32 %v2539_v54, %v2888_v36 }
 0x208   : > { %v2362_v38 = vpop.f32.mrf.mxu0  ;;  %v2891_v39 = vpop.f32.mrf.mxu1 }
 0x209   : > { %v3942_v34 = vpack.c.bf16 %v3172_v62, %v3172_v62  ;;  %v3124_v26 = vadd.f32 %v5707_v42, %v3068_v63  ;;  %v2540_v51 = vmax.f32 %v6124_v50, %v2362_v38 }
 0x20a   : > { %v4351_v7 = vpop.f32.mrf.mxu0  ;;  %v4461_v19 = vpop.f32.mrf.mxu1 }
 0x20b   : > { %3419 = vst.msk [vmem:[%s5716_s22 + $0x14] sm:$0xf] %vm3413_vm4, %v3942_v34  ;;  %v3173_v5 = vmax.f32 %v3124_v26, 0.0  ;;  %v3069_v6 = vmax.f32 %v2540_v51, %v2891_v39  ;;  %v6127_v34 = vmax.f32 %v5303_v29, %v5305_v30 }
 0x20c   : > { %v2367_v47 = vpop.f32.mrf.mxu0  ;;  %v2896_v8 = vpop.f32.mrf.mxu1 }
 0x20d   : > { %v3943_v2 = vpack.c.bf16 %v3173_v5, %v3173_v5  ;;  %v3125_v60 = vadd.f32 %v5707_v42, %v3069_v6  ;;  %v2541_v33 = vmax.f32 %v6125_v32, %v2367_v47  ;;  %v6128_v47 = vmax.f32 %v5315_v40, %v5317_v41 }
 0x20e   : > { %v4354_v57 = vpop.f32.mrf.mxu0  ;;  %v4464_v58 = vpop.f32.mrf.mxu1 }
 0x20f   : > { %3420 = vst.msk [vmem:[%s5716_s22 + $0x18] sm:$0xf] %vm3413_vm4, %v3943_v2  ;;  %v3174_v10 = vmax.f32 %v3125_v60, 0.0  ;;  %v3070_v11 = vmax.f32 %v2541_v33, %v2896_v8 }
 0x210   : > { %v2370_v20 = vpop.f32.mrf.mxu0  ;;  %v2899_v36 = vpop.f32.mrf.mxu1 }
 0x211   : > { %v3944_v45 = vpack.c.bf16 %v3174_v10, %v3174_v10  ;;  %v3126_v46 = vadd.f32 %v5707_v42, %v3070_v11  ;;  %v2542_v54 = vmax.f32 %v6126_v59, %v2370_v20  ;;  %v6129_v10 = vmax.f32 %v5323_v53, %v5325_v55 }
 0x212   : > { %v4355_v43 = vpop.f32.mrf.mxu0  ;;  %v4465_v61 = vpop.f32.mrf.mxu1 }
 0x213   : > { %3421 = vst.msk [vmem:[%s5716_s22 + $0x1c] sm:$0xf] %vm3413_vm4, %v3944_v45  ;;  %v3175_v17 = vmax.f32 %v3126_v46, 0.0  ;;  %v3071_v18 = vmax.f32 %v2542_v54, %v2899_v36  ;;  %v6130_v43 = vmax.f32 %v5335_v0, %v5337_v1 }
 0x214   : > { %v2375_v62 = vpop.f32.mrf.mxu0  ;;  %v2904_v63 = vpop.f32.mrf.mxu1 }
 0x215   : > { %v3945_v38 = vpack.c.bf16 %v3175_v17, %v3175_v17  ;;  %v3127_v39 = vadd.f32 %v5707_v42, %v3071_v18  ;;  %v2543_v26 = vmax.f32 %v6127_v34, %v2375_v62  ;;  %v6131_v34 = vmax.f32 %v5343_v13, %v5345_v15 }
 0x216   : > { %v4358_v50 = vpop.f32.mrf.mxu0  ;;  %v4468_v51 = vpop.f32.mrf.mxu1 }
 0x217   : > { %3422 = vst.msk [vmem:[%s5716_s22 + $0x20] sm:$0xf] %vm3413_vm4, %v3945_v38  ;;  %v3176_v22 = vmax.f32 %v3127_v39, 0.0  ;;  %v3072_v23 = vmax.f32 %v2543_v26, %v2904_v63 }
 0x218   : > { %v2378_v7 = vpop.f32.mrf.mxu0  ;;  %v2907_v19 = vpop.f32.mrf.mxu1 }
 0x219   : > { %v3946_v5 = vpack.c.bf16 %v3176_v22, %v3176_v22  ;;  %v3128_v6 = vadd.f32 %v5707_v42, %v3072_v23  ;;  %v2544_v8 = vmax.f32 %v6128_v47, %v2378_v7 }
 0x21a   : > { %v4359_v2 = vpop.f32.mrf.mxu0  ;;  %v4469_v60 = vpop.f32.mrf.mxu1 }
 0x21b   : > { %3423 = vst.msk [vmem:[%s5716_s22 + $0x24] sm:$0xf] %vm3413_vm4, %v3946_v5  ;;  %v3177_v29 = vmax.f32 %v3128_v6, 0.0  ;;  %v3073_v30 = vmax.f32 %v2544_v8, %v2907_v19  ;;  %v6132_v5 = vmax.f32 %v5355_v24, %v5357_v25 }
 0x21c   : > { %v2383_v32 = vpop.f32.mrf.mxu0  ;;  %v2912_v33 = vpop.f32.mrf.mxu1 }
 0x21d   : > { %v3947_v57 = vpack.c.bf16 %v3177_v29, %v3177_v29  ;;  %v3129_v58 = vadd.f32 %v5707_v42, %v3073_v30  ;;  %v2545_v11 = vmax.f32 %v6129_v10, %v2383_v32  ;;  %v6133_v32 = vmax.f32 %v5363_v44, %v5365_v49 }
 0x21e   : > { %v4362_v20 = vpop.f32.mrf.mxu0  ;;  %v4472_v36 = vpop.f32.mrf.mxu1 }
 0x21f   : > { %3424 = vst.msk [vmem:[%s5716_s22 + $0x28] sm:$0xf] %vm3413_vm4, %v3947_v57  ;;  %v3178_v40 = vmax.f32 %v3129_v58, 0.0  ;;  %v3074_v41 = vmax.f32 %v2545_v11, %v2912_v33 }
 0x220   : > { %v2386_v45 = vpop.f32.mrf.mxu0  ;;  %v2915_v46 = vpop.f32.mrf.mxu1 }
 0x221   : > { %v3948_v59 = vpack.c.bf16 %v3178_v40, %v3178_v40  ;;  %v3130_v54 = vadd.f32 %v5707_v42, %v3074_v41  ;;  %v2546_v61 = vmax.f32 %v6130_v43, %v2386_v45  ;;  %v6134_v40 = vmax.f32 %v5375_v3, %v5377_v4 }
 0x222   : > { %v4363_v17 = vpop.f32.mrf.mxu0  ;;  %v4473_v18 = vpop.f32.mrf.mxu1 }
 0x223   : > { %3425 = vst.msk [vmem:[%s5716_s22 + $0x2c] sm:$0xf] %vm3413_vm4, %v3948_v59  ;;  %v3179_v53 = vmax.f32 %v3130_v54, 0.0  ;;  %v3075_v55 = vmax.f32 %v2546_v61, %v2915_v46  ;;  %v6135_v17 = vmax.f32 %v5383_v28, %v5385_v37 }
 0x224   : > { %v2391_v62 = vpop.f32.mrf.mxu0  ;;  %v2920_v63 = vpop.f32.mrf.mxu1 }
 0x225   : > { %v3949_v38 = vpack.c.bf16 %v3179_v53, %v3179_v53  ;;  %v3131_v39 = vadd.f32 %v5707_v42, %v3075_v55  ;;  %v2547_v26 = vmax.f32 %v6131_v34, %v2391_v62  ;;  %v6136_v34 = vmax.f32 %v5395_v21, %v5397_v27 }
 0x226   : > { %v4366_v50 = vpop.f32.mrf.mxu0  ;;  %v4476_v51 = vpop.f32.mrf.mxu1 }
 0x227   : > { %3426 = vst.msk [vmem:[%s5716_s22 + $0x30] sm:$0xf] %vm3413_vm4, %v3949_v38  ;;  %v3180_v0 = vmax.f32 %v3131_v39, 0.0  ;;  %v3076_v1 = vmax.f32 %v2547_v26, %v2920_v63 }
 0x228   : > { %v2394_v22 = vpop.f32.mrf.mxu0  ;;  %v2923_v23 = vpop.f32.mrf.mxu1 }
 0x229   : > { %v3950_v7 = vpack.c.bf16 %v3180_v0, %v3180_v0  ;;  %v3132_v19 = vadd.f32 %v5707_v42, %v3076_v1  ;;  %v2548_v6 = vmax.f32 %v6132_v5, %v2394_v22 }
 0x22a   : > { %v4367_v47 = vpop.f32.mrf.mxu0  ;;  %v4477_v8 = vpop.f32.mrf.mxu1 }
 0x22b   : > { %3427 = vst.msk [vmem:[%s5716_s22 + $0x34] sm:$0xf] %vm3413_vm4, %v3950_v7  ;;  %v3181_v13 = vmax.f32 %v3132_v19, 0.0  ;;  %v3077_v15 = vmax.f32 %v2548_v6, %v2923_v23  ;;  %v6137_v7 = vmax.f32 %v5403_v35, %v5405_v16 }
 0x22c   : > { %v2399_v2 = vpop.f32.mrf.mxu0  ;;  %v2928_v60 = vpop.f32.mrf.mxu1 }
 0x22d   : > { %v3951_v29 = vpack.c.bf16 %v3181_v13, %v3181_v13  ;;  %v3133_v30 = vadd.f32 %v5707_v42, %v3077_v15  ;;  %v2549_v33 = vmax.f32 %v6133_v32, %v2399_v2  ;;  %v6138_v2 = vmax.f32 %v5415_v52, %v5417_v12 }
 0x22e   : > { %v4370_v57 = vpop.f32.mrf.mxu0  ;;  %v4480_v58 = vpop.f32.mrf.mxu1 }
 0x22f   : > { %3428 = vst.msk [vmem:[%s5716_s22 + $0x38] sm:$0xf] %vm3413_vm4, %v3951_v29  ;;  %v3182_v24 = vmax.f32 %v3133_v30, 0.0  ;;  %v3078_v25 = vmax.f32 %v2549_v33, %v2928_v60 }
 0x230   : > { %v2402_v10 = vpop.f32.mrf.mxu0  ;;  %v2931_v11 = vpop.f32.mrf.mxu1 }
 0x231   : > { %v3952_v20 = vpack.c.bf16 %v3182_v24, %v3182_v24  ;;  %v3134_v36 = vadd.f32 %v5707_v42, %v3078_v25  ;;  %v2550_v41 = vmax.f32 %v6134_v40, %v2402_v10  ;;  %v6139_v24 = vmax.f32 %v5423_v48, %v5425_v31 }
 0x232   : > { %v4371_v45 = vpop.f32.mrf.mxu0  ;;  %v4481_v46 = vpop.f32.mrf.mxu1 }
 0x233   : > { %3429 = vst.msk [vmem:[%s5716_s22 + $0x3c] sm:$0xf] %vm3413_vm4, %v3952_v20  ;;  %v3183_v44 = vmax.f32 %v3134_v36, 0.0  ;;  %v3079_v49 = vmax.f32 %v2550_v41, %v2931_v11  ;;  %v6140_v45 = vmax.f32 %v5435_v56, %v5437_v9 }
 0x234   : > { %v2407_v59 = vpop.f32.mrf.mxu0  ;;  %v2936_v54 = vpop.f32.mrf.mxu1 }
 0x235   : > { %v3953_v43 = vpack.c.bf16 %v3183_v44, %v3183_v44  ;;  %v3135_v61 = vadd.f32 %v5707_v42, %v3079_v49  ;;  %v2551_v18 = vmax.f32 %v6135_v17, %v2407_v59  ;;  %v6141_v17 = vld [vmem:[#allocation3_spill] sm:$0xff] }
 0x236   : > { %v4374_v53 = vpop.f32.mrf.mxu0  ;;  %v4484_v55 = vpop.f32.mrf.mxu1 }
 0x237   : > { %3430 = vst.msk [vmem:[%s5716_s22 + $0x40] sm:$0xf] %vm3413_vm4, %v3953_v43  ;;  %v3184_v3 = vmax.f32 %v3135_v61, 0.0  ;;  %v3080_v4 = vmax.f32 %v2551_v18, %v2936_v54  ;;  %v6142_v18 = vmax.f32 %v5443_v14, %v6141_v17 }
 0x238   : > { %v2410_v62 = vpop.f32.mrf.mxu0  ;;  %v2939_v63 = vpop.f32.mrf.mxu1 }
 0x239   : > { %v3954_v38 = vpack.c.bf16 %v3184_v3, %v3184_v3  ;;  %v3136_v39 = vadd.f32 %v5707_v42, %v3080_v4  ;;  %v2552_v26 = vmax.f32 %v6136_v34, %v2410_v62  ;;  %v6144_v34 = vld [vmem:[#allocation5_spill] sm:$0xff] }
 0x23a   : > { %v4375_v50 = vpop.f32.mrf.mxu0  ;;  %v4485_v51 = vpop.f32.mrf.mxu1 }
 0x23b   : > { %3431 = vst.msk [vmem:[%s5716_s22 + $0x44] sm:$0xf] %vm3413_vm4, %v3954_v38  ;;  %v3185_v28 = vmax.f32 %v3136_v39, 0.0  ;;  %v3081_v37 = vmax.f32 %v2552_v26, %v2939_v63  ;;  %v6143_v39 = vld [vmem:[#allocation4_spill] sm:$0xff] }
 0x23c   : > { %v2415_v0 = vpop.f32.mrf.mxu0  ;;  %v2944_v1 = vpop.f32.mrf.mxu1  ;;  %v6145_v26 = vmax.f32 %v6143_v39, %v6144_v34 }
 0x23d   : > { %v3955_v22 = vpack.c.bf16 %v3185_v28, %v3185_v28  ;;  %v3137_v23 = vadd.f32 %v5707_v42, %v3081_v37  ;;  %v2553_v19 = vmax.f32 %v6137_v7, %v2415_v0  ;;  %v6146_v7 = vld [vmem:[#allocation6_spill] sm:$0xff] }
 0x23e   : > { %v4378_v5 = vpop.f32.mrf.mxu0  ;;  %v4488_v6 = vpop.f32.mrf.mxu1 }
 0x23f   : > { %3432 = vst.msk [vmem:[%s5716_s22 + $0x48] sm:$0xf] %vm3413_vm4, %v3955_v22  ;;  %v3186_v21 = vmax.f32 %v3137_v23, 0.0  ;;  %v3082_v27 = vmax.f32 %v2553_v19, %v2944_v1  ;;  %v6147_v19 = vld [vmem:[#allocation7_spill] sm:$0xff] }
 0x240   : > { %v2418_v47 = vpop.f32.mrf.mxu0  ;;  %v2947_v8 = vpop.f32.mrf.mxu1  ;;  %v6148_v5 = vmax.f32 %v6146_v7, %v6147_v19 }
 0x241   : > { %v3956_v13 = vpack.c.bf16 %v3186_v21, %v3186_v21  ;;  %v3138_v15 = vadd.f32 %v5707_v42, %v3082_v27  ;;  %v2554_v60 = vmax.f32 %v6138_v2, %v2418_v47 }
 0x242   : > { %v4379_v29 = vpop.f32.mrf.mxu0  ;;  %v4489_v30 = vpop.f32.mrf.mxu1 }
 0x243   : > { %3433 = vst.msk [vmem:[%s5716_s22 + $0x4c] sm:$0xf] %vm3413_vm4, %v3956_v13  ;;  %v3187_v16 = vmax.f32 %v3138_v15, 0.0  ;;  %v3083_v35 = vmax.f32 %v2554_v60, %v2947_v8  ;;  %v6149_v29 = vld [vmem:[#allocation8_spill] sm:$0xff]  ;;  %v6150_v30 = vld [vmem:[#allocation9_spill] sm:$0xff] }
 0x244   : > { %v2423_v32 = vpop.f32.mrf.mxu0  ;;  %v2952_v33 = vpop.f32.mrf.mxu1 }
 0x245   : > { %v3957_v57 = vpack.c.bf16 %v3187_v16, %v3187_v16  ;;  %v3139_v58 = vadd.f32 %v5707_v42, %v3083_v35  ;;  %v2555_v25 = vmax.f32 %v6139_v24, %v2423_v32  ;;  %v6151_v16 = vmax.f32 %v6149_v29, %v6150_v30 }
 0x246   : > { %v4382_v10 = vpop.f32.mrf.mxu0  ;;  %v4492_v11 = vpop.f32.mrf.mxu1 }
 0x247   : > { %3434 = vst.msk [vmem:[%s5716_s22 + $0x50] sm:$0xf] %vm3413_vm4, %v3957_v57  ;;  %v3188_v12 = vmax.f32 %v3139_v58, 0.0  ;;  %v3084_v52 = vmax.f32 %v2555_v25, %v2952_v33 }
 0x248   : > { %v2426_v20 = vpop.f32.mrf.mxu0  ;;  %v2955_v36 = vpop.f32.mrf.mxu1 }
 0x249   : > { %v3958_v40 = vpack.c.bf16 %v3188_v12, %v3188_v12  ;;  %v3140_v41 = vadd.f32 %v5707_v42, %v3084_v52  ;;  %v2556_v46 = vmax.f32 %v6140_v45, %v2426_v20  ;;  %v6152_v12 = vld [vmem:[#allocation10_spill] sm:$0xff]  ;;  %v6153_v52 = vld [vmem:[#allocation11_spill] sm:$0xff] }
 0x24a   : > { %v4383_v44 = vpop.f32.mrf.mxu0  ;;  %v4493_v49 = vpop.f32.mrf.mxu1  ;;  %v6154_v20 = vmax.f32 %v6152_v12, %v6153_v52 }
 0x24b   : > { %3435 = vst.msk [vmem:[%s5716_s22 + $0x54] sm:$0xf] %vm3413_vm4, %v3958_v40  ;;  %v3189_v31 = vmax.f32 %v3140_v41, 0.0  ;;  %v3085_v48 = vmax.f32 %v2556_v46, %v2955_v36 }
 0x24c   : > { %v2431_v59 = vpop.f32.mrf.mxu0  ;;  %v2960_v54 = vpop.f32.mrf.mxu1 }
 0x24d   : > { %v3959_v43 = vpack.c.bf16 %v3189_v31, %v3189_v31  ;;  %v3141_v61 = vadd.f32 %v5707_v42, %v3085_v48  ;;  %v2557_v53 = vmax.f32 %v6142_v18, %v2431_v59  ;;  %v6155_v59 = vld [vmem:[#allocation12_spill] sm:$0xff] }
 0x24e   : > { %v4386_v55 = vpop.f32.mrf.mxu0  ;;  %v4496_v3 = vpop.f32.mrf.mxu1 }
 0x24f   : > { %3436 = vst.msk [vmem:[%s5716_s22 + $0x58] sm:$0xf] %vm3413_vm4, %v3959_v43  ;;  %v3190_v9 = vmax.f32 %v3141_v61, 0.0  ;;  %v3086_v56 = vmax.f32 %v2557_v53, %v2960_v54  ;;  %v6156_v54 = vld [vmem:[#allocation13_spill] sm:$0xff] }
 0x250   : > { %v2434_v4 = vpop.f32.mrf.mxu0  ;;  %v2963_v62 = vpop.f32.mrf.mxu1  ;;  %v6157_v43 = vmax.f32 %v6155_v59, %v6156_v54 }
 0x251   : > { %v3960_v63 = vpack.c.bf16 %v3190_v9, %v3190_v9  ;;  %v3142_v38 = vadd.f32 %v5707_v42, %v3086_v56  ;;  %v2558_v50 = vmax.f32 %v6145_v26, %v2434_v4 }
 0x252   : > { %v4387_v51 = vpop.f32.mrf.mxu0  ;;  %v4497_v28 = vpop.f32.mrf.mxu1 }
 0x253   : > { %3437 = vst.msk [vmem:[%s5716_s22 + $0x5c] sm:$0xf] %vm3413_vm4, %v3960_v63  ;;  %v3191_v14 = vmax.f32 %v3142_v38, 0.0  ;;  %v3087_v37 = vmax.f32 %v2558_v50, %v2963_v62  ;;  %v6158_v62 = vld [vmem:[#allocation14_spill] sm:$0xff]  ;;  %v6159_v63 = vld [vmem:[#allocation15_spill] sm:$0xff] }
 0x254   : > { %v2439_v0 = vpop.f32.mrf.mxu0  ;;  %v2968_v1 = vpop.f32.mrf.mxu1  ;;  %v6160_v38 = vmax.f32 %v6158_v62, %v6159_v63 }
 0x255   : > { %v3961_v22 = vpack.c.bf16 %v3191_v14, %v3191_v14  ;;  %v3143_v23 = vadd.f32 %v5707_v42, %v3087_v37  ;;  %v2559_v6 = vmax.f32 %v6148_v5, %v2439_v0 }
 0x256   : > { %v4390_v21 = vpop.f32.mrf.mxu0  ;;  %v4500_v27 = vpop.f32.mrf.mxu1 }
 0x257   : > { %3438 = vst.msk [vmem:[%s5716_s22 + $0x60] sm:$0xf] %vm3413_vm4, %v3961_v22  ;;  %v3192_v47 = vmax.f32 %v3143_v23, 0.0  ;;  %v3088_v8 = vmax.f32 %v2559_v6, %v2968_v1  ;;  %v6161_v1 = vld [vmem:[#allocation16_spill] sm:$0xff]  ;;  %v6162_v22 = vld [vmem:[#allocation17_spill] sm:$0xff] }
 0x258   : > { %v2442_v13 = vpop.f32.mrf.mxu0  ;;  %v2971_v15 = vpop.f32.mrf.mxu1  ;;  %v6163_v23 = vmax.f32 %v6161_v1, %v6162_v22 }
 0x259   : > { %v3962_v2 = vpack.c.bf16 %v3192_v47, %v3192_v47  ;;  %v3144_v60 = vadd.f32 %v5707_v42, %v3088_v8  ;;  %v2560_v35 = vmax.f32 %v6151_v16, %v2442_v13 }
 0x25a   : > { %v4391_v32 = vpop.f32.mrf.mxu0  ;;  %v4501_v33 = vpop.f32.mrf.mxu1 }
 0x25b   : > { %3439 = vst.msk [vmem:[%s5716_s22 + $0x64] sm:$0xf] %vm3413_vm4, %v3962_v2  ;;  %v3193_v57 = vmax.f32 %v3144_v60, 0.0  ;;  %v3089_v58 = vmax.f32 %v2560_v35, %v2971_v15  ;;  %v6164_v15 = vld [vmem:[#allocation18_spill] sm:$0xff]  ;;  %v6165_v2 = vld [vmem:[#allocation19_spill] sm:$0xff] }
 0x25c   : > { %v2447_v24 = vpop.f32.mrf.mxu0  ;;  %v2976_v25 = vpop.f32.mrf.mxu1  ;;  %v6166_v60 = vmax.f32 %v6164_v15, %v6165_v2 }
 0x25d   : > { %v3963_v10 = vpack.c.bf16 %v3193_v57, %v3193_v57  ;;  %v3145_v11 = vadd.f32 %v5707_v42, %v3089_v58  ;;  %v2561_v36 = vmax.f32 %v6154_v20, %v2447_v24 }
 0x25e   : > { %v4394_v40 = vpop.f32.mrf.mxu0  ;;  %v4504_v41 = vpop.f32.mrf.mxu1 }
 0x25f   : > { %3440 = vst.msk [vmem:[%s5716_s22 + $0x68] sm:$0xf] %vm3413_vm4, %v3963_v10  ;;  %v3194_v45 = vmax.f32 %v3145_v11, 0.0  ;;  %v3090_v46 = vmax.f32 %v2561_v36, %v2976_v25  ;;  %v6167_v25 = vld [vmem:[#allocation20_spill] sm:$0xff]  ;;  %v6168_v10 = vld [vmem:[#allocation21_spill] sm:$0xff] }
 0x260   : > { %v2450_v44 = vpop.f32.mrf.mxu0  ;;  %v2979_v49 = vpop.f32.mrf.mxu1  ;;  %v6169_v11 = vmax.f32 %v6167_v25, %v6168_v10 }
 0x261   : > { %v3964_v31 = vpack.c.bf16 %v3194_v45, %v3194_v45  ;;  %v3146_v48 = vadd.f32 %v5707_v42, %v3090_v46  ;;  %v2562_v61 = vmax.f32 %v6157_v43, %v2450_v44 }
 0x262   : > { %v4395_v17 = vpop.f32.mrf.mxu0  ;;  %v4505_v18 = vpop.f32.mrf.mxu1 }
 0x263   : > { %3441 = vst.msk [vmem:[%s5716_s22 + $0x6c] sm:$0xf] %vm3413_vm4, %v3964_v31  ;;  %v3195_v53 = vmax.f32 %v3146_v48, 0.0  ;;  %v3091_v55 = vmax.f32 %v2562_v61, %v2979_v49  ;;  %v6170_v49 = vld [vmem:[#allocation22_spill] sm:$0xff]  ;;  %v6171_v31 = vld [vmem:[#allocation23_spill] sm:$0xff] }
 0x264   : > { %v2455_v3 = vpop.f32.mrf.mxu0  ;;  %v2984_v9 = vpop.f32.mrf.mxu1  ;;  %v6172_v48 = vmax.f32 %v6170_v49, %v6171_v31 }
 0x265   : > { %v3965_v56 = vpack.c.bf16 %v3195_v53, %v3195_v53  ;;  %v3147_v4 = vadd.f32 %v5707_v42, %v3091_v55  ;;  %v2563_v39 = vmax.f32 %v6160_v38, %v2455_v3 }
 0x266   : > { %v4398_v34 = vpop.f32.mrf.mxu0  ;;  %v4508_v26 = vpop.f32.mrf.mxu1 }
 0x267   : > { %3442 = vst.msk [vmem:[%s5716_s22 + $0x70] sm:$0xf] %vm3413_vm4, %v3965_v56  ;;  %v3196_v50 = vmax.f32 %v3147_v4, 0.0  ;;  %v3092_v51 = vmax.f32 %v2563_v39, %v2984_v9  ;;  %v6173_v9 = vld [vmem:[#allocation24_spill] sm:$0xff]  ;;  %v6174_v56 = vld [vmem:[#allocation25_spill] sm:$0xff] }
 0x268   : > { %v2458_v28 = vpop.f32.mrf.mxu0  ;;  %v2987_v14 = vpop.f32.mrf.mxu1  ;;  %v6175_v4 = vmax.f32 %v6173_v9, %v6174_v56 }
 0x269   : > { %v3966_v37 = vpack.c.bf16 %v3196_v50, %v3196_v50  ;;  %v3148_v0 = vadd.f32 %v5707_v42, %v3092_v51  ;;  %v2564_v7 = vmax.f32 %v6163_v23, %v2458_v28 }
 0x26a   : > { %v4399_v19 = vpop.f32.mrf.mxu0  ;;  %v4509_v5 = vpop.f32.mrf.mxu1 }
 0x26b   : > { %3443 = vst.msk [vmem:[%s5716_s22 + $0x74] sm:$0xf] %vm3413_vm4, %v3966_v37  ;;  %v3197_v6 = vmax.f32 %v3148_v0, 0.0  ;;  %v3093_v21 = vmax.f32 %v2564_v7, %v2987_v14  ;;  %v6176_v14 = vld [vmem:[#allocation26_spill] sm:$0xff]  ;;  %v6177_v37 = vld [vmem:[#allocation27_spill] sm:$0xff] }
 0x26c   : > { %v2463_v27 = vpop.f32.mrf.mxu0  ;;  %v2992_v47 = vpop.f32.mrf.mxu1  ;;  %v6178_v0 = vmax.f32 %v6176_v14, %v6177_v37 }
 0x26d   : > { %v3967_v8 = vpack.c.bf16 %v3197_v6, %v3197_v6  ;;  %v3149_v13 = vadd.f32 %v5707_v42, %v3093_v21  ;;  %v2565_v29 = vmax.f32 %v6166_v60, %v2463_v27 }
 0x26e   : > { %v4402_v30 = vpop.f32.mrf.mxu0  ;;  %v4512_v16 = vpop.f32.mrf.mxu1 }
 0x26f   : > { %3444 = vst.msk [vmem:[%s5716_s22 + $0x78] sm:$0xf] %vm3413_vm4, %v3967_v8  ;;  %v3198_v35 = vmax.f32 %v3149_v13, 0.0  ;;  %v3094_v32 = vmax.f32 %v2565_v29, %v2992_v47  ;;  %v6179_v47 = vld [vmem:[#allocation28_spill] sm:$0xff]  ;;  %v6180_v8 = vld [vmem:[#allocation29_spill] sm:$0xff] }
 0x270   : > { %v2466_v33 = vpop.f32.mrf.mxu0  ;;  %v2995_v57 = vpop.f32.mrf.mxu1  ;;  %v6181_v13 = vmax.f32 %v6179_v47, %v6180_v8 }
 0x271   : > { %v3968_v58 = vpack.c.bf16 %v3198_v35, %v3198_v35  ;;  %v3150_v24 = vadd.f32 %v5707_v42, %v3094_v32  ;;  %v2566_v12 = vmax.f32 %v6169_v11, %v2466_v33 }
 0x272   : > { %v4403_v52 = vpop.f32.mrf.mxu0  ;;  %v4513_v20 = vpop.f32.mrf.mxu1 }
 0x273   : > { %3445 = vst.msk [vmem:[%s5716_s22 + $0x7c] sm:$0xf] %vm3413_vm4, %v3968_v58  ;;  %v3199_v36 = vmax.f32 %v3150_v24, 0.0  ;;  %v3095_v40 = vmax.f32 %v2566_v12, %v2995_v57  ;;  %v6182_v57 = vld [vmem:[#allocation30_spill] sm:$0xff]  ;;  %v6183_v58 = vld [vmem:[#allocation31_spill] sm:$0xff] }
 0x274   : > { %v2471_v41 = vpop.f32.mrf.mxu0  ;;  %v3000_v45 = vpop.f32.mrf.mxu1  ;;  %v6184_v24 = vmax.f32 %v6182_v57, %v6183_v58 }
 0x275   : > { %v3969_v46 = vpack.c.bf16 %v3199_v36, %v3199_v36  ;;  %v3151_v44 = vadd.f32 %v5707_v42, %v3095_v40  ;;  %v2567_v59 = vmax.f32 %v6172_v48, %v2471_v41 }
 0x276   : > { %v4406_v54 = vpop.f32.mrf.mxu0  ;;  %v4516_v43 = vpop.f32.mrf.mxu1 }
 0x277   : > { %3446 = vst.msk [vmem:[%s5716_s22 + $0x80] sm:$0xf] %vm3413_vm4, %v3969_v46  ;;  %v3200_v61 = vmax.f32 %v3151_v44, 0.0  ;;  %v3096_v17 = vmax.f32 %v2567_v59, %v3000_v45  ;;  %v6185_v45 = vld [vmem:[#allocation32_spill] sm:$0xff]  ;;  %v6186_v46 = vld [vmem:[#allocation33_spill] sm:$0xff] }
 0x278   : > { %v2474_v18 = vpop.f32.mrf.mxu0  ;;  %v3003_v53 = vpop.f32.mrf.mxu1  ;;  %v6187_v44 = vmax.f32 %v6185_v45, %v6186_v46 }
 0x279   : > { %v3970_v55 = vpack.c.bf16 %v3200_v61, %v3200_v61  ;;  %v3152_v3 = vadd.f32 %v5707_v42, %v3096_v17  ;;  %v2568_v62 = vmax.f32 %v6175_v4, %v2474_v18 }
 0x27a   : > { %v4407_v63 = vpop.f32.mrf.mxu0  ;;  %v4517_v38 = vpop.f32.mrf.mxu1 }
 0x27b   : > { %3447 = vst.msk [vmem:[%s5716_s22 + $0x84] sm:$0xf] %vm3413_vm4, %v3970_v55  ;;  %v3201_v39 = vmax.f32 %v3152_v3, 0.0  ;;  %v3097_v34 = vmax.f32 %v2568_v62, %v3003_v53  ;;  %v6188_v53 = vld [vmem:[#allocation34_spill] sm:$0xff]  ;;  %v6189_v55 = vld [vmem:[#allocation35_spill] sm:$0xff] }
 0x27c   : > { %v2479_v26 = vpop.f32.mrf.mxu0  ;;  %v3008_v50 = vpop.f32.mrf.mxu1  ;;  %v6190_v3 = vmax.f32 %v6188_v53, %v6189_v55 }
 0x27d   : > { %v3971_v51 = vpack.c.bf16 %v3201_v39, %v3201_v39  ;;  %v3153_v28 = vadd.f32 %v5707_v42, %v3097_v34  ;;  %v2569_v1 = vmax.f32 %v6178_v0, %v2479_v26 }
 0x27e   : > { %v4410_v22 = vpop.f32.mrf.mxu0  ;;  %v4520_v23 = vpop.f32.mrf.mxu1 }
 0x27f   : > { %3448 = vst.msk [vmem:[%s5716_s22 + $0x88] sm:$0xf] %vm3413_vm4, %v3971_v51  ;;  %v3202_v7 = vmax.f32 %v3153_v28, 0.0  ;;  %v3098_v19 = vmax.f32 %v2569_v1, %v3008_v50  ;;  %v6191_v50 = vld [vmem:[#allocation36_spill] sm:$0xff]  ;;  %v6192_v51 = vld [vmem:[#allocation37_spill] sm:$0xff] }
 0x280   : > { %v2482_v5 = vpop.f32.mrf.mxu0  ;;  %v3011_v6 = vpop.f32.mrf.mxu1  ;;  %v6193_v28 = vmax.f32 %v6191_v50, %v6192_v51 }
 0x281   : > { %v3972_v21 = vpack.c.bf16 %v3202_v7, %v3202_v7  ;;  %v3154_v27 = vadd.f32 %v5707_v42, %v3098_v19  ;;  %v2570_v15 = vmax.f32 %v6181_v13, %v2482_v5 }
 0x282   : > { %v4411_v2 = vpop.f32.mrf.mxu0  ;;  %v4521_v60 = vpop.f32.mrf.mxu1 }
 0x283   : > { %3449 = vst.msk [vmem:[%s5716_s22 + $0x8c] sm:$0xf] %vm3413_vm4, %v3972_v21  ;;  %v3203_v29 = vmax.f32 %v3154_v27, 0.0  ;;  %v3099_v30 = vmax.f32 %v2570_v15, %v3011_v6  ;;  %v6194_v6 = vld [vmem:[#allocation38_spill] sm:$0xff]  ;;  %v6195_v21 = vld [vmem:[#allocation39_spill] sm:$0xff] }
 0x284   : > { %v2487_v16 = vpop.f32.mrf.mxu0  ;;  %v3016_v35 = vpop.f32.mrf.mxu1  ;;  %v6196_v27 = vmax.f32 %v6194_v6, %v6195_v21 }
 0x285   : > { %v3973_v32 = vpack.c.bf16 %v3203_v29, %v3203_v29  ;;  %v3155_v33 = vadd.f32 %v5707_v42, %v3099_v30  ;;  %v2571_v25 = vmax.f32 %v6184_v24, %v2487_v16 }
 0x286   : > { %v4414_v10 = vpop.f32.mrf.mxu0  ;;  %v4524_v11 = vpop.f32.mrf.mxu1 }
 0x287   : > { %3450 = vst.msk [vmem:[%s5716_s22 + $0x90] sm:$0xf] %vm3413_vm4, %v3973_v32  ;;  %v3204_v12 = vmax.f32 %v3155_v33, 0.0  ;;  %v3100_v52 = vmax.f32 %v2571_v25, %v3016_v35  ;;  %v6197_v35 = vld [vmem:[#allocation40_spill] sm:$0xff]  ;;  %v6198_v32 = vld [vmem:[#allocation41_spill] sm:$0xff] }
 0x288   : > { %v2490_v20 = vpop.f32.mrf.mxu0  ;;  %v3019_v36 = vpop.f32.mrf.mxu1  ;;  %v6199_v33 = vmax.f32 %v6197_v35, %v6198_v32 }
 0x289   : > { %v3974_v40 = vpack.c.bf16 %v3204_v12, %v3204_v12  ;;  %v3156_v41 = vadd.f32 %v5707_v42, %v3100_v52  ;;  %v2572_v49 = vmax.f32 %v6187_v44, %v2490_v20 }
 0x28a   : > { %v4415_v31 = vpop.f32.mrf.mxu0  ;;  %v4525_v48 = vpop.f32.mrf.mxu1 }
 0x28b   : > { %3451 = vst.msk [vmem:[%s5716_s22 + $0x94] sm:$0xf] %vm3413_vm4, %v3974_v40  ;;  %v3205_v59 = vmax.f32 %v3156_v41, 0.0  ;;  %v3101_v54 = vmax.f32 %v2572_v49, %v3019_v36  ;;  %v6200_v36 = vld [vmem:[#allocation42_spill] sm:$0xff]  ;;  %v6201_v40 = vld [vmem:[#allocation43_spill] sm:$0xff] }
 0x28c   : > { %v2495_v43 = vpop.f32.mrf.mxu0  ;;  %v3024_v61 = vpop.f32.mrf.mxu1  ;;  %v6202_v41 = vmax.f32 %v6200_v36, %v6201_v40 }
 0x28d   : > { %v3975_v17 = vpack.c.bf16 %v3205_v59, %v3205_v59  ;;  %v3157_v18 = vadd.f32 %v5707_v42, %v3101_v54  ;;  %v2573_v9 = vmax.f32 %v6190_v3, %v2495_v43 }
 0x28e   : > { %v4418_v56 = vpop.f32.mrf.mxu0  ;;  %v4528_v4 = vpop.f32.mrf.mxu1 }
 0x28f   : > { %3452 = vst.msk [vmem:[%s5716_s22 + $0x98] sm:$0xf] %vm3413_vm4, %v3975_v17  ;;  %v3206_v62 = vmax.f32 %v3157_v18, 0.0  ;;  %v3102_v63 = vmax.f32 %v2573_v9, %v3024_v61  ;;  %v6203_v61 = vld [vmem:[#allocation44_spill] sm:$0xff]  ;;  %v6204_v17 = vld [vmem:[#allocation45_spill] sm:$0xff] }
 0x290   : > { %v2498_v38 = vpop.f32.mrf.mxu0  ;;  %v3027_v39 = vpop.f32.mrf.mxu1  ;;  %v6205_v18 = vmax.f32 %v6203_v61, %v6204_v17 }
 0x291   : > { %v3976_v34 = vpack.c.bf16 %v3206_v62, %v3206_v62  ;;  %v3158_v26 = vadd.f32 %v5707_v42, %v3102_v63  ;;  %v2574_v14 = vmax.f32 %v6193_v28, %v2498_v38 }
 0x292   : > { %v4419_v37 = vpop.f32.mrf.mxu0  ;;  %v4529_v0 = vpop.f32.mrf.mxu1 }
 0x293   : > { %3453 = vst.msk [vmem:[%s5716_s22 + $0x9c] sm:$0xf] %vm3413_vm4, %v3976_v34  ;;  %v3207_v1 = vmax.f32 %v3158_v26, 0.0  ;;  %v3103_v22 = vmax.f32 %v2574_v14, %v3027_v39  ;;  %v6206_v39 = vld [vmem:[#allocation46_spill] sm:$0xff]  ;;  %v6207_v34 = vld [vmem:[#allocation47_spill] sm:$0xff] }
 0x294   : > { %v2503_v23 = vpop.f32.mrf.mxu0  ;;  %v3032_v7 = vpop.f32.mrf.mxu1  ;;  %v6208_v26 = vmax.f32 %v6206_v39, %v6207_v34 }
 0x295   : > { %v3977_v19 = vpack.c.bf16 %v3207_v1, %v3207_v1  ;;  %v3159_v5 = vadd.f32 %v5707_v42, %v3103_v22  ;;  %v2575_v47 = vmax.f32 %v6196_v27, %v2503_v23 }
 0x296   : > { %v4422_v8 = vpop.f32.mrf.mxu0  ;;  %v4532_v13 = vpop.f32.mrf.mxu1 }
 0x297   : > { %3454 = vst.msk [vmem:[%s5716_s22 + $0xa0] sm:$0xf] %vm3413_vm4, %v3977_v19  ;;  %v3208_v15 = vmax.f32 %v3159_v5, 0.0  ;;  %v3104_v2 = vmax.f32 %v2575_v47, %v3032_v7  ;;  %v6209_v7 = vld [vmem:[#allocation48_spill] sm:$0xff]  ;;  %v6210_v19 = vld [vmem:[#allocation49_spill] sm:$0xff] }
 0x298   : > { %v2506_v60 = vpop.f32.mrf.mxu0  ;;  %v3035_v29 = vpop.f32.mrf.mxu1  ;;  %v6211_v5 = vmax.f32 %v6209_v7, %v6210_v19 }
 0x299   : > { %v3978_v30 = vpack.c.bf16 %v3208_v15, %v3208_v15  ;;  %v3160_v16 = vadd.f32 %v5707_v42, %v3104_v2  ;;  %v2576_v57 = vmax.f32 %v6199_v33, %v2506_v60 }
 0x29a   : > { %v4423_v58 = vpop.f32.mrf.mxu0  ;;  %v4533_v24 = vpop.f32.mrf.mxu1 }
 0x29b   : > { %3455 = vst.msk [vmem:[%s5716_s22 + $0xa4] sm:$0xf] %vm3413_vm4, %v3978_v30  ;;  %v3209_v25 = vmax.f32 %v3160_v16, 0.0  ;;  %v3105_v10 = vmax.f32 %v2576_v57, %v3035_v29  ;;  %v6212_v29 = vld [vmem:[#allocation50_spill] sm:$0xff]  ;;  %v6213_v30 = vld [vmem:[#allocation51_spill] sm:$0xff] }
 0x29c   : > { %v2511_v11 = vpop.f32.mrf.mxu0  ;;  %v3040_v12 = vpop.f32.mrf.mxu1  ;;  %v6214_v16 = vmax.f32 %v6212_v29, %v6213_v30 }
 0x29d   : > { %v3979_v52 = vpack.c.bf16 %v3209_v25, %v3209_v25  ;;  %v3161_v20 = vadd.f32 %v5707_v42, %v3105_v10  ;;  %v2577_v45 = vmax.f32 %v6202_v41, %v2511_v11 }
 0x29e   : > { %v4426_v46 = vpop.f32.mrf.mxu0  ;;  %v4536_v44 = vpop.f32.mrf.mxu1 }
 0x29f   : > { %3456 = vst.msk [vmem:[%s5716_s22 + $0xa8] sm:$0xf] %vm3413_vm4, %v3979_v52  ;;  %v3210_v49 = vmax.f32 %v3161_v20, 0.0  ;;  %v3106_v31 = vmax.f32 %v2577_v45, %v3040_v12 }
 0x2a0   : > { %v2514_v48 = vpop.f32.mrf.mxu0  ;;  %v3043_v59 = vpop.f32.mrf.mxu1 }
 0x2a1   : > { %v3980_v54 = vpack.c.bf16 %v3210_v49, %v3210_v49  ;;  %v3162_v43 = vadd.f32 %v5707_v42, %v3106_v31  ;;  %v2578_v53 = vmax.f32 %v6205_v18, %v2514_v48 }
 0x2a2   : > { %v4427_v55 = vpop.f32.mrf.mxu0  ;;  %v4537_v3 = vpop.f32.mrf.mxu1 }
 0x2a3   : > { %3457 = vst.msk [vmem:[%s5716_s22 + $0xac] sm:$0xf] %vm3413_vm4, %v3980_v54  ;;  %v3211_v9 = vmax.f32 %v3162_v43, 0.0  ;;  %v3107_v56 = vmax.f32 %v2578_v53, %v3043_v59 }
 0x2a4   : > { %v2519_v4 = vpop.f32.mrf.mxu0  ;;  %v3048_v62 = vpop.f32.mrf.mxu1 }
 0x2a5   : > { %v3981_v63 = vpack.c.bf16 %v3211_v9, %v3211_v9  ;;  %v3163_v38 = vadd.f32 %v5707_v42, %v3107_v56  ;;  %v2579_v50 = vmax.f32 %v6208_v26, %v2519_v4 }
 0x2a6   : > { %v4430_v51 = vpop.f32.mrf.mxu0  ;;  %v4540_v28 = vpop.f32.mrf.mxu1 }
 0x2a7   : > { %3458 = vst.msk [vmem:[%s5716_s22 + $0xb0] sm:$0xf] %vm3413_vm4, %v3981_v63  ;;  %v3212_v14 = vmax.f32 %v3163_v38, 0.0  ;;  %v3108_v37 = vmax.f32 %v2579_v50, %v3048_v62 }
 0x2a8   : > { %v2522_v0 = vpop.f32.mrf.mxu0  ;;  %v3051_v1 = vpop.f32.mrf.mxu1 }
 0x2a9   : > { %v3982_v22 = vpack.c.bf16 %v3212_v14, %v3212_v14  ;;  %v3164_v23 = vadd.f32 %v5707_v42, %v3108_v37  ;;  %v2580_v6 = vmax.f32 %v6211_v5, %v2522_v0 }
 0x2aa   : > { %v4431_v21 = vpop.f32.mrf.mxu0  ;;  %v4541_v27 = vpop.f32.mrf.mxu1 }
 0x2ab   : > { %3459 = vst.msk [vmem:[%s5716_s22 + $0xb4] sm:$0xf] %vm3413_vm4, %v3982_v22  ;;  %v3213_v47 = vmax.f32 %v3164_v23, 0.0  ;;  %v3109_v8 = vmax.f32 %v2580_v6, %v3051_v1 }
 0x2ac   : > { %v2527_v13 = vpop.f32.mrf.mxu0  ;;  %v3056_v15 = vpop.f32.mrf.mxu1 }
 0x2ad   : > { %v3983_v2 = vpack.c.bf16 %v3213_v47, %v3213_v47  ;;  %v3165_v60 = vadd.f32 %v5707_v42, %v3109_v8  ;;  %v2581_v35 = vmax.f32 %v6214_v16, %v2527_v13 }
 0x2ae   : > { %v4434_v32 = vpop.f32.mrf.mxu0  ;;  %v4544_v33 = vpop.f32.mrf.mxu1 }
 0x2af   : > { %3460 = vst.msk [vmem:[%s5716_s22 + $0xb8] sm:$0xf] %vm3413_vm4, %v3983_v2  ;;  %v3214_v57 = vmax.f32 %v3165_v60, 0.0  ;;  %v3110_v58 = vmax.f32 %v2581_v35, %v3056_v15 }
 0x2b0   : > { %v2530_v24 = vpop.f32.mrf.mxu0  ;;  %v3059_v25 = vpop.f32.mrf.mxu1 }
 0x2b1   : > { %v3984_v10 = vpack.c.bf16 %v3214_v57, %v3214_v57  ;;  %v3166_v11 = vadd.f32 %v5707_v42, %v3110_v58 }
 0x2b2   : > { %v4435_v12 = vpop.f32.mrf.mxu0  ;;  %v4545_v52 = vpop.f32.mrf.mxu1 }
 0x2b3   : > { %3461 = vst.msk [vmem:[%s5716_s22 + $0xbc] sm:$0xf] %vm3413_vm4, %v3984_v10  ;;  %v3215_v20 = vmax.f32 %v3166_v11, 0.0 }
 0x2b5   : > { %v3985_v36 = vpack.c.bf16 %v3215_v20, %v3215_v20 }
 0x2b7   : > { %3462 = vst.msk [vmem:[%s5716_s22 + $0xc0] sm:$0xf] %vm3413_vm4, %v3985_v36 }
 0x2b8 PF: > { %p10_p9 = scmp.ge.s32.totalorder %s4744_s16, 4   ;;  %s6215_s12 = smov %s4698_s13 }
 0x2b9   : > { %s6216_s13 = smov %s4753_s19  ;;  %s6217_s14 = smov %s4744_s16 }
 0x2ba   :  { %12 = sbr.rel (!%p10_p9) target bundleno = 2 (0x2), region = 111 }

// kernel: net_forward.4
= control target key start
LH: loop header
LB: loop body
LE: loop exit
PB: predicated region body
PF: predicated region fallthrough
CT: control target
= control target key end

     0   :  { %s1854_s12 = smov 0   ;;  %s1856_s13 = smov 0   ;;  %s2312_s0 = inlined_call_operand.vmem [shape: bf16[4,100,150], index: 0, kind: input, shape index: {}]   ;;  %s2313_s1 = inlined_call_operand.vmem [shape: bf16[150,16], index: 1, kind: input, shape index: {}]   ;;  %s2314_s2 = inlined_call_operand.vmem [shape: f32[1,16], index: 2, kind: input, shape index: {}]   ;;  %s2315_s3 = inlined_call_operand.vmem [shape: bf16[100,16], index: 3, kind: output, shape index: {}]  }
   0x1   :  { %s1858_s14 = smov 0  }
   0x2 LB: > { %s1870_s15 = sadd.s32 4294967295, %s1767_s14   ;;  %s1873_s16 = sadd.s32 1, %s1767_s14   ;;  %s1767_s14 = sphi %s1858_s14, %s2329_s14   ;;  %s1763_s13 = sphi %s1856_s13, %s2328_s13   ;;  %s1759_s12 = sphi %s1854_s12, %s2327_s12  }
   0x3   : > { %s17_s17 = ssub.s32 %s1767_s14, %s1873_s16  ;;  %s20_s18 = sadd.s32 1, %s1763_s13 }
   0x4   : > { %p18_p0 = scmp.eq.s32.totalorder %s17_s17, 0  ;;  %p27_p1 = scmp.ne.s32.totalorder %s1763_s13, %s1759_s12 }
   0x5   : > { %p28_p2 = scmp.eq.s32.totalorder %s1767_s14, 0  ;;  %p99_p3 = scmp.eq.s32.totalorder %s1870_s15, 1 }
   0x6   : > { %s1883_s19 = scalar_select %p18_p0, %s1763_s13, %s20_s18  }
   0x7   : > { %p29_p4 = por %p28_p2, %p27_p1  ;;  %p1885_p5 = por %p99_p3, %p27_p1 }
   0x8   : > { %p1336_p6 = scmp.ge.s32.totalorder %s1767_s14, 2 }
   0xa   : > { %127 = sbr.rel (%p1336_p6) target bundleno = 81 (0x51), region = 24 }
   0xf   : > { %130 = sbr.rel (!%p29_p4) target bundleno = 81 (0x51), region = 28  ;;  %s132_s21 = sand.u32 (%p29_p4), 1, %s1763_s13  }
  0x10   : > { %s135_s22 = smul.u32 (%p29_p4), 7, %s1767_s14 }
  0x11   : > { %s1461_s23 = smul.u32 (%p29_p4), 224, %s132_s21 }
  0x12   : > { %s136_s24 = ssub.s32 (%p29_p4), 13, %s135_s22  ;;  %s1460_s25 = smul.u32 (%p29_p4), 56, %s1767_s14 }
  0x13   : > { %p137_p7 = scmp.lt.s32.totalorder (%p29_p4), %s136_s24, 7  ;;  %s1901_s30 = scalar_lea.vmem (%p29_p4), [#allocation2], %s1461_s23  }
  0x14   : > { %s1896_s28 = scalar_lea.vmem %s2312_s0, %s1460_s25  }
  0x15   : > { %s2331_s24 = smov (!%p137_p7, %s136_s24), 7 }
  0x16   : > { %s1449_s29 = sshll.u32 %s2331_s24, 9 }
  0x17   : > { %p1342_p8 = scmp.eq.s32.totalorder %s1449_s29, 0 }
  0x18   : > { %1619 = sdivrem.u32 (!%p1342_p8), %s2331_s24, 7 }
  0x19   : > { %147 = sbr.rel (%p1342_p8) target bundleno = 81 (0x51), region = 32 }
  0x21   : > { %s1904_s4 = spop.drf %1619 }
  0x22   : > { %p1343_p9 = scmp.le.s32.totalorder %s1904_s4, 0 }
  0x23   : > { %s2317_s5 = smov (!%p1343_p9), %s1901_s30  ;;  %s2318_s6 = smov (!%p1343_p9), %s1896_s28 }
  0x24   : > { %1262 = sbr.rel (%p1343_p9) target bundleno = 56 (0x38), region = 180  ;;  %s1913_s7 = smov (!%p1343_p9), 0  }
  0x25   : > { %s1915_s8 = smov (!%p1343_p9), 0  }
  0x29 LB: >> { %v272_v0 = vld [vmem:[%s1775_s6] sm:$0xff]  ;;  %v274_v1 = vld [vmem:[%s1775_s6 + $0x8] sm:$0xff]  ;;  %v276_v2 = vld [vmem:[%s1775_s6 + $0x10] sm:$0xff]  ;;  %s328_s9 = sadd.s32 1, %s1779_s7  ;;  %s266_s8 = sadd.s32 1, %s1783_s8   ;;  %s1783_s8 = sphi %s1915_s8, %s266_s8   ;;  %s1779_s7 = sphi %s1913_s7, %s2321_s7   ;;  %s1775_s6 = sphi %s2318_s6, %s2320_s6   ;;  %s1771_s5 = sphi %s2317_s5, %s2319_s5  }
  0x2a   : >> { %273 = vst [vmem:[%s1771_s5] sm:$0xff] %v272_v0  ;;  %275 = vst [vmem:[%s1771_s5 + $0x8] sm:$0xff] %v274_v1  ;;  %v278_v3 = vld [vmem:[%s1775_s6 + $0x18] sm:$0xff]  ;;  %v280_v4 = vld [vmem:[%s1775_s6 + $0x20] sm:$0xff]  ;;  %p329_p10 = scmp.ge.s32.totalorder %s328_s9, %s1904_s4  ;;  %p265_p11 = scmp.ge.s32.totalorder %s266_s8, %s1904_s4 }
  0x2b   : >> { %277 = vst [vmem:[%s1771_s5 + $0x10] sm:$0xff] %v276_v2  ;;  %v282_v5 = vld [vmem:[%s1775_s6 + $0x28] sm:$0xff]  ;;  %279 = vst [vmem:[%s1771_s5 + $0x18] sm:$0xff] %v278_v3  ;;  %v284_v6 = vld [vmem:[%s1775_s6 + $0x30] sm:$0xff] }
  0x2c   : >> { %281 = vst [vmem:[%s1771_s5 + $0x20] sm:$0xff] %v280_v4  ;;  %283 = vst [vmem:[%s1771_s5 + $0x28] sm:$0xff] %v282_v5  ;;  %v286_v7 = vld [vmem:[%s1775_s6 + $0x68] sm:$0xff]  ;;  %v288_v8 = vld [vmem:[%s1775_s6 + $0x70] sm:$0xff]  ;;  %s2333_s9 = smov (%p329_p10, %s328_s9), 0 }
  0x2d   : >> { %285 = vst [vmem:[%s1771_s5 + $0x30] sm:$0xff] %v284_v6  ;;  %287 = vst [vmem:[%s1771_s5 + $0x38] sm:$0xff] %v286_v7  ;;  %v290_v9 = vld [vmem:[%s1775_s6 + $0x78] sm:$0xff]  ;;  %v292_v10 = vld [vmem:[%s1775_s6 + $0x80] sm:$0xff]  ;;  %s331_s10 = smul.u32 56, %s2333_s9  ;;  %s2321_s7 = smov %s2333_s9 }
  0x2e   : >> { %289 = vst [vmem:[%s1771_s5 + $0x40] sm:$0xff] %v288_v8  ;;  %v294_v11 = vld [vmem:[%s1775_s6 + $0x88] sm:$0xff]  ;;  %291 = vst [vmem:[%s1771_s5 + $0x48] sm:$0xff] %v290_v9  ;;  %v296_v12 = vld [vmem:[%s1775_s6 + $0x90] sm:$0xff] }
  0x2f   : >> { %293 = vst [vmem:[%s1771_s5 + $0x50] sm:$0xff] %v292_v10  ;;  %295 = vst [vmem:[%s1771_s5 + $0x58] sm:$0xff] %v294_v11  ;;  %v298_v13 = vld [vmem:[%s1775_s6 + $0x98] sm:$0xff]  ;;  %v300_v14 = vld [vmem:[%s1775_s6 + $0xd0] sm:$0xff]  ;;  %s333_s11 = scalar_lea.vmem %s1896_s28, %s331_s10   ;;  %s334_s17 = scalar_lea.vmem %s1901_s30, %s331_s10 [#allocation2]  }
  0x30   : >> { %297 = vst [vmem:[%s1771_s5 + $0x60] sm:$0xff] %v296_v12  ;;  %299 = vst [vmem:[%s1771_s5 + $0x68] sm:$0xff] %v298_v13  ;;  %v302_v15 = vld [vmem:[%s1775_s6 + $0xd8] sm:$0xff]  ;;  %v304_v16 = vld [vmem:[%s1775_s6 + $0xe0] sm:$0xff] }
  0x31   : >> { %301 = vst [vmem:[%s1771_s5 + $0x70] sm:$0xff] %v300_v14  ;;  %v306_v17 = vld [vmem:[%s1775_s6 + $0xe8] sm:$0xff]  ;;  %303 = vst [vmem:[%s1771_s5 + $0x78] sm:$0xff] %v302_v15  ;;  %v308_v18 = vld [vmem:[%s1775_s6 + $0xf0] sm:$0xff] }
  0x32   : >> { %305 = vst [vmem:[%s1771_s5 + $0x80] sm:$0xff] %v304_v16  ;;  %307 = vst [vmem:[%s1771_s5 + $0x88] sm:$0xff] %v306_v17  ;;  %v310_v19 = vld [vmem:[%s1775_s6 + $0xf8] sm:$0xff]  ;;  %v312_v20 = vld [vmem:[%s1775_s6 + $0x100] sm:$0xff] }
  0x33   : >> { %309 = vst [vmem:[%s1771_s5 + $0x90] sm:$0xff] %v308_v18  ;;  %311 = vst [vmem:[%s1771_s5 + $0x98] sm:$0xff] %v310_v19  ;;  %v314_v21 = vld [vmem:[%s1775_s6 + $0x138] sm:$0xff]  ;;  %v316_v22 = vld [vmem:[%s1775_s6 + $0x140] sm:$0xff]  ;;  %268 = sbr.rel (!%p265_p11) target bundleno = 41 (0x29), region = 186 }
  0x34   : >> { %313 = vst [vmem:[%s1771_s5 + $0xa0] sm:$0xff] %v312_v20  ;;  %v318_v23 = vld [vmem:[%s1775_s6 + $0x148] sm:$0xff]  ;;  %315 = vst [vmem:[%s1771_s5 + $0xa8] sm:$0xff] %v314_v21  ;;  %v320_v24 = vld [vmem:[%s1775_s6 + $0x150] sm:$0xff] }
  0x35   : >> { %317 = vst [vmem:[%s1771_s5 + $0xb0] sm:$0xff] %v316_v22  ;;  %319 = vst [vmem:[%s1771_s5 + $0xb8] sm:$0xff] %v318_v23  ;;  %v322_v25 = vld [vmem:[%s1775_s6 + $0x158] sm:$0xff]  ;;  %v324_v26 = vld [vmem:[%s1775_s6 + $0x160] sm:$0xff] }
  0x36   : >> { %321 = vst [vmem:[%s1771_s5 + $0xc0] sm:$0xff] %v320_v24  ;;  %323 = vst [vmem:[%s1771_s5 + $0xc8] sm:$0xff] %v322_v25  ;;  %v326_v27 = vld [vmem:[%s1775_s6 + $0x168] sm:$0xff]  ;;  %s2320_s6 = smov %s333_s11 }
  0x37   : >> { %325 = vst [vmem:[%s1771_s5 + $0xd0] sm:$0xff] %v324_v26  ;;  %327 = vst [vmem:[%s1771_s5 + $0xd8] sm:$0xff] %v326_v27  ;;  %s2319_s5 = smov %s334_s17 }
  0x38 PF: > { %1621 = sdivrem.u32 %s2331_s24, 7 }
  0x39   : > { %s1344_s18 = smul.u32 56, %s1904_s4 }
  0x3b   : > { %s2003_s21 = scalar_lea.vmem %s1896_s28, %s1344_s18   ;;  %s2006_s22 = scalar_lea.vmem %s1901_s30, %s1344_s18 [#allocation2]  }
  0x41   : > { %s2008_s23 = spop.drf %1621 }
  0x42   : > { %p1346_p12 = scmp.le.s32.totalorder %s2008_s23, 0 }
  0x43   : > { %s2322_s25 = smov (!%p1346_p12), %s2006_s22  ;;  %s2323_s26 = smov (!%p1346_p12), %s2003_s21 }
  0x44   : > { %1276 = sbr.rel (%p1346_p12) target bundleno = 81 (0x51), region = 191  ;;  %s1793_s27 = smov (!%p1346_p12), 0  }
  0x45   : > { %s1797_s29 = smov (!%p1346_p12), 0  }
  0x49 LB: >> { %v351_v28 = vld [vmem:[%s1791_s26] sm:$0xff]  ;;  %v353_v29 = vld [vmem:[%s1791_s26 + $0x68] sm:$0xff]  ;;  %v355_v30 = vld [vmem:[%s1791_s26 + $0xd0] sm:$0xff]  ;;  %s359_s24 = sadd.s32 1, %s1795_s27  ;;  %s345_s29 = sadd.s32 1, %s1799_s29   ;;  %s1799_s29 = sphi %s1797_s29, %s345_s29   ;;  %s1795_s27 = sphi %s1793_s27, %s1794_s27   ;;  %s1791_s26 = sphi %s2323_s26, %s364_s26   ;;  %s1787_s25 = sphi %s2322_s25, %s365_s25  }
  0x4a   : >> { %352 = vst [vmem:[%s1787_s25] sm:$0xff] %v351_v28  ;;  %354 = vst [vmem:[%s1787_s25 + $0x38] sm:$0xff] %v353_v29  ;;  %v357_v31 = vld [vmem:[%s1791_s26 + $0x138] sm:$0xff]  ;;  %p360_p13 = scmp.ge.s32.totalorder %s359_s24, %s2008_s23  ;;  %p344_p0 = scmp.ge.s32.totalorder %s345_s29, %s2008_s23 }
  0x4b   : >> { %356 = vst [vmem:[%s1787_s25 + $0x70] sm:$0xff] %v355_v30  ;;  %358 = vst [vmem:[%s1787_s25 + $0xa8] sm:$0xff] %v357_v31 }
  0x4c   : >> { %s2335_s24 = smov (%p360_p13, %s359_s24), 0  ;;  %347 = sbr.rel (!%p344_p0) target bundleno = 73 (0x49), region = 197 }
  0x4d   : >> { %s1347_s28 = sshll.u32 %s2335_s24, 3  ;;  %s1794_s27 = smov %s2335_s24  }
  0x4e   : >> { %s364_s26 = scalar_lea.vmem %s2003_s21, %s1347_s28   ;;  %s365_s25 = scalar_lea.vmem %s2006_s22, %s1347_s28 [#allocation2]  }
  0x51 PF: > { %p1349_p1 = scmp.ge.s32.totalorder %s1767_s14, 1  ;;  %p370_p2 = scmp.lt.s32.totalorder %s1767_s14, 3 }
  0x53   : > { %p371_p3 = pnand %p1349_p1, %p370_p2 }
  0x54   : > { %s377_s6 = sand.u32 (!%p371_p3), 1, %s1759_s12  }
  0x55   : > { %374 = sbr.rel (%p371_p3) target bundleno = 457 (0x1c9), region = 80 }
  0x56   : > { %s1462_s7 = smul.u32 (!%p371_p3), 224, %s377_s6 }
  0x58   : > { %s2057_s10 = scalar_lea.vmem (!%p371_p3), [#allocation2], %s1462_s7  ;;  %s1463_s7 = smul.u32 (!%p371_p3), 28, %s377_s6 }
  0x5a   : > { %v2032_v32 = vld [vmem:[%s2313_s1 + $0x38] sm:$0xff]   ;;  %v1833_v33 = vmov 0   ;;  %v2041_v34 = vld [vmem:[%s2313_s1 + $0x30] sm:$0xff]   ;;  %v2053_v35 = vld [vmem:[%s2313_s1 + $0x28] sm:$0xff]   ;;  %vm527_vm0 = vcmask 179200   ;;  %vm540_vm1 = vcmask 1042432  }
  0x5b   : > { %544 = vmatprep.subr.bf16.mxu0 %v1833_v33  ;;  %661 = vmatprep.subr.bf16.mxu1 %v1833_v33  ;;  %v2064_v36 = vld [vmem:[%s2313_s1 + $0x20] sm:$0xff]   ;;  %v2076_v39 = vld [vmem:[%s2313_s1 + $0x18] sm:$0xff]   ;;  %v2086_v40 = vld [vmem:[%s2313_s1 + $0x10] sm:$0xff]   ;;  %vm1030_vm2 = vcmask 125952   ;;  %s2229_s12 = scalar_lea.vmem [#allocation3], %s1463_s7   ;;  %s1045_s6 = smul.u32 (%p1885_p5), 7, %s1870_s15 }
  0x5c   : > { %545 = vmatpush1.bf16.msra.mxu0 %v2032_v32  ;;  %662 = vmatpush1.bf16.msra.mxu1 %v2032_v32  ;;  %v1635_v37 = vld [vmem:[%s2057_s10 + $0x4] ss:$8 sps:$4 sm:$0xff]   ;;  %v1631_v43 = vld [vmem:[%s2313_s1 + $0x48] ss:$0 sps:$4 sm:$0x77]   ;;  %v436_v56 = vld [vmem:[%s2057_s10 + $0x30] sm:$0xff] }
  0x5d   : > { %546 = vmatprep.subr.bf16.mxu0 %v1833_v33  ;;  %663 = vmatprep.subr.bf16.mxu1 %v1833_v33  ;;  %v1638_v38 = vld [vmem:[%s2057_s10 + $0x3c] ss:$8 sps:$4 sm:$0xff]   ;;  %v2095_v41 = vld [vmem:[%s2313_s1 + $0x8] sm:$0xff]   ;;  %v2115_v44 = vsel %vm540_vm1, %v1631_v43, 0  ;;  %v1636_v47 = vld [vmem:[%s2057_s10 + $0x38] ss:$8 sps:$4 sm:$0xff]   ;;  %v1357_v58 = vcombine.high %v436_v56, %v436_v56  ;;  %v1356_v60 = vcombine.low %v436_v56, %v436_v56 }
  0x5e   : > { %1368 = vmatprep.mubr.msk.bf16.mxu0 %vm527_vm0, %v1635_v37  ;;  %1387 = vmatprep.mubr.msk.bf16.mxu1 %vm527_vm0, %v1638_v38  ;;  %v2104_v42 = vld [vmem:[%s2313_s1] sm:$0xff]   ;;  %v1639_v48 = vld [vmem:[%s2057_s10 + $0x14] ss:$8 sps:$4 sm:$0xff]   ;;  %v1641_v50 = vld [vmem:[%s2057_s10 + $0x10] ss:$8 sps:$4 sm:$0xff]   ;;  %s1459_s8 = smul.u32 (%p1885_p5), 28, %s1870_s15 }
  0x5f   : > { %v2122_v45 = vld [vmem:[%s2313_s1 + $0x40] sm:$0xff]   ;;  %v1642_v49 = vld [vmem:[%s2057_s10 + $0x4c] ss:$8 sps:$4 sm:$0xff]   ;;  %v1644_v51 = vld [vmem:[%s2057_s10 + $0x48] ss:$8 sps:$4 sm:$0xff]   ;;  %s1046_s9 = ssub.s32 (%p1885_p5), 13, %s1045_s6 }
  0x60   : > { %547 = vmatpush1.bf16.msra.mxu0 %v2041_v34  ;;  %664 = vmatpush1.bf16.msra.mxu1 %v2041_v34  ;;  %v1633_v46 = vld [vmem:[%s2057_s10] ss:$8 sps:$4 sm:$0xff]   ;;  %v1645_v52 = vld [vmem:[%s2057_s10 + $0x24] ss:$8 sps:$4 sm:$0xff]   ;;  %v1657_v62 = vld [vmem:[%s2057_s10 + $0x74] ss:$8 sps:$4 sm:$0xff]   ;;  %s2263_s17 = scalar_lea.vmem (%p1885_p5), %s2315_s3, %s1459_s8  }
  0x61   : > { %548 = vmatprep.subr.bf16.mxu0 %v1833_v33  ;;  %665 = vmatprep.subr.bf16.mxu1 %v1833_v33  ;;  %v1648_v53 = vld [vmem:[%s2057_s10 + $0x5c] ss:$8 sps:$4 sm:$0xff]   ;;  %v1647_v54 = vld [vmem:[%s2057_s10 + $0x20] ss:$8 sps:$4 sm:$0xff]   ;;  %v1660_v63 = vld [vmem:[%s2057_s10 + $0xac] ss:$8 sps:$4 sm:$0xff]  }
  0x62   : > { %v1650_v55 = vld [vmem:[%s2057_s10 + $0x58] ss:$8 sps:$4 sm:$0xff]   ;;  %v1378_v57 = vld [vmem:[%s2057_s10 + $0x68] sm:$0xff]  ;;  %v1663_v3 = vld [vmem:[%s2057_s10 + $0xbc] ss:$8 sps:$4 sm:$0xff]   ;;  %p1047_p4 = scmp.lt.s32.totalorder (%p1885_p5), %s1046_s9, 7 }
  0x63   : > { %v1386_v59 = vcombine.high %v1378_v57, %v1378_v57  ;;  %v1385_v61 = vcombine.low %v1378_v57, %v1378_v57  ;;  %v1655_v0 = vld [vmem:[%s2057_s10 + $0x70] ss:$8 sps:$4 sm:$0xff]   ;;  %v1661_v2 = vld [vmem:[%s2057_s10 + $0x84] ss:$8 sps:$4 sm:$0xff]   ;;  %v1665_v4 = vld [vmem:[%s2057_s10 + $0x80] ss:$8 sps:$4 sm:$0xff]  }
  0x64   : > { %549 = vmatpush1.bf16.msra.mxu0 %v2053_v35  ;;  %666 = vmatpush1.bf16.msra.mxu1 %v2053_v35  ;;  %v1658_v1 = vld [vmem:[%s2057_s10 + $0xa8] ss:$8 sps:$4 sm:$0xff]   ;;  %v1666_v5 = vld [vmem:[%s2057_s10 + $0xb8] ss:$8 sps:$4 sm:$0xff]   ;;  %v1667_v6 = vld [vmem:[%s2057_s10 + $0x94] ss:$8 sps:$4 sm:$0xff]  }
  0x65   : > { %550 = vmatprep.subr.bf16.mxu0 %v1833_v33  ;;  %667 = vmatprep.subr.bf16.mxu1 %v1833_v33  ;;  %v1669_v7 = vld [vmem:[%s2057_s10 + $0xcc] ss:$8 sps:$4 sm:$0xff]   ;;  %v1397_v8 = vld [vmem:[%s2057_s10 + $0xa0] sm:$0xff]  ;;  %v1416_v9 = vld [vmem:[%s2057_s10 + $0xd8] sm:$0xff] }
  0x66   : > { %v1671_v10 = vld [vmem:[%s2057_s10 + $0x90] ss:$8 sps:$4 sm:$0xff]   ;;  %v1405_v12 = vcombine.high %v1397_v8, %v1397_v8  ;;  %v1424_v13 = vcombine.high %v1416_v9, %v1416_v9  ;;  %v1404_v14 = vcombine.low %v1397_v8, %v1397_v8  ;;  %v1423_v15 = vcombine.low %v1416_v9, %v1416_v9 }
  0x67   : > { %v1672_v11 = vld [vmem:[%s2057_s10 + $0xc8] ss:$8 sps:$4 sm:$0xff]  }
  0x68   : > { %551 = vmatpush1.bf16.msra.mxu0 %v2064_v36  ;;  %668 = vmatpush1.bf16.msra.mxu1 %v2064_v36 }
  0x69   : > { %552 = vmatprep.subr.bf16.mxu0 %v1833_v33  ;;  %669 = vmatprep.subr.bf16.mxu1 %v1833_v33 }
  0x6c   : > { %553 = vmatpush1.bf16.msra.mxu0 %v2076_v39  ;;  %670 = vmatpush1.bf16.msra.mxu1 %v2076_v39 }
  0x6d   : > { %554 = vmatprep.subr.bf16.mxu0 %v1833_v33  ;;  %671 = vmatprep.subr.bf16.mxu1 %v1833_v33 }
  0x70   : > { %555 = vmatpush1.bf16.msra.mxu0 %v2086_v40  ;;  %672 = vmatpush1.bf16.msra.mxu1 %v2086_v40 }
  0x71   : > { %556 = vmatprep.subr.bf16.mxu0 %v1833_v33  ;;  %673 = vmatprep.subr.bf16.mxu1 %v1833_v33 }
  0x74   : > { %557 = vmatpush1.bf16.msra.mxu0 %v2095_v41  ;;  %674 = vmatpush1.bf16.msra.mxu1 %v2095_v41 }
  0x75   : > { %558 = vmatprep.subr.bf16.mxu0 %v1833_v33  ;;  %675 = vmatprep.subr.bf16.mxu1 %v1833_v33 }
  0x78   : > { %559 = vmatpush1.bf16.msra.mxu0 %v2104_v42  ;;  %676 = vmatpush1.bf16.msra.mxu1 %v2104_v42 }
  0x79   : > { %572 = vmatprep.subr.bf16.mxu0 %v1833_v33  ;;  %689 = vmatprep.subr.bf16.mxu1 %v1833_v33 }
  0x7c   : > { %573 = vmatpush2.bf16.msra.mxu0 %v2115_v44  ;;  %690 = vmatpush2.bf16.msra.mxu1 %v2115_v44 }
  0x7d   : > { %574 = vmatprep.subr.bf16.mxu0 %v1833_v33  ;;  %691 = vmatprep.subr.bf16.mxu1 %v1833_v33 }
  0x80   : > { %575 = vmatpush2.bf16.msra.mxu0 %v2122_v45  ;;  %692 = vmatpush2.bf16.msra.mxu1 %v2122_v45 }
  0x81   : > { %785 = vmatprep.subr.bf16.mxu0 %v1833_v33  ;;  %909 = vmatprep.subr.bf16.mxu1 %v1833_v33 }
  0x83   : > { %577 = vmatmul.mubr.bf16.vlgmr.msra.gmra.mxu0 %v1633_v46  ;;  %694 = vmatmul.mubr.bf16.vlgmr.msra.gmra.mxu1 %v1636_v47 }
  0x84   : > { %786 = vmatpush1.bf16.msra.mxu0 %v2032_v32  ;;  %910 = vmatpush1.bf16.msra.mxu1 %v2032_v32 }
  0x85   : > { %787 = vmatprep.subr.bf16.mxu0 %v1833_v33  ;;  %911 = vmatprep.subr.bf16.mxu1 %v1833_v33 }
  0x86   : > { %1369 = vmatprep.mubr.msk.bf16.mxu0 %vm527_vm0, %v1639_v48  ;;  %1388 = vmatprep.mubr.msk.bf16.mxu1 %vm527_vm0, %v1642_v49 }
  0x88   : > { %788 = vmatpush1.bf16.msra.mxu0 %v2041_v34  ;;  %912 = vmatpush1.bf16.msra.mxu1 %v2041_v34 }
  0x89   : > { %789 = vmatprep.subr.bf16.mxu0 %v1833_v33  ;;  %913 = vmatprep.subr.bf16.mxu1 %v1833_v33 }
  0x8b   : > { %585 = vmatmul.mubr.bf16.gmra.mxu0 %v1641_v50  ;;  %702 = vmatmul.mubr.bf16.gmra.mxu1 %v1644_v51 }
  0x8c   : > { %790 = vmatpush1.bf16.msra.mxu0 %v2053_v35  ;;  %914 = vmatpush1.bf16.msra.mxu1 %v2053_v35 }
  0x8d   : > { %791 = vmatprep.subr.bf16.mxu0 %v1833_v33  ;;  %915 = vmatprep.subr.bf16.mxu1 %v1833_v33 }
  0x8e   : > { %1370 = vmatprep.mubr.msk.bf16.mxu0 %vm527_vm0, %v1645_v52  ;;  %1389 = vmatprep.mubr.msk.bf16.mxu1 %vm527_vm0, %v1648_v53  ;;  %v2223_v52 = vld [vmem:[%s2314_s2] ss:$0 sm:$0xff] }
  0x90   : > { %792 = vmatpush1.bf16.msra.mxu0 %v2064_v36  ;;  %916 = vmatpush1.bf16.msra.mxu1 %v2064_v36 }
  0x91   : > { %793 = vmatprep.subr.bf16.mxu0 %v1833_v33  ;;  %917 = vmatprep.subr.bf16.mxu1 %v1833_v33 }
  0x93   : > { %593 = vmatmul.mubr.bf16.gmra.mxu0 %v1647_v54  ;;  %710 = vmatmul.mubr.bf16.gmra.mxu1 %v1650_v55 }
  0x94   : > { %794 = vmatpush1.bf16.msra.mxu0 %v2076_v39  ;;  %918 = vmatpush1.bf16.msra.mxu1 %v2076_v39 }
  0x95   : > { %795 = vmatprep.subr.bf16.mxu0 %v1833_v33  ;;  %919 = vmatprep.subr.bf16.mxu1 %v1833_v33 }
  0x96   : > { %1371 = vmatprep.mubr.msk.bf16.mxu0 %vm527_vm0, %v1357_v58  ;;  %1390 = vmatprep.mubr.msk.bf16.mxu1 %vm527_vm0, %v1386_v59 }
  0x98   : > { %796 = vmatpush1.bf16.msra.mxu0 %v2086_v40  ;;  %920 = vmatpush1.bf16.msra.mxu1 %v2086_v40 }
  0x99   : > { %797 = vmatprep.subr.bf16.mxu0 %v1833_v33  ;;  %921 = vmatprep.subr.bf16.mxu1 %v1833_v33 }
  0x9b   : > { %601 = vmatmul.mubr.bf16.gmra.mxu0 %v1356_v60  ;;  %718 = vmatmul.mubr.bf16.gmra.mxu1 %v1385_v61 }
  0x9c   : > { %798 = vmatpush1.bf16.msra.mxu0 %v2095_v41  ;;  %922 = vmatpush1.bf16.msra.mxu1 %v2095_v41 }
  0x9d   : > { %799 = vmatprep.subr.bf16.mxu0 %v1833_v33  ;;  %923 = vmatprep.subr.bf16.mxu1 %v1833_v33 }
  0x9e   : > { %1406 = vmatprep.mubr.msk.bf16.mxu0 %vm527_vm0, %v1657_v62  ;;  %1425 = vmatprep.mubr.msk.bf16.mxu1 %vm527_vm0, %v1660_v63 }
  0xa0   : > { %800 = vmatpush1.bf16.msra.mxu0 %v2104_v42  ;;  %924 = vmatpush1.bf16.msra.mxu1 %v2104_v42 }
  0xa1   : > { %813 = vmatprep.subr.bf16.mxu0 %v1833_v33  ;;  %937 = vmatprep.subr.bf16.mxu1 %v1833_v33 }
  0xa4   : > { %814 = vmatpush2.bf16.msra.mxu0 %v2115_v44  ;;  %938 = vmatpush2.bf16.msra.mxu1 %v2115_v44 }
  0xa5   : > { %815 = vmatprep.subr.bf16.mxu0 %v1833_v33  ;;  %939 = vmatprep.subr.bf16.mxu1 %v1833_v33 }
  0xa8   : > { %816 = vmatpush2.bf16.msra.mxu0 %v2122_v45  ;;  %940 = vmatpush2.bf16.msra.mxu1 %v2122_v45 }
  0xab   : > { %818 = vmatmul.mubr.bf16.vlgmr.msra.gmra.mxu0 %v1655_v0  ;;  %942 = vmatmul.mubr.bf16.vlgmr.msra.gmra.mxu1 %v1658_v1 }
  0xac   : > { %1407 = vmatprep.mubr.msk.bf16.mxu0 %vm527_vm0, %v1661_v2  ;;  %1426 = vmatprep.mubr.msk.bf16.mxu1 %vm527_vm0, %v1663_v3 }
  0xb3   : > { %826 = vmatmul.mubr.bf16.gmra.mxu0 %v1665_v4  ;;  %950 = vmatmul.mubr.bf16.gmra.mxu1 %v1666_v5 }
  0xb4   : > { %1408 = vmatprep.mubr.msk.bf16.mxu0 %vm527_vm0, %v1667_v6  ;;  %1427 = vmatprep.mubr.msk.bf16.mxu1 %vm527_vm0, %v1669_v7 }
  0xbb   : > { %834 = vmatmul.mubr.bf16.gmra.mxu0 %v1671_v10  ;;  %958 = vmatmul.mubr.bf16.gmra.mxu1 %v1672_v11 }
  0xbc   : > { %1409 = vmatprep.mubr.msk.bf16.mxu0 %vm527_vm0, %v1405_v12  ;;  %1428 = vmatprep.mubr.msk.bf16.mxu1 %vm527_vm0, %v1424_v13 }
  0xc3   : > { %842 = vmatmul.mubr.bf16.gmra.mxu0 %v1404_v14  ;;  %966 = vmatmul.mubr.bf16.gmra.mxu1 %v1423_v15 }
 0x143   : > { %v578_v16 = vpop.f32.mrf.mxu0  ;;  %v695_v17 = vpop.f32.mrf.mxu1 }
 0x144   : > { %v725_v48 = vmax.f32 %v578_v16, %v695_v17 }
 0x145   : > { %v580_v18 = vpop.f32.mrf.mxu0  ;;  %v697_v19 = vpop.f32.mrf.mxu1 }
 0x147   : > { %v581_v20 = vpop.f32.mrf.mxu0  ;;  %v698_v21 = vpop.f32.mrf.mxu1 }
 0x148   : > { %v726_v55 = vmax.f32 %v581_v20, %v698_v21 }
 0x149   : > { %v583_v22 = vpop.f32.mrf.mxu0  ;;  %v700_v23 = vpop.f32.mrf.mxu1 }
 0x14b   : > { %v586_v24 = vpop.f32.mrf.mxu0  ;;  %v703_v25 = vpop.f32.mrf.mxu1 }
 0x14c   : > { %v727_v63 = vmax.f32 %v586_v24, %v703_v25 }
 0x14d   : > { %v588_v26 = vpop.f32.mrf.mxu0  ;;  %v705_v27 = vpop.f32.mrf.mxu1 }
 0x14f   : > { %v589_v28 = vpop.f32.mrf.mxu0  ;;  %v706_v29 = vpop.f32.mrf.mxu1 }
 0x150   : > { %v728_v9 = vmax.f32 %v589_v28, %v706_v29 }
 0x151   : > { %v591_v30 = vpop.f32.mrf.mxu0  ;;  %v708_v31 = vpop.f32.mrf.mxu1 }
 0x153   : > { %v2208_v32 = vpop.f32.mrf.mxu0  ;;  %v2210_v33 = vpop.f32.mrf.mxu1 }
 0x154   : > { %v729_v19 = vmax.f32 %v2208_v32, %v2210_v33 }
 0x155   : > { %v596_v34 = vpop.f32.mrf.mxu0  ;;  %v713_v35 = vpop.f32.mrf.mxu1 }
 0x157   : > { %v2212_v36 = vpop.f32.mrf.mxu0  ;;  %v2214_v37 = vpop.f32.mrf.mxu1 }
 0x158   : > { %v730_v29 = vmax.f32 %v2212_v36, %v2214_v37 }
 0x159   : > { %v599_v38 = vpop.f32.mrf.mxu0  ;;  %v716_v39 = vpop.f32.mrf.mxu1 }
 0x15b   : > { %v2216_v40 = vpop.f32.mrf.mxu0  ;;  %v2218_v41 = vpop.f32.mrf.mxu1 }
 0x15d   : > { %v604_v42 = vpop.f32.mrf.mxu0  ;;  %v721_v43 = vpop.f32.mrf.mxu1 }
 0x15e   : > { %v731_v43 = vmax.f32 %v2216_v40, %v2218_v41 }
 0x15f   : > { %v605_v44 = vpop.f32.mrf.mxu0  ;;  %v722_v45 = vpop.f32.mrf.mxu1 }
 0x161   : > { %v606_v46 = vpop.f32.mrf.mxu0  ;;  %v723_v47 = vpop.f32.mrf.mxu1 }
 0x16b   : > { %v819_v49 = vpop.f32.mrf.mxu0  ;;  %v943_v50 = vpop.f32.mrf.mxu1 }
 0x16c   : > { %v849_v51 = vmax.f32 %v725_v48, %v819_v49 }
 0x16d   : > { %v821_v53 = vpop.f32.mrf.mxu0  ;;  %v945_v54 = vpop.f32.mrf.mxu1 }
 0x16e   : > { %v973_v56 = vmax.f32 %v849_v51, %v943_v50 }
 0x16f   : > { %v822_v57 = vpop.f32.mrf.mxu0  ;;  %v946_v58 = vpop.f32.mrf.mxu1 }
 0x170   : > { %v987_v59 = vadd.f32 %v2223_v52, %v973_v56  ;;  %v850_v60 = vmax.f32 %v726_v55, %v822_v57 }
 0x171   : > { %v824_v61 = vpop.f32.mrf.mxu0  ;;  %v948_v62 = vpop.f32.mrf.mxu1 }
 0x172   : > { %v994_v0 = vmax.f32 %v987_v59, 0.0  ;;  %v974_v1 = vmax.f32 %v850_v60, %v946_v58 }
 0x173   : > { %v827_v2 = vpop.f32.mrf.mxu0  ;;  %v951_v3 = vpop.f32.mrf.mxu1 }
 0x174   : > { %v1452_v4 = vpack.c.bf16 %v994_v0, %v994_v0  ;;  %v988_v5 = vadd.f32 %v2223_v52, %v974_v1  ;;  %v851_v6 = vmax.f32 %v727_v63, %v827_v2 }
 0x175   : > { %v829_v7 = vpop.f32.mrf.mxu0  ;;  %v953_v8 = vpop.f32.mrf.mxu1 }
 0x176   : > { %1031 = vst.msk [vmem:[%s2229_s12] sm:$0xf] %vm1030_vm2, %v1452_v4  ;;  %v995_v10 = vmax.f32 %v988_v5, 0.0  ;;  %v975_v11 = vmax.f32 %v851_v6, %v951_v3 }
 0x177   : > { %v830_v12 = vpop.f32.mrf.mxu0  ;;  %v954_v13 = vpop.f32.mrf.mxu1 }
 0x178   : > { %v1453_v14 = vpack.c.bf16 %v995_v10, %v995_v10  ;;  %v989_v15 = vadd.f32 %v2223_v52, %v975_v11  ;;  %v852_v16 = vmax.f32 %v728_v9, %v830_v12 }
 0x179   : > { %v832_v17 = vpop.f32.mrf.mxu0  ;;  %v956_v18 = vpop.f32.mrf.mxu1 }
 0x17a   : > { %1032 = vst.msk [vmem:[%s2229_s12 + $0x4] sm:$0xf] %vm1030_vm2, %v1453_v14  ;;  %v996_v20 = vmax.f32 %v989_v15, 0.0  ;;  %v976_v21 = vmax.f32 %v852_v16, %v954_v13 }
 0x17b   : > { %v835_v22 = vpop.f32.mrf.mxu0  ;;  %v959_v23 = vpop.f32.mrf.mxu1 }
 0x17c   : > { %v1454_v24 = vpack.c.bf16 %v996_v20, %v996_v20  ;;  %v990_v25 = vadd.f32 %v2223_v52, %v976_v21  ;;  %v853_v26 = vmax.f32 %v729_v19, %v835_v22 }
 0x17d   : > { %v837_v27 = vpop.f32.mrf.mxu0  ;;  %v961_v28 = vpop.f32.mrf.mxu1 }
 0x17e   : > { %1033 = vst.msk [vmem:[%s2229_s12 + $0x8] sm:$0xf] %vm1030_vm2, %v1454_v24  ;;  %v997_v30 = vmax.f32 %v990_v25, 0.0  ;;  %v977_v31 = vmax.f32 %v853_v26, %v959_v23 }
 0x17f   : > { %v838_v32 = vpop.f32.mrf.mxu0  ;;  %v962_v33 = vpop.f32.mrf.mxu1 }
 0x180   : > { %v1455_v34 = vpack.c.bf16 %v997_v30, %v997_v30  ;;  %v991_v35 = vadd.f32 %v2223_v52, %v977_v31  ;;  %v854_v38 = vmax.f32 %v730_v29, %v838_v32 }
 0x181   : > { %v840_v39 = vpop.f32.mrf.mxu0  ;;  %v964_v42 = vpop.f32.mrf.mxu1 }
 0x182   : > { %1034 = vst.msk [vmem:[%s2229_s12 + $0xc] sm:$0xf] %vm1030_vm2, %v1455_v34  ;;  %v998_v44 = vmax.f32 %v991_v35, 0.0  ;;  %v978_v36 = vmax.f32 %v854_v38, %v962_v33 }
 0x183   : > { %v843_v37 = vpop.f32.mrf.mxu0  ;;  %v967_v45 = vpop.f32.mrf.mxu1 }
 0x184   : > { %v1456_v46 = vpack.c.bf16 %v998_v44, %v998_v44  ;;  %v992_v47 = vadd.f32 %v2223_v52, %v978_v36  ;;  %v855_v48 = vmax.f32 %v731_v43, %v843_v37 }
 0x185   : > { %v845_v49 = vpop.f32.mrf.mxu0  ;;  %v969_v50 = vpop.f32.mrf.mxu1 }
 0x186   : > { %1035 = vst.msk [vmem:[%s2229_s12 + $0x10] sm:$0xf] %vm1030_vm2, %v1456_v46  ;;  %v999_v51 = vmax.f32 %v992_v47, 0.0  ;;  %v979_v53 = vmax.f32 %v855_v48, %v967_v45 }
 0x187   : > { %v846_v54 = vpop.f32.mrf.mxu0  ;;  %v970_v40 = vpop.f32.mrf.mxu1 }
 0x188   : > { %v1457_v41 = vpack.c.bf16 %v999_v51, %v999_v51  ;;  %v993_v55 = vadd.f32 %v2223_v52, %v979_v53 }
 0x189   : > { %v847_v56 = vpop.f32.mrf.mxu0  ;;  %v971_v57 = vpop.f32.mrf.mxu1 }
 0x18a   : > { %1036 = vst.msk [vmem:[%s2229_s12 + $0x14] sm:$0xf] %vm1030_vm2, %v1457_v41  ;;  %v1000_v58 = vmax.f32 %v993_v55, 0.0  ;;  %1044 = sbr.rel (!%p1885_p5) target bundleno = 457 (0x1c9), region = 88 }
 0x18c   : > { %v1458_v59 = vpack.c.bf16 %v1000_v58, %v1000_v58 }
 0x18e   : > { %1037 = vst.msk [vmem:[%s2229_s12 + $0x18] sm:$0xf] %vm1030_vm2, %v1458_v59 }
 0x18f   : > { %s2337_s9 = smov (!%p1047_p4, %s1046_s9), 7 }
 0x190   : > { %s1437_s18 = sshll.u32 %s2337_s9, 6 }
 0x191   : > { %p1440_p6 = scmp.eq.s32.totalorder %s1437_s18, 0 }
 0x192   : > { %1677 = sdivrem.u32 (!%p1440_p6), %s2337_s9, 7 }
 0x193   : > { %1055 = sbr.rel (%p1440_p6) target bundleno = 457 (0x1c9), region = 92 }
 0x19b   : > { %s2269_s20 = spop.drf %1677 }
 0x19c   : > { %p1441_p5 = scmp.le.s32.totalorder %s2269_s20, 0 }
 0x19d   : > { %s2324_s15 = smov (!%p1441_p5), %s2263_s17  ;;  %s2325_s21 = smov (!%p1441_p5), %s2229_s12 }
 0x19e   : > { %1290 = sbr.rel (%p1441_p5) target bundleno = 432 (0x1b0), region = 202  ;;  %s2278_s22 = smov (!%p1441_p5), 0  }
 0x19f   : > { %s2280_s23 = smov (!%p1441_p5), 0  }
 0x1a3 LB: >> { %v1073_v52 = vld [vmem:[%s1807_s21] sm:$0xf]  ;;  %v1075_v60 = vld [vmem:[%s1807_s21 + $0x4] sm:$0xf]  ;;  %v1077_v61 = vld [vmem:[%s1807_s21 + $0x8] sm:$0xf]  ;;  %s1815_s23 = sphi %s2280_s23, %s1067_s23   ;;  %s1811_s22 = sphi %s2278_s22, %s2326_s22   ;;  %s1807_s21 = sphi %s2325_s21, %s1092_s21   ;;  %s1803_s15 = sphi %s2324_s15, %s1093_s15  }
 0x1a4   : >> { %1074 = vst [vmem:[%s1803_s15] sm:$0xf] %v1073_v52  ;;  %1076 = vst [vmem:[%s1803_s15 + $0x4] sm:$0xf] %v1075_v60  ;;  %v1079_v62 = vld [vmem:[%s1807_s21 + $0xc] sm:$0xf]  ;;  %s1087_s25 = sadd.s32 1, %s1811_s22 }
 0x1a5   : >> { %1078 = vst [vmem:[%s1803_s15 + $0x8] sm:$0xf] %v1077_v61  ;;  %v1081_v63 = vld [vmem:[%s1807_s21 + $0x10] sm:$0xf]  ;;  %v1083_v0 = vld [vmem:[%s1807_s21 + $0x14] sm:$0xf]  ;;  %p1088_p7 = scmp.ge.s32.totalorder %s1087_s25, %s2269_s20 }
 0x1a6   : >> { %1080 = vst [vmem:[%s1803_s15 + $0xc] sm:$0xf] %v1079_v62  ;;  %1082 = vst [vmem:[%s1803_s15 + $0x10] sm:$0xf] %v1081_v63  ;;  %v1085_v1 = vld [vmem:[%s1807_s21 + $0x18] sm:$0xf] }
 0x1a7   : >> { %1084 = vst [vmem:[%s1803_s15 + $0x14] sm:$0xf] %v1083_v0  ;;  %1086 = vst [vmem:[%s1803_s15 + $0x18] sm:$0xf] %v1085_v1  ;;  %s2339_s25 = smov (%p1088_p7, %s1087_s25), 0  ;;  %s1067_s23 = sadd.s32 1, %s1815_s23  }
 0x1a8   : >> { %s1090_s26 = smul.u32 28, %s2339_s25  ;;  %p1066_p8 = scmp.ge.s32.totalorder %s1067_s23, %s2269_s20 }
 0x1a9   : >> { %s2326_s22 = smov %s2339_s25 }
 0x1aa   : >> { %s1092_s21 = scalar_lea.vmem %s2229_s12, %s1090_s26 [#allocation3]   ;;  %s1093_s15 = scalar_lea.vmem %s2263_s17, %s1090_s26  }
 0x1ab   : > { %1069 = sbr.rel (!%p1066_p8) target bundleno = 419 (0x1a3), region = 208 }
 0x1b0 PF: > { %1679 = sdivrem.u32 %s2337_s9, 7 }
 0x1b1   : > { %s1442_s27 = smul.u32 28, %s2269_s20 }
 0x1b3   : > { %s1098_s29 = scalar_lea.vmem %s2229_s12, %s1442_s27 [#allocation3]   ;;  %s1100_s24 = scalar_lea.vmem %s2263_s17, %s1442_s27  }
 0x1b9   : > { %s1680_s28 = spop.drf %1679 }
 0x1ba   : > { %p1444_p9 = scmp.le.s32.totalorder %s1680_s28, 0 }
 0x1bb   : > { %s1817_s30 = smov (!%p1444_p9), %s1100_s24   ;;  %s1821_s4 = smov (!%p1444_p9), %s1098_s29  }
 0x1bc   : > { %1304 = sbr.rel (%p1444_p9) target bundleno = 457 (0x1c9), region = 213  ;;  %s1825_s5 = smov (!%p1444_p9), 0  }
 0x1bd   : > { %s1829_s14 = smov (!%p1444_p9), 0  }
 0x1c1 LB: >> { %v1110_v2 = vld [vmem:[%s1823_s4] sm:$0xf]  ;;  %s1112_s7 = sadd.s32 1, %s1827_s5  ;;  %s1104_s14 = sadd.s32 1, %s1831_s14   ;;  %s1831_s14 = sphi %s1829_s14, %s1104_s14   ;;  %s1827_s5 = sphi %s1825_s5, %s1826_s5   ;;  %s1823_s4 = sphi %s1821_s4, %s1117_s4   ;;  %s1819_s30 = sphi %s1817_s30, %s1118_s30  }
 0x1c2   : >> { %1111 = vst [vmem:[%s1819_s30] sm:$0xf] %v1110_v2  ;;  %p1113_p10 = scmp.ge.s32.totalorder %s1112_s7, %s1680_s28  ;;  %p1103_p11 = scmp.ge.s32.totalorder %s1104_s14, %s1680_s28 }
 0x1c4   : >> { %s2341_s7 = smov (%p1113_p10, %s1112_s7), 0  ;;  %1106 = sbr.rel (!%p1103_p11) target bundleno = 449 (0x1c1), region = 219 }
 0x1c5   : >> { %s1445_s12 = sshll.u32 %s2341_s7, 2  ;;  %s1826_s5 = smov %s2341_s7  }
 0x1c6   : >> { %s1117_s4 = scalar_lea.vmem %s1098_s29, %s1445_s12 [#allocation3]   ;;  %s1118_s30 = scalar_lea.vmem %s1100_s24, %s1445_s12  }
 0x1c9 PF: > { %p10_p12 = scmp.ge.s32.totalorder %s1873_s16, 4   ;;  %s2327_s12 = smov %s1763_s13 }
 0x1ca   : > { %s2328_s13 = smov %s1883_s19  ;;  %s2329_s14 = smov %s1873_s16 }
 0x1cb   :  { %12 = sbr.rel (!%p10_p12) target bundleno = 2 (0x2), region = 230 }

// kernel: net_forward.5
= control target key start
LH: loop header
LB: loop body
LE: loop exit
PB: predicated region body
PF: predicated region fallthrough
CT: control target
= control target key end

     0   :  { %v776_v1 = vmov 0   ;;  %v91_v18 = vlaneseq  ;;  %v777_v26 = vmov 1983009808   ;;  %vm257_vm0 = vcmask 130048   ;;  %s987_s0 = inlined_call_operand.vmem [shape: bf16[4,400], index: 0, kind: input, shape index: {}]   ;;  %s988_s1 = inlined_call_operand.vmem [shape: bf16[400,128], index: 1, kind: input, shape index: {}]   ;;  %s989_s2 = inlined_call_operand.vmem [shape: f32[1,128], index: 2, kind: input, shape index: {}]   ;;  %s990_s3 = inlined_call_operand.vmem [shape: bf16[128,128], index: 3, kind: input, shape index: {}]   ;;  %s991_s4 = inlined_call_operand.vmem [shape: f32[1,128], index: 4, kind: input, shape index: {}]   ;;  %s992_s5 = inlined_call_operand.vmem [shape: bf16[128,128], index: 5, kind: input, shape index: {}]   ;;  %s993_s6 = inlined_call_operand.vmem [shape: f32[1,128], index: 6, kind: input, shape index: {}]   ;;  %s994_s7 = inlined_call_operand.hbm [shape: f32[4,128], index: 7, kind: output, shape index: {}]  }
   0x1   :  { %v712_v0 = vld [vmem:[%s988_s1 + $0x78] sm:$0xff]   ;;  %301 = vmatprep.subr.bf16.mxu1 %v776_v1  ;;  %v715_v4 = vld [vmem:[%s988_s1 + $0x70] sm:$0xff]   ;;  %v718_v7 = vld [vmem:[%s988_s1 + $0x68] sm:$0xff]   ;;  %v89_v27 = vunpack.c.l.s4 %v777_v26  ;;  %v778_v39 = vmov 0.0  }
   0x2   :  { %v713_v2 = vld [vmem:[%s988_s1 + $0xb8] sm:$0xff]   ;;  %627 = vmatprep.subr.bf16.mxu0 %v712_v0  ;;  %v716_v5 = vld [vmem:[%s988_s1 + $0xb0] sm:$0xff]   ;;  %v719_v8 = vld [vmem:[%s988_s1 + $0xa8] sm:$0xff]   ;;  %v92_v23 = vshrl.u32 %v91_v18, 7 }
   0x3   :  { %v714_v3 = vld [vmem:[%s988_s1 + $0x38] sm:$0xff]   ;;  %302 = vmatpush1.bf16.msra.mxu1 %v713_v2  ;;  %v717_v6 = vld [vmem:[%s988_s1 + $0x30] sm:$0xff]   ;;  %v720_v9 = vld [vmem:[%s988_s1 + $0x28] sm:$0xff]   ;;  %v90_v30 = vunpack.c.0.s8 %v89_v27 }
   0x4   :  { %628 = vmatpush3.bf16.msra.mxu0 %v714_v3  ;;  %303 = vmatprep.subr.bf16.mxu1 %v776_v1  ;;  %v721_v10 = vld [vmem:[%s988_s1 + $0x60] sm:$0xff]   ;;  %v724_v13 = vld [vmem:[%s988_s1 + $0x58] sm:$0xff]   ;;  %v727_v16 = vld [vmem:[%s988_s1 + $0x50] sm:$0xff]  }
   0x5   :  { %629 = vmatprep.subr.bf16.mxu0 %v715_v4  ;;  %v722_v11 = vld [vmem:[%s988_s1 + $0xa0] sm:$0xff]   ;;  %v725_v14 = vld [vmem:[%s988_s1 + $0x98] sm:$0xff]   ;;  %v728_v17 = vld [vmem:[%s988_s1 + $0x90] sm:$0xff]   ;;  %v93_v32 = vsub.s32 %v90_v30, %v92_v23 }
   0x6   :  { %v723_v12 = vld [vmem:[%s988_s1 + $0x20] sm:$0xff]   ;;  %v726_v15 = vld [vmem:[%s988_s1 + $0x18] sm:$0xff]   ;;  %v729_v19 = vld [vmem:[%s988_s1 + $0x10] sm:$0xff]  }
   0x7   :  { %304 = vmatpush1.bf16.msra.mxu1 %v716_v5  ;;  %v730_v20 = vld [vmem:[%s988_s1 + $0x48] sm:$0xff]   ;;  %v733_v24 = vld [vmem:[%s988_s1 + $0x40] sm:$0xff]   ;;  %v738_v36 = vld [vmem:[%s990_s3 + $0x38] sm:$0xff]  }
   0x8   :  { %630 = vmatpush3.bf16.msra.mxu0 %v717_v6  ;;  %305 = vmatprep.subr.bf16.mxu1 %v776_v1  ;;  %v731_v21 = vld [vmem:[%s988_s1 + $0x88] sm:$0xff]   ;;  %v28_v25 = vld [vmem:[%s987_s0] sm:$0xff]  ;;  %v739_v40 = vld [vmem:[%s990_s3 + $0x30] sm:$0xff]  }
   0x9   :  { %631 = vmatprep.subr.bf16.mxu0 %v718_v7  ;;  %v732_v22 = vld [vmem:[%s988_s1 + $0x8] sm:$0xff]   ;;  %v734_v28 = vld [vmem:[%s988_s1 + $0x80] sm:$0xff]   ;;  %v87_v29 = vcombine.high %v28_v25, %v28_v25  ;;  %v94_v34 = vrot.slane %v28_v25, %v93_v32 }
   0xa   :  { %v735_v31 = vld [vmem:[%s988_s1] sm:$0xff]  }
   0xb   :  { %306 = vmatpush1.bf16.msra.mxu1 %v719_v8  ;;  %v737_v33 = vld [vmem:[%s988_s1 + $0xc0] sm:$0xff]   ;;  %v101_v35 = vrot.slane %v87_v29, %v93_v32  ;;  %v102_v37 = vcombine.high %v94_v34, %v94_v34 }
   0xc   :  { %632 = vmatpush3.bf16.msra.mxu0 %v720_v9  ;;  %307 = vmatprep.subr.bf16.mxu1 %v776_v1 }
   0xd   :  { %633 = vmatprep.subr.bf16.mxu0 %v721_v10  ;;  %v103_v38 = vcombine.high %v101_v35, %v101_v35  ;;  %293 = vmatprep.mubr.bf16.mxu0 %v102_v37 }
   0xf   :  { %308 = vmatpush1.bf16.msra.mxu1 %v722_v11  ;;  %608 = vmatprep.mubr.msk.bf16.mxu1 %vm257_vm0, %v103_v38 }
  0x10   :  { %634 = vmatpush3.bf16.msra.mxu0 %v723_v12  ;;  %309 = vmatprep.subr.bf16.mxu1 %v776_v1 }
  0x11   :  { %635 = vmatprep.subr.bf16.mxu0 %v724_v13 }
  0x13   :  { %310 = vmatpush1.bf16.msra.mxu1 %v725_v14 }
  0x14   :  { %636 = vmatpush3.bf16.msra.mxu0 %v726_v15  ;;  %311 = vmatprep.subr.bf16.mxu1 %v776_v1 }
  0x15   :  { %637 = vmatprep.subr.bf16.mxu0 %v727_v16 }
  0x17   :  { %312 = vmatpush1.bf16.msra.mxu1 %v728_v17 }
  0x18   :  { %638 = vmatpush3.bf16.msra.mxu0 %v729_v19  ;;  %313 = vmatprep.subr.bf16.mxu1 %v776_v1 }
  0x19   :  { %639 = vmatprep.subr.bf16.mxu0 %v730_v20 }
  0x1b   :  { %314 = vmatpush1.bf16.msra.mxu1 %v731_v21 }
  0x1c   :  { %640 = vmatpush3.bf16.msra.mxu0 %v732_v22  ;;  %315 = vmatprep.subr.bf16.mxu1 %v776_v1 }
  0x1d   :  { %641 = vmatprep.subr.bf16.mxu0 %v733_v24 }
  0x1f   :  { %316 = vmatpush1.bf16.msra.mxu1 %v734_v28 }
  0x20   :  { %642 = vmatpush3.bf16.msra.mxu0 %v735_v31  ;;  %331 = vmatprep.subr.bf16.mxu1 %v776_v1 }
  0x21   :  { %667 = vmatprep.subr.bf16.mxu0 %v778_v39 }
  0x23   :  { %332 = vmatpush2.bf16.msra.mxu1 %v737_v33  ;;  %294 = vmatmul.mubr.bf16.vlgmr.msra.gmra.mxu0 %v94_v34 }
  0x24   :  { %668 = vmatpush3.bf16.msra.mxu0 %v738_v36  ;;  %687 = vmatprep.subr.bf16.mxu1 %v778_v39 }
  0x25   :  { %12 = vsyncpa [#allocation3], 0  ;;  %669 = vmatprep.subr.bf16.mxu0 %v778_v39  ;;  %v740_v41 = vld [vmem:[%s990_s3 + $0x28] sm:$0xff]   ;;  %v741_v42 = vld [vmem:[%s990_s3 + $0x20] sm:$0xff]   ;;  %vm779_vm1 = vmmov 0   ;;  %s780_s16 = smov [#allocation2]  }
  0x26   :  { %334 = vmatmul.mubr.bf16.vlgmr.msra.gmra.mxu1 %v101_v35  ;;  %v742_v43 = vld [vmem:[%s990_s3 + $0x18] sm:$0xff]   ;;  %v743_v44 = vld [vmem:[%s990_s3 + $0x10] sm:$0xff]   ;;  %v744_v45 = vld [vmem:[%s990_s3 + $0x8] sm:$0xff]   ;;  %683 = vmatprep.mubr.msk.bf16.mxu0 %vm779_vm1, %v778_v39  ;;  %s574_s17 = sshll.u32 %s780_s16, 4  ;;  %s575_s17 = int_to_ptr.vmem [resolvable:$true] %s574_s17 }
  0x27   :  { %v745_v46 = vld [vmem:[%s990_s3] sm:$0xff]   ;;  %703 = vmatprep.mubr.msk.bf16.mxu1 %vm779_vm1, %v778_v39  ;;  %v746_v47 = vld [vmem:[%s992_s5 + $0x38] sm:$0xff]   ;;  %v747_v48 = vld [vmem:[%s992_s5 + $0x30] sm:$0xff]   ;;  %p759_p1 = scmp.lt.s32.totalorder %s575_s17, %s575_s17 }
  0x28   :  { %670 = vmatpush3.bf16.msra.mxu0 %v739_v40  ;;  %688 = vmatpush3.bf16.msra.mxu1 %v746_v47  ;;  %v748_v49 = vld [vmem:[%s992_s5 + $0x28] sm:$0xff]   ;;  %v749_v50 = vld [vmem:[%s992_s5 + $0x20] sm:$0xff]   ;;  %v750_v51 = vld [vmem:[%s992_s5 + $0x18] sm:$0xff]  }
  0x29   :  { %671 = vmatprep.subr.bf16.mxu0 %v778_v39  ;;  %689 = vmatprep.subr.bf16.mxu1 %v778_v39  ;;  %v751_v52 = vld [vmem:[%s992_s5 + $0x10] sm:$0xff]   ;;  %v582_v55 = vld [vmem:[%s989_s2] ss:$0 sm:$0xff]  ;;  %v752_v3 = vld [vmem:[%s992_s5 + $0x8] sm:$0xff]  }
  0x2a   :  { %v753_v4 = vld [vmem:[%s992_s5] sm:$0xff]  }
  0x2b   :  { %v609_v5 = vld [vmem:[%s991_s4] ss:$0 sm:$0xff]  ;;  %s754_s4 = scalar_lea.vmem %s575_s17, 64 }
  0x2c   :  { %672 = vmatpush3.bf16.msra.mxu0 %v740_v41  ;;  %690 = vmatpush3.bf16.msra.mxu1 %v747_v48  ;;  %v618_v13 = vld [vmem:[%s993_s6] ss:$0 sm:$0xff]  ;;  %p755_p0 = scmp.ne.s32.totalorder %s575_s17, %s754_s4  ;;  %p760_p2 = scmp.lt.s32.totalorder %s754_s4, %s754_s4 }
  0x2d   :  { %673 = vmatprep.subr.bf16.mxu0 %v778_v39  ;;  %691 = vmatprep.subr.bf16.mxu1 %v778_v39 }
  0x2e   :  { %p761_p3 = por %p760_p2, %p759_p1 }
  0x30   :  { %674 = vmatpush3.bf16.msra.mxu0 %v741_v42  ;;  %692 = vmatpush3.bf16.msra.mxu1 %v748_v49  ;;  %p762_p4 = pnand %p761_p3, %p755_p0 }
  0x31   :  { %675 = vmatprep.subr.bf16.mxu0 %v778_v39  ;;  %693 = vmatprep.subr.bf16.mxu1 %v778_v39 }
  0x34   :  { %676 = vmatpush3.bf16.msra.mxu0 %v742_v43  ;;  %694 = vmatpush3.bf16.msra.mxu1 %v749_v50 }
  0x35   :  { %677 = vmatprep.subr.bf16.mxu0 %v778_v39  ;;  %695 = vmatprep.subr.bf16.mxu1 %v778_v39 }
  0x38   :  { %678 = vmatpush3.bf16.msra.mxu0 %v743_v44  ;;  %696 = vmatpush3.bf16.msra.mxu1 %v750_v51 }
  0x39   :  { %679 = vmatprep.subr.bf16.mxu0 %v778_v39  ;;  %697 = vmatprep.subr.bf16.mxu1 %v778_v39 }
  0x3c   :  { %680 = vmatpush3.bf16.msra.mxu0 %v744_v45  ;;  %698 = vmatpush3.bf16.msra.mxu1 %v751_v52 }
  0x3d   :  { %681 = vmatprep.subr.bf16.mxu0 %v778_v39  ;;  %699 = vmatprep.subr.bf16.mxu1 %v778_v39 }
  0x40   :  { %682 = vmatpush3.bf16.msra.mxu0 %v745_v46  ;;  %700 = vmatpush3.bf16.msra.mxu1 %v752_v3 }
  0x41   :  { %701 = vmatprep.subr.bf16.mxu1 %v778_v39 }
  0x44   :  { %702 = vmatpush3.bf16.msra.mxu1 %v753_v4 }
  0xe3   :  { %v643_v53 = vpop.f32.mrf.mxu0 }
  0xe5   :  { %v644_v54 = vpop.f32.mrf.mxu0 }
  0xe6   :  { %v335_v56 = vpop.f32.mrf.mxu1  ;;  %v645_v57 = vadd.f32 %v644_v54, %v643_v53 }
  0xe7   :  { %v646_v58 = vpop.f32.mrf.mxu0 }
  0xe8   :  { %v337_v59 = vpop.f32.mrf.mxu1  ;;  %v296_v60 = vadd.f32 %v645_v57, %v582_v55 }
  0xe9   :  { %v647_v61 = vpop.f32.mrf.mxu0 }
  0xea   :  { %v338_v62 = vpop.f32.mrf.mxu1  ;;  %v336_v63 = vadd.f32 %v335_v56, %v296_v60 }
  0xec   :  { %v339_v0 = vpop.f32.mrf.mxu1  ;;  %v341_v1 = vmax.f32 %v336_v63, 0.0 }
  0xee   :  { %v342_v2 = vpack.c.bf16 %v341_v1, %v341_v1 }
  0xf0   :  { %684 = vmatmul.mubr.bf16.vlgmr.msra.gmra.mxu0 %v342_v2 }
 0x1b0   :  { %v448_v6 = vpop.f32.mrf.mxu0 }
 0x1b1   :  { %v449_v7 = vadd.f32 %v609_v5, %v448_v6 }
 0x1b2   :  { %v685_v8 = vpop.f32.mrf.mxu0 }
 0x1b3   :  { %v454_v9 = vmax.f32 %v449_v7, 0.0 }
 0x1b4   :  { %v451_v10 = vpop.f32.mrf.mxu0 }
 0x1b5   :  { %v455_v11 = vpack.c.bf16 %v454_v9, %v454_v9 }
 0x1b6   :  { %v686_v12 = vpop.f32.mrf.mxu0 }
 0x1b7   :  { %704 = vmatmul.mubr.bf16.vlgmr.msra.gmra.mxu1 %v455_v11 }
 0x277   :  { %v561_v14 = vpop.f32.mrf.mxu1 }
 0x278   :  { %v562_v15 = vadd.f32 %v618_v13, %v561_v14 }
 0x279   :  { %v705_v16 = vpop.f32.mrf.mxu1 }
 0x27a   :  { %567 = vst [vmem:[#allocation2] sm:$0xf] %v562_v15 }
 0x27b   :  { %v564_v17 = vpop.f32.mrf.mxu1 }
 0x27c   :  { %765 = shalt.err (!%p762_p4)
}
 0x27d   :  { %577 = dma.vmem_to_hbm [thread:$0]  %s575_s17, 64, %s994_s7, [#allocation3]   ;;  %v706_v18 = vpop.f32.mrf.mxu1 }
 0x27e   :  { %774 = dma.done.wait [#allocation3], 64  }
 0x27f   :  { %775 = vsyncadd [#allocation3], 4294967232 }
 0x280   :  { %581 = vsyncpa [#allocation3], 1 }

</bundles_post_ra>
